<compile_context>
chip_gen: v5e
topology: v5e:2x2
jax: 0.10.0
libtpu: 0.0.40
codegen_flags: <defaults>
</compile_context>

<pallas_src>
import functools

import numpy as np

import jax
import jax.numpy as jnp
from jax import lax
from jax.experimental import pallas as pl
from jax.experimental.pallas import tpu as pltpu

LANE = 128  # lane width — head output is padded to a multiple of this


# -----------------------------------------------------------------------------
# Fused ViT backbone kernel (one grid step == TB images)
# -----------------------------------------------------------------------------
def _vit_fused_kernel(
    # ---- inputs ----
    patches_ref,                  # (TB*(S-1), CPP) bf16  — per-step batch block
    mask_ref,                     # (TBS, TBS) f32        — additive block-diag mask
    cls_pos0_ref,                 # (1, E) f32            — cls token + pos[0]
    pos_rest_ref,                 # (TB*(S-1), E) f32     — pos[1:] tiled per image
    patch_w_ref, patch_b_ref,     # (CPP, E) bf16 / (1, E) f32
    ln1_g_ref, ln1_b_ref,         # (D, 1, E) f32
    qkv_w_ref, qkv_b_ref,         # (D, E, 3E) bf16 / (D, 1, 3E) f32
    proj_w_ref, proj_b_ref,       # (D, E, E) bf16 / (D, 1, E) f32
    ln2_g_ref, ln2_b_ref,         # (D, 1, E) f32
    fc1_w_ref, fc1_b_ref,         # (D, E, HID) bf16 / (D, 1, HID) f32
    fc2_w_ref, fc2_b_ref,         # (D, HID, E) bf16 / (D, 1, E) f32
    lnf_g_ref, lnf_b_ref,         # (1, E) f32
    head_w_ref, head_b_ref,       # (E, NCP) bf16 / (1, NCP) f32
    # ---- output ----
    o_ref,                        # (1, TB, NCP) f32
    # ---- scratch ----
    xs_buf,                       # (TBS, E) f32
    *, depth, num_heads, head_dim, tb, seq, eps, compute_dtype):
    c = compute_dtype
    f32 = jnp.float32
    emb_dim = num_heads * head_dim
    n_patch = tb * (seq - 1)
    tbs = tb * seq

    def mm(a, w):
        # bf16 MXU inputs, f32 accumulation.
        return jnp.dot(a.astype(c), w.astype(c), preferred_element_type=f32)

    def ln(x, g, b):
        # LayerNorm entirely in f32 (VPU/EUP-friendly on all generations).
        mu = jnp.mean(x, axis=-1, keepdims=True)
        xc = x - mu
        var = jnp.mean(xc * xc, axis=-1, keepdims=True)
        return xc * lax.rsqrt(var + eps) * g + b

    scale = 1.0 / (head_dim ** 0.5)
    dimnums = (((1,), (1,)), ((), ()))        # contract last dims: q @ k^T
    mask = mask_ref[...]                      # (TBS, TBS) additive, 0 / -1e30

    # ---- patch embed + pos, assemble the per-step token slab ----
    # Row layout: [0, n_patch)       -> patch tokens, per-image contiguous
    #             [n_patch, tbs)     -> the TB cls tokens (one per image)
    # Attention is permutation-equivariant given the mask, so this ordering
    # (no interleaving) keeps the assembly to two plain stores and the final
    # cls extraction to a static row slice.
    emb = (mm(patches_ref[...], patch_w_ref[...])
           + patch_b_ref[...].astype(f32)
           + pos_rest_ref[...])                                   # (n_patch, E) f32
    xs_buf[0:n_patch, :] = emb
    xs_buf[n_patch:tbs, :] = jnp.broadcast_to(cls_pos0_ref[...], (tb, emb_dim))
    xs0 = xs_buf[...]                                             # (TBS, E) f32

    def layer(d, xs):
        # ---------------- multi-head self-attention ----------------
        h = ln(xs, ln1_g_ref[d], ln1_b_ref[d])                    # (TBS, E)
        qkv = mm(h, qkv_w_ref[d]) + qkv_b_ref[d]                  # (TBS, 3E) — ONE matmul
        heads = []
        for hh in range(num_heads):
            o_q = hh * head_dim
            qh = qkv[:, o_q:o_q + head_dim]                       # static lane slices
            kh = qkv[:, emb_dim + o_q:emb_dim + o_q + head_dim]
            vh = qkv[:, 2 * emb_dim + o_q:2 * emb_dim + o_q + head_dim]
            s = lax.dot_general(qh.astype(c), kh.astype(c), dimnums,
                                preferred_element_type=f32) * scale + mask
            s = s - jnp.max(s, axis=-1, keepdims=True)
            p = jnp.exp(s)
            p = p * pl.reciprocal(jnp.sum(p, axis=-1, keepdims=True), approx=True)
            heads.append(mm(p, vh))                               # (TBS, DH)
        attn = jnp.concatenate(heads, axis=-1)                    # (TBS, E) lane concat
        xs = xs + mm(attn, proj_w_ref[d]) + proj_b_ref[d]         # ONE proj matmul

        # ---------------- MLP ----------------
        h = ln(xs, ln2_g_ref[d], ln2_b_ref[d])
        f1 = mm(h, fc1_w_ref[d]) + fc1_b_ref[d]                   # (TBS, HID)
        # TODO(synk): PyTorch nn.GELU defaults to exact erf; tanh approx used here.
        f1 = jax.nn.gelu(f1, approximate=True)
        xs = xs + mm(f1, fc2_w_ref[d]) + fc2_b_ref[d]             # residual in-kernel
        return xs

    xs = lax.fori_loop(0, depth, layer, xs0, unroll=True)

    # Final LN on the cls rows only (LN is per-token) + lane-dense probe head.
    cls_tok = xs[n_patch:tbs, :]                                  # (TB, E)
    hf = ln(cls_tok, lnf_g_ref[...], lnf_b_ref[...])
    logits = mm(hf, head_w_ref[...]) + head_b_ref[...]            # (TB, NCP)
    o_ref[0] = logits.astype(o_ref.dtype)


# -----------------------------------------------------------------------------
# Deterministic ViT backbone parameters (synthetic, no checkpoint load)
# -----------------------------------------------------------------------------
CFG = dict(
    img_size=16,
    patch_size=8,
    in_chans=3,
    embed_dim=32,
    depth=2,
    num_heads=4,
    mlp_ratio=4,
    num_classes=10,
)


def init_params(key, cfg):
    e = cfg["embed_dim"]
    p = cfg["patch_size"]
    c = cfg["in_chans"]
    d = cfg["depth"]
    hid = cfg["mlp_ratio"] * e
    n_tok = (cfg["img_size"] // p) ** 2 + 1  # + cls token

    def nrm(k, shape, std=0.02):
        return (std * jax.random.normal(k, shape)).astype(jnp.float32)

    keys = iter(jax.random.split(key, 16))
    return {
        "patch_w": nrm(next(keys), (c * p * p, e)),
        "patch_b": jnp.zeros((e,), jnp.float32),
        "cls": nrm(next(keys), (1, 1, e)),
        "pos": nrm(next(keys), (1, n_tok, e)),
        "ln_g": jnp.ones((e,), jnp.float32),
        "ln_b": jnp.zeros((e,), jnp.float32),
        "head_w": nrm(next(keys), (e, cfg["num_classes"])),
        "head_b": jnp.zeros((cfg["num_classes"],), jnp.float32),
        # per-block params stacked along a leading depth axis
        "ln1_g": jnp.ones((d, 1, e), jnp.float32),
        "ln1_b": jnp.zeros((d, 1, e), jnp.float32),
        "qkv_w": nrm(next(keys), (d, e, 3 * e)),
        "qkv_b": jnp.zeros((d, 1, 3 * e), jnp.float32),
        "proj_w": nrm(next(keys), (d, e, e)),
        "proj_b": jnp.zeros((d, 1, e), jnp.float32),
        "ln2_g": jnp.ones((d, 1, e), jnp.float32),
        "ln2_b": jnp.zeros((d, 1, e), jnp.float32),
        "fc1_w": nrm(next(keys), (d, e, hid)),
        "fc1_b": jnp.zeros((d, 1, hid), jnp.float32),
        "fc2_w": nrm(next(keys), (d, hid, e)),
        "fc2_b": jnp.zeros((d, 1, e), jnp.float32),
    }


# -----------------------------------------------------------------------------
# Backbone forward: layout plumbing in XLA, everything else in ONE Pallas call
# -----------------------------------------------------------------------------
def vit_backbone(params, cfg, x, tb=None):
    B, C, H, W = x.shape
    p = cfg["patch_size"]
    e = cfg["embed_dim"]
    nh = cfg["num_heads"]
    dh = e // nh
    depth = cfg["depth"]
    hid = cfg["mlp_ratio"] * e
    nc = cfg["num_classes"]
    gh, gw = H // p, W // p
    sp = gh * gw                   # patch tokens per image
    S = sp + 1                     # + cls
    cpp = C * p * p
    cdt = jnp.bfloat16
    ncp = ((nc + LANE - 1) // LANE) * LANE     # lane-dense head width (=128)

    # ---- batch-block size: fill MXU sublanes but keep >=2 grid steps so both
    # of v7x's TensorCores get work (irrelevant on single-TC v5e/v6e).
    if tb is None:
        tb = max(1, min(8, -(-B // 2)))
    # round tb up so the patch-row block tiles the bf16 sublane dim (16)
    while (tb * sp) % 16 != 0:
        tb *= 2
    g = -(-B // tb)
    b_pad = g * tb
    tbs = tb * S

    # ---- layout plumbing (XLA): Conv2d-equivalent (C, ph, pw) patch flatten ----
    patches = (x.reshape(B, C, gh, p, gw, p)
                 .transpose(0, 2, 4, 1, 3, 5)
                 .reshape(B, sp, cpp))
    if b_pad != B:
        patches = jnp.concatenate(
            [patches, jnp.zeros((b_pad - B, sp, cpp), patches.dtype)], axis=0)
    patches = patches.reshape(b_pad * sp, cpp).astype(cdt)        # (B_pad*(S-1), cpp)

    pos = params["pos"][0]                                        # (S, E)
    cls_pos0 = (params["cls"][0, 0] + pos[0]).reshape(1, e)       # cls + pos[0]
    pos_rest = jnp.tile(pos[1:], (tb, 1))                         # (tb*sp, E)

    # Additive block-diagonal attention mask over the per-step token stack:
    # rows [0, tb*sp) are patch tokens (image = r // sp), rows [tb*sp, tbs)
    # are the cls tokens (image = r - tb*sp).
    img_id = np.concatenate([np.repeat(np.arange(tb), sp), np.arange(tb)])
    mask = jnp.asarray(
        np.where(img_id[:, None] == img_id[None, :], 0.0, -1e30), dtype=jnp.float32)

    # Lane-dense head: pad num_classes to 128 with zeros; slice outside.
    head_w = (jnp.zeros((e, ncp), jnp.float32)
              .at[:, :nc].set(params["head_w"]).astype(cdt))
    head_b = jnp.zeros((1, ncp), jnp.float32).at[:, :nc].set(params["head_b"][None, :])

    args = (
        patches, mask, cls_pos0, pos_rest,
        params["patch_w"].astype(cdt), params["patch_b"].reshape(1, e),
        params["ln1_g"], params["ln1_b"],
        params["qkv_w"].astype(cdt), params["qkv_b"],
        params["proj_w"].astype(cdt), params["proj_b"],
        params["ln2_g"], params["ln2_b"],
        params["fc1_w"].astype(cdt), params["fc1_b"],
        params["fc2_w"].astype(cdt), params["fc2_b"],
        params["ln_g"].reshape(1, e), params["ln_b"].reshape(1, e),
        head_w, head_b,
    )

    def resident(a):
        nd = a.ndim
        return pl.BlockSpec(a.shape, lambda b, _nd=nd: (0,) * _nd)

    in_specs = ([pl.BlockSpec((tb * sp, cpp), lambda b: (b, 0))]
                + [resident(a) for a in args[1:]])
    out_specs = pl.BlockSpec((1, tb, ncp), lambda b: (b, 0, 0))

    # Advisory cost estimate so XLA schedules the surrounding layout ops well.
    per_layer = (2 * tbs * e * 3 * e            # fused QKV
                 + 4 * tbs * tbs * e            # scores + A·V over all heads
                 + 2 * tbs * e * e              # output projection
                 + 4 * tbs * e * hid)           # fc1 + fc2
    flops = g * (2 * tb * sp * cpp * e + depth * per_layer + 2 * tb * e * ncp)
    transcendentals = g * depth * (nh * tbs * tbs + tbs * hid)
    bytes_accessed = int(sum(int(a.size) * a.dtype.itemsize for a in args)
                         + b_pad * ncp * 4)
    cost = pl.CostEstimate(flops=int(flops), transcendentals=int(transcendentals),
                           bytes_accessed=bytes_accessed)

    kernel = functools.partial(
        _vit_fused_kernel, depth=depth, num_heads=nh, head_dim=dh,
        tb=tb, seq=S, eps=1e-6, compute_dtype=cdt)

    logits_pad = pl.pallas_call(
        kernel,
        out_shape=jax.ShapeDtypeStruct((g, tb, ncp), jnp.float32),
        grid=(g,),
        in_specs=in_specs,
        out_specs=out_specs,
        scratch_shapes=[pltpu.VMEM((tbs, e), jnp.float32)],
        compiler_params=pltpu.CompilerParams(dimension_semantics=("parallel",)),
        cost_estimate=cost,
    )(*args)

    return logits_pad.reshape(b_pad, ncp)[:B, :nc]


def linear_prob_wrapper(params, cfg, x, mask_ratio=0):
    """Equivalent of LinearProbWrapper.forward: returns backbone(x).
    mask_ratio is accepted and ignored, exactly like the PyTorch module."""
    del mask_ratio
    return vit_backbone(params, cfg, x)


# -----------------------------------------------------------------------------
# Pure-JAX reference (mirrors the kernel's bf16-matmul / f32-elementwise policy)
# -----------------------------------------------------------------------------
def vit_reference(params, cfg, x):
    B, C, H, W = x.shape
    p = cfg["patch_size"]
    e = cfg["embed_dim"]
    nh = cfg["num_heads"]
    dh = e // nh
    depth = cfg["depth"]
    gh, gw = H // p, W // p
    sp = gh * gw
    cpp = C * p * p
    cdt = jnp.bfloat16
    f32 = jnp.float32

    def ln(xv, g_, b_):
        mu = jnp.mean(xv, -1, keepdims=True)
        xc = xv - mu
        var = jnp.mean(xc * xc, -1, keepdims=True)
        return xc * lax.rsqrt(var + 1e-6) * g_ + b_

    def mm(a, w):
        return jnp.einsum("...i,ij->...j", a.astype(cdt), w.astype(cdt),
                          preferred_element_type=f32)

    patches = (x.reshape(B, C, gh, p, gw, p).transpose(0, 2, 4, 1, 3, 5)
               .reshape(B, sp, cpp))
    tok = mm(patches, params["patch_w"]) + params["patch_b"]
    cls = jnp.broadcast_to(params["cls"], (B, 1, e)).astype(f32)
    xs = jnp.concatenate([cls, tok], axis=1) + params["pos"]
    for d in range(depth):
        h = ln(xs, params["ln1_g"][d], params["ln1_b"][d])
        qkv = mm(h, params["qkv_w"][d]) + params["qkv_b"][d]
        q, k, v = jnp.split(qkv, 3, axis=-1)
        q = q.reshape(B, -1, nh, dh).transpose(0, 2, 1, 3)
        k = k.reshape(B, -1, nh, dh).transpose(0, 2, 1, 3)
        v = v.reshape(B, -1, nh, dh).transpose(0, 2, 1, 3)
        s = jnp.einsum("bhqd,bhkd->bhqk", q.astype(cdt), k.astype(cdt),
                       preferred_element_type=f32) / (dh ** 0.5)
        pr = jax.nn.softmax(s, axis=-1)
        o = jnp.einsum("bhqk,bhkd->bhqd", pr.astype(cdt), v.astype(cdt),
                       preferred_element_type=f32)
        o = o.transpose(0, 2, 1, 3).reshape(B, -1, e)
        xs = xs + mm(o, params["proj_w"][d]) + params["proj_b"][d]
        h = ln(xs, params["ln2_g"][d], params["ln2_b"][d])
        f1 = jax.nn.gelu(mm(h, params["fc1_w"][d]) + params["fc1_b"][d],
                         approximate=True)
        xs = xs + mm(f1, params["fc2_w"][d]) + params["fc2_b"][d]
    hf = ln(xs, params["ln_g"], params["ln_b"])
    return mm(hf[:, 0], params["head_w"]) + params["head_b"]


# -----------------------------------------------------------------------------
if __name__ == "__main__":
    key = jax.random.PRNGKey(0)
    k_param, k_x = jax.random.split(key)

    params = init_params(k_param, CFG)
    # layout: NCHW input, matching PyTorch.
    B = 8
    x = jax.random.normal(
        k_x, (B, CFG["in_chans"], CFG["img_size"], CFG["img_size"]), jnp.float32)

    out = linear_prob_wrapper(params, CFG, x, mask_ratio=0)
    out = jax.block_until_ready(out)

    assert out.shape == (B, CFG["num_classes"]), out.shape
    assert out.dtype == jnp.float32
    assert bool(jnp.all(jnp.isfinite(out)))

    # Correctness check vs. pure-JAX reference (loose tol: bf16 matmuls + EUP
    # approximate reciprocal in the softmax denominator).
    ref = jax.block_until_ready(vit_reference(params, CFG, x))
    np.testing.assert_allclose(np.asarray(out), np.asarray(ref),
                               rtol=5e-2, atol=1e-2)

    print("KERNEL_OK")
</pallas_src>

<mosaic_0001>
module attributes {stable_mosaic.version = 11 : i64} {
  func.func @_vit_fused_kernel(%arg0: i32, %arg1: memref<16x192xbf16, #tpu.memory_space<vmem>>, %arg2: memref<20x20xf32, #tpu.memory_space<vmem>>, %arg3: memref<1x32xf32, #tpu.memory_space<vmem>>, %arg4: memref<16x32xf32, #tpu.memory_space<vmem>>, %arg5: memref<192x32xbf16, #tpu.memory_space<vmem>>, %arg6: memref<1x32xf32, #tpu.memory_space<vmem>>, %arg7: memref<2x1x32xf32, #tpu.memory_space<vmem>>, %arg8: memref<2x1x32xf32, #tpu.memory_space<vmem>>, %arg9: memref<2x32x96xbf16, #tpu.memory_space<vmem>>, %arg10: memref<2x1x96xf32, #tpu.memory_space<vmem>>, %arg11: memref<2x32x32xbf16, #tpu.memory_space<vmem>>, %arg12: memref<2x1x32xf32, #tpu.memory_space<vmem>>, %arg13: memref<2x1x32xf32, #tpu.memory_space<vmem>>, %arg14: memref<2x1x32xf32, #tpu.memory_space<vmem>>, %arg15: memref<2x32x128xbf16, #tpu.memory_space<vmem>>, %arg16: memref<2x1x128xf32, #tpu.memory_space<vmem>>, %arg17: memref<2x128x32xbf16, #tpu.memory_space<vmem>>, %arg18: memref<2x1x32xf32, #tpu.memory_space<vmem>>, %arg19: memref<1x32xf32, #tpu.memory_space<vmem>>, %arg20: memref<1x32xf32, #tpu.memory_space<vmem>>, %arg21: memref<32x128xbf16, #tpu.memory_space<vmem>>, %arg22: memref<1x128xf32, #tpu.memory_space<vmem>>, %arg23: memref<1x4x128xf32, #tpu.memory_space<vmem>>, %arg24: memref<20x32xf32, #tpu.memory_space<vmem>>) attributes {dimension_semantics = [#tpu.dimension_semantics<parallel>], iteration_bounds = array<i64: 2>, scalar_prefetch = 0 : i64, scratch_operands = 1 : i64, tpu.core_type = #tpu.core_type<tc>, window_params = [{transform_indices = @transform_0, window_bounds = array<i64: 16, 192>}, {pipeline_mode = #tpu.pipeline_mode<synchronous>, transform_indices = @transform_1, window_bounds = array<i64: 20, 20>}, {pipeline_mode = #tpu.pipeline_mode<synchronous>, transform_indices = @transform_2, window_bounds = array<i64: 1, 32>}, {pipeline_mode = #tpu.pipeline_mode<synchronous>, transform_indices = @transform_3, window_bounds = array<i64: 16, 32>}, {pipeline_mode = #tpu.pipeline_mode<synchronous>, transform_indices = @transform_4, window_bounds = array<i64: 192, 32>}, {pipeline_mode = #tpu.pipeline_mode<synchronous>, transform_indices = @transform_5, window_bounds = array<i64: 1, 32>}, {pipeline_mode = #tpu.pipeline_mode<synchronous>, transform_indices = @transform_6, window_bounds = array<i64: 2, 1, 32>}, {pipeline_mode = #tpu.pipeline_mode<synchronous>, transform_indices = @transform_7, window_bounds = array<i64: 2, 1, 32>}, {pipeline_mode = #tpu.pipeline_mode<synchronous>, transform_indices = @transform_8, window_bounds = array<i64: 2, 32, 96>}, {pipeline_mode = #tpu.pipeline_mode<synchronous>, transform_indices = @transform_9, window_bounds = array<i64: 2, 1, 96>}, {pipeline_mode = #tpu.pipeline_mode<synchronous>, transform_indices = @transform_10, window_bounds = array<i64: 2, 32, 32>}, {pipeline_mode = #tpu.pipeline_mode<synchronous>, transform_indices = @transform_11, window_bounds = array<i64: 2, 1, 32>}, {pipeline_mode = #tpu.pipeline_mode<synchronous>, transform_indices = @transform_12, window_bounds = array<i64: 2, 1, 32>}, {pipeline_mode = #tpu.pipeline_mode<synchronous>, transform_indices = @transform_13, window_bounds = array<i64: 2, 1, 32>}, {pipeline_mode = #tpu.pipeline_mode<synchronous>, transform_indices = @transform_14, window_bounds = array<i64: 2, 32, 128>}, {pipeline_mode = #tpu.pipeline_mode<synchronous>, transform_indices = @transform_15, window_bounds = array<i64: 2, 1, 128>}, {pipeline_mode = #tpu.pipeline_mode<synchronous>, transform_indices = @transform_16, window_bounds = array<i64: 2, 128, 32>}, {pipeline_mode = #tpu.pipeline_mode<synchronous>, transform_indices = @transform_17, window_bounds = array<i64: 2, 1, 32>}, {pipeline_mode = #tpu.pipeline_mode<synchronous>, transform_indices = @transform_18, window_bounds = array<i64: 1, 32>}, {pipeline_mode = #tpu.pipeline_mode<synchronous>, transform_indices = @transform_19, window_bounds = array<i64: 1, 32>}, {pipeline_mode = #tpu.pipeline_mode<synchronous>, transform_indices = @transform_20, window_bounds = array<i64: 32, 128>}, {pipeline_mode = #tpu.pipeline_mode<synchronous>, transform_indices = @transform_21, window_bounds = array<i64: 1, 128>}, {transform_indices = @transform_22, window_bounds = array<i64: 1, 4, 128>}]} {
    %c0 = arith.constant 0 : index
    %c0_0 = arith.constant 0 : index
    %0 = vector.load %arg2[%c0, %c0_0] : memref<20x20xf32, #tpu.memory_space<vmem>>, vector<20x20xf32>
    %c0_1 = arith.constant 0 : index
    %c0_2 = arith.constant 0 : index
    %1 = vector.load %arg1[%c0_1, %c0_2] : memref<16x192xbf16, #tpu.memory_space<vmem>>, vector<16x192xbf16>
    %c0_3 = arith.constant 0 : index
    %c0_4 = arith.constant 0 : index
    %2 = vector.load %arg5[%c0_3, %c0_4] : memref<192x32xbf16, #tpu.memory_space<vmem>>, vector<192x32xbf16>
    %cst = arith.constant dense<0.000000e+00> : vector<16x32xf32>
    %3 = tpu.matmul %1, %2, %cst {dimension_numbers = #tpu.dot_dimension_numbers<[1], [0], [0], [1], [0, 0, 1, 1], [], []>} : vector<16x192xbf16>, vector<192x32xbf16>, vector<16x32xf32> -> vector<16x32xf32>
    %c0_5 = arith.constant 0 : index
    %c0_6 = arith.constant 0 : index
    %4 = vector.load %arg6[%c0_5, %c0_6] : memref<1x32xf32, #tpu.memory_space<vmem>>, vector<1x32xf32>
    %5 = vector.broadcast %4 : vector<1x32xf32> to vector<16x32xf32>
    %6 = arith.addf %3, %5 : vector<16x32xf32>
    %c0_7 = arith.constant 0 : index
    %c0_8 = arith.constant 0 : index
    %7 = vector.load %arg4[%c0_7, %c0_8] : memref<16x32xf32, #tpu.memory_space<vmem>>, vector<16x32xf32>
    %8 = arith.addf %6, %7 : vector<16x32xf32>
    %c0_9 = arith.constant 0 : index
    %c0_10 = arith.constant 0 : index
    %9 = vector.load %arg24[%c0_9, %c0_10] : memref<20x32xf32, #tpu.memory_space<vmem>>, vector<16x32xf32>
    tpu.vector_store %arg24[%c0_9, %c0_10], %8 {strides = array<i32>} : memref<20x32xf32, #tpu.memory_space<vmem>>, vector<16x32xf32>,
    %c0_11 = arith.constant 0 : index
    %c0_12 = arith.constant 0 : index
    %10 = vector.load %arg3[%c0_11, %c0_12] : memref<1x32xf32, #tpu.memory_space<vmem>>, vector<1x32xf32>
    %11 = vector.shape_cast %10 : vector<1x32xf32> to vector<1x32xf32>
    %12 = vector.broadcast %11 : vector<1x32xf32> to vector<4x32xf32>
    %c16 = arith.constant 16 : index
    %c0_13 = arith.constant 0 : index
    %13 = vector.load %arg24[%c16, %c0_13] : memref<20x32xf32, #tpu.memory_space<vmem>>, vector<4x32xf32>
    tpu.vector_store %arg24[%c16, %c0_13], %12 {strides = array<i32>} : memref<20x32xf32, #tpu.memory_space<vmem>>, vector<4x32xf32>,
    %c0_14 = arith.constant 0 : index
    %c0_15 = arith.constant 0 : index
    %14 = vector.load %arg24[%c0_14, %c0_15] : memref<20x32xf32, #tpu.memory_space<vmem>>, vector<20x32xf32>
    %c0_i32 = arith.constant 0 : i32
    %15 = arith.index_cast %c0_i32 : i32 to index
    %c0_16 = arith.constant 0 : index
    %c0_17 = arith.constant 0 : index
    %16 = vector.load %arg7[%15, %c0_16, %c0_17] : memref<2x1x32xf32, #tpu.memory_space<vmem>>, vector<1x1x32xf32>
    %17 = vector.shape_cast %16 : vector<1x1x32xf32> to vector<1x32xf32>
    %18 = arith.index_cast %c0_i32 : i32 to index
    %c0_18 = arith.constant 0 : index
    %c0_19 = arith.constant 0 : index
    %19 = vector.load %arg8[%18, %c0_18, %c0_19] : memref<2x1x32xf32, #tpu.memory_space<vmem>>, vector<1x1x32xf32>
    %20 = vector.shape_cast %19 : vector<1x1x32xf32> to vector<1x32xf32>
    %cst_20 = arith.constant dense<0.000000e+00> : vector<20xf32>
    %21 = vector.multi_reduction <add>, %14, %cst_20 [1] : vector<20x32xf32> to vector<20xf32>
    %22 = vector.shape_cast %21 : vector<20xf32> to vector<20x1xf32>
    %cst_21 = arith.constant 3.200000e+01 : f32
    %23 = vector.broadcast %cst_21 : f32 to vector<20x1xf32>
    %24 = arith.divf %22, %23 : vector<20x1xf32>
    %25 = vector.broadcast %24 : vector<20x1xf32> to vector<20x32xf32>
    %26 = arith.subf %14, %25 : vector<20x32xf32>
    %27 = arith.mulf %26, %26 : vector<20x32xf32>
    %cst_22 = arith.constant dense<0.000000e+00> : vector<20xf32>
    %28 = vector.multi_reduction <add>, %27, %cst_22 [1] : vector<20x32xf32> to vector<20xf32>
    %29 = vector.shape_cast %28 : vector<20xf32> to vector<20x1xf32>
    %cst_23 = arith.constant 3.200000e+01 : f32
    %30 = vector.broadcast %cst_23 : f32 to vector<20x1xf32>
    %31 = arith.divf %29, %30 : vector<20x1xf32>
    %cst_24 = arith.constant 9.99999997E-7 : f32
    %32 = vector.broadcast %cst_24 : f32 to vector<20x1xf32>
    %33 = arith.addf %31, %32 : vector<20x1xf32>
    %34 = math.rsqrt %33 : vector<20x1xf32>
    %35 = vector.broadcast %34 : vector<20x1xf32> to vector<20x32xf32>
    %36 = arith.mulf %26, %35 : vector<20x32xf32>
    %37 = vector.broadcast %17 : vector<1x32xf32> to vector<20x32xf32>
    %38 = arith.mulf %36, %37 : vector<20x32xf32>
    %39 = vector.broadcast %20 : vector<1x32xf32> to vector<20x32xf32>
    %40 = arith.addf %38, %39 : vector<20x32xf32>
    %41 = arith.index_cast %c0_i32 : i32 to index
    %c0_25 = arith.constant 0 : index
    %c0_26 = arith.constant 0 : index
    %42 = vector.load %arg9[%41, %c0_25, %c0_26] : memref<2x32x96xbf16, #tpu.memory_space<vmem>>, vector<1x32x96xbf16>
    %43 = vector.shape_cast %42 : vector<1x32x96xbf16> to vector<32x96xbf16>
    %44 = arith.truncf %40 : vector<20x32xf32> to vector<20x32xbf16>
    %cst_27 = arith.constant dense<0.000000e+00> : vector<20x96xf32>
    %45 = tpu.matmul %44, %43, %cst_27 {dimension_numbers = #tpu.dot_dimension_numbers<[1], [0], [0], [1], [0, 0, 1, 1], [], []>} : vector<20x32xbf16>, vector<32x96xbf16>, vector<20x96xf32> -> vector<20x96xf32>
    %46 = arith.index_cast %c0_i32 : i32 to index
    %c0_28 = arith.constant 0 : index
    %c0_29 = arith.constant 0 : index
    %47 = vector.load %arg10[%46, %c0_28, %c0_29] : memref<2x1x96xf32, #tpu.memory_space<vmem>>, vector<1x1x96xf32>
    %48 = vector.shape_cast %47 : vector<1x1x96xf32> to vector<1x96xf32>
    %49 = vector.broadcast %48 : vector<1x96xf32> to vector<20x96xf32>
    %50 = arith.addf %45, %49 : vector<20x96xf32>
    %51 = vector.extract_strided_slice %50 {offsets = [0, 0], sizes = [20, 8], strides = [1, 1]} : vector<20x96xf32> to vector<20x8xf32>
    %52 = vector.extract_strided_slice %50 {offsets = [0, 32], sizes = [20, 8], strides = [1, 1]} : vector<20x96xf32> to vector<20x8xf32>
    %53 = vector.extract_strided_slice %50 {offsets = [0, 64], sizes = [20, 8], strides = [1, 1]} : vector<20x96xf32> to vector<20x8xf32>
    %54 = arith.truncf %51 : vector<20x8xf32> to vector<20x8xbf16>
    %55 = arith.truncf %52 : vector<20x8xf32> to vector<20x8xbf16>
    %cst_30 = arith.constant dense<0.000000e+00> : vector<20x20xf32>
    %56 = tpu.matmul %54, %55, %cst_30 {dimension_numbers = #tpu.dot_dimension_numbers<[1], [1], [0], [0], [0, 0, 1, 0], [], []>} : vector<20x8xbf16>, vector<20x8xbf16>, vector<20x20xf32> -> vector<20x20xf32>
    %cst_31 = arith.constant 0.353553385 : f32
    %57 = vector.broadcast %cst_31 : f32 to vector<20x20xf32>
    %58 = arith.mulf %56, %57 : vector<20x20xf32>
    %59 = arith.addf %58, %0 : vector<20x20xf32>
    %cst_32 = arith.constant dense<0xFF800000> : vector<20xf32>
    %60 = vector.multi_reduction <maximumf>, %59, %cst_32 [1] : vector<20x20xf32> to vector<20xf32>
    %61 = vector.shape_cast %60 : vector<20xf32> to vector<20x1xf32>
    %62 = vector.broadcast %61 : vector<20x1xf32> to vector<20x20xf32>
    %63 = arith.subf %59, %62 : vector<20x20xf32>
    %64 = math.exp %63 : vector<20x20xf32>
    %cst_33 = arith.constant dense<0.000000e+00> : vector<20xf32>
    %65 = vector.multi_reduction <add>, %64, %cst_33 [1] : vector<20x20xf32> to vector<20xf32>
    %66 = vector.shape_cast %65 : vector<20xf32> to vector<20x1xf32>
    %67 = tpu.reciprocal %66 {approx = true} : vector<20x1xf32> -> vector<20x1xf32>
    %68 = vector.broadcast %67 : vector<20x1xf32> to vector<20x20xf32>
    %69 = arith.mulf %64, %68 : vector<20x20xf32>
    %70 = arith.truncf %69 : vector<20x20xf32> to vector<20x20xbf16>
    %71 = arith.truncf %53 : vector<20x8xf32> to vector<20x8xbf16>
    %cst_34 = arith.constant dense<0.000000e+00> : vector<20x8xf32>
    %72 = tpu.matmul %70, %71, %cst_34 {dimension_numbers = #tpu.dot_dimension_numbers<[1], [0], [0], [1], [0, 0, 1, 1], [], []>} : vector<20x20xbf16>, vector<20x8xbf16>, vector<20x8xf32> -> vector<20x8xf32>
    %73 = vector.extract_strided_slice %50 {offsets = [0, 8], sizes = [20, 8], strides = [1, 1]} : vector<20x96xf32> to vector<20x8xf32>
    %74 = vector.extract_strided_slice %50 {offsets = [0, 40], sizes = [20, 8], strides = [1, 1]} : vector<20x96xf32> to vector<20x8xf32>
    %75 = vector.extract_strided_slice %50 {offsets = [0, 72], sizes = [20, 8], strides = [1, 1]} : vector<20x96xf32> to vector<20x8xf32>
    %76 = arith.truncf %73 : vector<20x8xf32> to vector<20x8xbf16>
    %77 = arith.truncf %74 : vector<20x8xf32> to vector<20x8xbf16>
    %cst_35 = arith.constant dense<0.000000e+00> : vector<20x20xf32>
    %78 = tpu.matmul %76, %77, %cst_35 {dimension_numbers = #tpu.dot_dimension_numbers<[1], [1], [0], [0], [0, 0, 1, 0], [], []>} : vector<20x8xbf16>, vector<20x8xbf16>, vector<20x20xf32> -> vector<20x20xf32>
    %cst_36 = arith.constant 0.353553385 : f32
    %79 = vector.broadcast %cst_36 : f32 to vector<20x20xf32>
    %80 = arith.mulf %78, %79 : vector<20x20xf32>
    %81 = arith.addf %80, %0 : vector<20x20xf32>
    %cst_37 = arith.constant dense<0xFF800000> : vector<20xf32>
    %82 = vector.multi_reduction <maximumf>, %81, %cst_37 [1] : vector<20x20xf32> to vector<20xf32>
    %83 = vector.shape_cast %82 : vector<20xf32> to vector<20x1xf32>
    %84 = vector.broadcast %83 : vector<20x1xf32> to vector<20x20xf32>
    %85 = arith.subf %81, %84 : vector<20x20xf32>
    %86 = math.exp %85 : vector<20x20xf32>
    %cst_38 = arith.constant dense<0.000000e+00> : vector<20xf32>
    %87 = vector.multi_reduction <add>, %86, %cst_38 [1] : vector<20x20xf32> to vector<20xf32>
    %88 = vector.shape_cast %87 : vector<20xf32> to vector<20x1xf32>
    %89 = tpu.reciprocal %88 {approx = true} : vector<20x1xf32> -> vector<20x1xf32>
    %90 = vector.broadcast %89 : vector<20x1xf32> to vector<20x20xf32>
    %91 = arith.mulf %86, %90 : vector<20x20xf32>
    %92 = arith.truncf %91 : vector<20x20xf32> to vector<20x20xbf16>
    %93 = arith.truncf %75 : vector<20x8xf32> to vector<20x8xbf16>
    %cst_39 = arith.constant dense<0.000000e+00> : vector<20x8xf32>
    %94 = tpu.matmul %92, %93, %cst_39 {dimension_numbers = #tpu.dot_dimension_numbers<[1], [0], [0], [1], [0, 0, 1, 1], [], []>} : vector<20x20xbf16>, vector<20x8xbf16>, vector<20x8xf32> -> vector<20x8xf32>
    %95 = vector.extract_strided_slice %50 {offsets = [0, 16], sizes = [20, 8], strides = [1, 1]} : vector<20x96xf32> to vector<20x8xf32>
    %96 = vector.extract_strided_slice %50 {offsets = [0, 48], sizes = [20, 8], strides = [1, 1]} : vector<20x96xf32> to vector<20x8xf32>
    %97 = vector.extract_strided_slice %50 {offsets = [0, 80], sizes = [20, 8], strides = [1, 1]} : vector<20x96xf32> to vector<20x8xf32>
    %98 = arith.truncf %95 : vector<20x8xf32> to vector<20x8xbf16>
    %99 = arith.truncf %96 : vector<20x8xf32> to vector<20x8xbf16>
    %cst_40 = arith.constant dense<0.000000e+00> : vector<20x20xf32>
    %100 = tpu.matmul %98, %99, %cst_40 {dimension_numbers = #tpu.dot_dimension_numbers<[1], [1], [0], [0], [0, 0, 1, 0], [], []>} : vector<20x8xbf16>, vector<20x8xbf16>, vector<20x20xf32> -> vector<20x20xf32>
    %cst_41 = arith.constant 0.353553385 : f32
    %101 = vector.broadcast %cst_41 : f32 to vector<20x20xf32>
    %102 = arith.mulf %100, %101 : vector<20x20xf32>
    %103 = arith.addf %102, %0 : vector<20x20xf32>
    %cst_42 = arith.constant dense<0xFF800000> : vector<20xf32>
    %104 = vector.multi_reduction <maximumf>, %103, %cst_42 [1] : vector<20x20xf32> to vector<20xf32>
    %105 = vector.shape_cast %104 : vector<20xf32> to vector<20x1xf32>
    %106 = vector.broadcast %105 : vector<20x1xf32> to vector<20x20xf32>
    %107 = arith.subf %103, %106 : vector<20x20xf32>
    %108 = math.exp %107 : vector<20x20xf32>
    %cst_43 = arith.constant dense<0.000000e+00> : vector<20xf32>
    %109 = vector.multi_reduction <add>, %108, %cst_43 [1] : vector<20x20xf32> to vector<20xf32>
    %110 = vector.shape_cast %109 : vector<20xf32> to vector<20x1xf32>
    %111 = tpu.reciprocal %110 {approx = true} : vector<20x1xf32> -> vector<20x1xf32>
    %112 = vector.broadcast %111 : vector<20x1xf32> to vector<20x20xf32>
    %113 = arith.mulf %108, %112 : vector<20x20xf32>
    %114 = arith.truncf %113 : vector<20x20xf32> to vector<20x20xbf16>
    %115 = arith.truncf %97 : vector<20x8xf32> to vector<20x8xbf16>
    %cst_44 = arith.constant dense<0.000000e+00> : vector<20x8xf32>
    %116 = tpu.matmul %114, %115, %cst_44 {dimension_numbers = #tpu.dot_dimension_numbers<[1], [0], [0], [1], [0, 0, 1, 1], [], []>} : vector<20x20xbf16>, vector<20x8xbf16>, vector<20x8xf32> -> vector<20x8xf32>
    %117 = vector.extract_strided_slice %50 {offsets = [0, 24], sizes = [20, 8], strides = [1, 1]} : vector<20x96xf32> to vector<20x8xf32>
    %118 = vector.extract_strided_slice %50 {offsets = [0, 56], sizes = [20, 8], strides = [1, 1]} : vector<20x96xf32> to vector<20x8xf32>
    %119 = vector.extract_strided_slice %50 {offsets = [0, 88], sizes = [20, 8], strides = [1, 1]} : vector<20x96xf32> to vector<20x8xf32>
    %120 = arith.truncf %117 : vector<20x8xf32> to vector<20x8xbf16>
    %121 = arith.truncf %118 : vector<20x8xf32> to vector<20x8xbf16>
    %cst_45 = arith.constant dense<0.000000e+00> : vector<20x20xf32>
    %122 = tpu.matmul %120, %121, %cst_45 {dimension_numbers = #tpu.dot_dimension_numbers<[1], [1], [0], [0], [0, 0, 1, 0], [], []>} : vector<20x8xbf16>, vector<20x8xbf16>, vector<20x20xf32> -> vector<20x20xf32>
    %cst_46 = arith.constant 0.353553385 : f32
    %123 = vector.broadcast %cst_46 : f32 to vector<20x20xf32>
    %124 = arith.mulf %122, %123 : vector<20x20xf32>
    %125 = arith.addf %124, %0 : vector<20x20xf32>
    %cst_47 = arith.constant dense<0xFF800000> : vector<20xf32>
    %126 = vector.multi_reduction <maximumf>, %125, %cst_47 [1] : vector<20x20xf32> to vector<20xf32>
    %127 = vector.shape_cast %126 : vector<20xf32> to vector<20x1xf32>
    %128 = vector.broadcast %127 : vector<20x1xf32> to vector<20x20xf32>
    %129 = arith.subf %125, %128 : vector<20x20xf32>
    %130 = math.exp %129 : vector<20x20xf32>
    %cst_48 = arith.constant dense<0.000000e+00> : vector<20xf32>
    %131 = vector.multi_reduction <add>, %130, %cst_48 [1] : vector<20x20xf32> to vector<20xf32>
    %132 = vector.shape_cast %131 : vector<20xf32> to vector<20x1xf32>
    %133 = tpu.reciprocal %132 {approx = true} : vector<20x1xf32> -> vector<20x1xf32>
    %134 = vector.broadcast %133 : vector<20x1xf32> to vector<20x20xf32>
    %135 = arith.mulf %130, %134 : vector<20x20xf32>
    %136 = arith.truncf %135 : vector<20x20xf32> to vector<20x20xbf16>
    %137 = arith.truncf %119 : vector<20x8xf32> to vector<20x8xbf16>
    %cst_49 = arith.constant dense<0.000000e+00> : vector<20x8xf32>
    %138 = tpu.matmul %136, %137, %cst_49 {dimension_numbers = #tpu.dot_dimension_numbers<[1], [0], [0], [1], [0, 0, 1, 1], [], []>} : vector<20x20xbf16>, vector<20x8xbf16>, vector<20x8xf32> -> vector<20x8xf32>
    %139 = tpu.concatenate %72, %94, %116, %138 in 1 : vector<20x8xf32>, vector<20x8xf32>, vector<20x8xf32>, vector<20x8xf32> -> vector<20x32xf32>
    %140 = arith.index_cast %c0_i32 : i32 to index
    %c0_50 = arith.constant 0 : index
    %c0_51 = arith.constant 0 : index
    %141 = vector.load %arg11[%140, %c0_50, %c0_51] : memref<2x32x32xbf16, #tpu.memory_space<vmem>>, vector<1x32x32xbf16>
    %142 = vector.shape_cast %141 : vector<1x32x32xbf16> to vector<32x32xbf16>
    %143 = arith.truncf %139 : vector<20x32xf32> to vector<20x32xbf16>
    %cst_52 = arith.constant dense<0.000000e+00> : vector<20x32xf32>
    %144 = tpu.matmul %143, %142, %cst_52 {dimension_numbers = #tpu.dot_dimension_numbers<[1], [0], [0], [1], [0, 0, 1, 1], [], []>} : vector<20x32xbf16>, vector<32x32xbf16>, vector<20x32xf32> -> vector<20x32xf32>
    %145 = arith.addf %14, %144 : vector<20x32xf32>
    %146 = arith.index_cast %c0_i32 : i32 to index
    %c0_53 = arith.constant 0 : index
    %c0_54 = arith.constant 0 : index
    %147 = vector.load %arg12[%146, %c0_53, %c0_54] : memref<2x1x32xf32, #tpu.memory_space<vmem>>, vector<1x1x32xf32>
    %148 = vector.shape_cast %147 : vector<1x1x32xf32> to vector<1x32xf32>
    %149 = vector.broadcast %148 : vector<1x32xf32> to vector<20x32xf32>
    %150 = arith.addf %145, %149 : vector<20x32xf32>
    %151 = arith.index_cast %c0_i32 : i32 to index
    %c0_55 = arith.constant 0 : index
    %c0_56 = arith.constant 0 : index
    %152 = vector.load %arg13[%151, %c0_55, %c0_56] : memref<2x1x32xf32, #tpu.memory_space<vmem>>, vector<1x1x32xf32>
    %153 = vector.shape_cast %152 : vector<1x1x32xf32> to vector<1x32xf32>
    %154 = arith.index_cast %c0_i32 : i32 to index
    %c0_57 = arith.constant 0 : index
    %c0_58 = arith.constant 0 : index
    %155 = vector.load %arg14[%154, %c0_57, %c0_58] : memref<2x1x32xf32, #tpu.memory_space<vmem>>, vector<1x1x32xf32>
    %156 = vector.shape_cast %155 : vector<1x1x32xf32> to vector<1x32xf32>
    %cst_59 = arith.constant dense<0.000000e+00> : vector<20xf32>
    %157 = vector.multi_reduction <add>, %150, %cst_59 [1] : vector<20x32xf32> to vector<20xf32>
    %158 = vector.shape_cast %157 : vector<20xf32> to vector<20x1xf32>
    %cst_60 = arith.constant 3.200000e+01 : f32
    %159 = vector.broadcast %cst_60 : f32 to vector<20x1xf32>
    %160 = arith.divf %158, %159 : vector<20x1xf32>
    %161 = vector.broadcast %160 : vector<20x1xf32> to vector<20x32xf32>
    %162 = arith.subf %150, %161 : vector<20x32xf32>
    %163 = arith.mulf %162, %162 : vector<20x32xf32>
    %cst_61 = arith.constant dense<0.000000e+00> : vector<20xf32>
    %164 = vector.multi_reduction <add>, %163, %cst_61 [1] : vector<20x32xf32> to vector<20xf32>
    %165 = vector.shape_cast %164 : vector<20xf32> to vector<20x1xf32>
    %cst_62 = arith.constant 3.200000e+01 : f32
    %166 = vector.broadcast %cst_62 : f32 to vector<20x1xf32>
    %167 = arith.divf %165, %166 : vector<20x1xf32>
    %cst_63 = arith.constant 9.99999997E-7 : f32
    %168 = vector.broadcast %cst_63 : f32 to vector<20x1xf32>
    %169 = arith.addf %167, %168 : vector<20x1xf32>
    %170 = math.rsqrt %169 : vector<20x1xf32>
    %171 = vector.broadcast %170 : vector<20x1xf32> to vector<20x32xf32>
    %172 = arith.mulf %162, %171 : vector<20x32xf32>
    %173 = vector.broadcast %153 : vector<1x32xf32> to vector<20x32xf32>
    %174 = arith.mulf %172, %173 : vector<20x32xf32>
    %175 = vector.broadcast %156 : vector<1x32xf32> to vector<20x32xf32>
    %176 = arith.addf %174, %175 : vector<20x32xf32>
    %177 = arith.index_cast %c0_i32 : i32 to index
    %c0_64 = arith.constant 0 : index
    %c0_65 = arith.constant 0 : index
    %178 = vector.load %arg15[%177, %c0_64, %c0_65] : memref<2x32x128xbf16, #tpu.memory_space<vmem>>, vector<1x32x128xbf16>
    %179 = vector.shape_cast %178 : vector<1x32x128xbf16> to vector<32x128xbf16>
    %180 = arith.truncf %176 : vector<20x32xf32> to vector<20x32xbf16>
    %cst_66 = arith.constant dense<0.000000e+00> : vector<20x128xf32>
    %181 = tpu.matmul %180, %179, %cst_66 {dimension_numbers = #tpu.dot_dimension_numbers<[1], [0], [0], [1], [0, 0, 1, 1], [], []>} : vector<20x32xbf16>, vector<32x128xbf16>, vector<20x128xf32> -> vector<20x128xf32>
    %182 = arith.index_cast %c0_i32 : i32 to index
    %c0_67 = arith.constant 0 : index
    %c0_68 = arith.constant 0 : index
    %183 = vector.load %arg16[%182, %c0_67, %c0_68] : memref<2x1x128xf32, #tpu.memory_space<vmem>>, vector<1x1x128xf32>
    %184 = vector.shape_cast %183 : vector<1x1x128xf32> to vector<1x128xf32>
    %185 = vector.broadcast %184 : vector<1x128xf32> to vector<20x128xf32>
    %186 = arith.addf %181, %185 : vector<20x128xf32>
    %187 = arith.mulf %186, %186 : vector<20x128xf32>
    %188 = arith.mulf %186, %187 : vector<20x128xf32>
    %cst_69 = arith.constant 4.471500e-02 : f32
    %189 = vector.broadcast %cst_69 : f32 to vector<20x128xf32>
    %190 = arith.mulf %189, %188 : vector<20x128xf32>
    %191 = arith.addf %186, %190 : vector<20x128xf32>
    %cst_70 = arith.constant 0.797884583 : f32
    %192 = vector.broadcast %cst_70 : f32 to vector<20x128xf32>
    %193 = arith.mulf %192, %191 : vector<20x128xf32>
    %194 = math.tanh %193 : vector<20x128xf32>
    %cst_71 = arith.constant 1.000000e+00 : f32
    %195 = vector.broadcast %cst_71 : f32 to vector<20x128xf32>
    %196 = arith.addf %195, %194 : vector<20x128xf32>
    %cst_72 = arith.constant 5.000000e-01 : f32
    %197 = vector.broadcast %cst_72 : f32 to vector<20x128xf32>
    %198 = arith.mulf %197, %196 : vector<20x128xf32>
    %199 = arith.mulf %186, %198 : vector<20x128xf32>
    %200 = arith.index_cast %c0_i32 : i32 to index
    %c0_73 = arith.constant 0 : index
    %c0_74 = arith.constant 0 : index
    %201 = vector.load %arg17[%200, %c0_73, %c0_74] : memref<2x128x32xbf16, #tpu.memory_space<vmem>>, vector<1x128x32xbf16>
    %202 = vector.shape_cast %201 : vector<1x128x32xbf16> to vector<128x32xbf16>
    %203 = arith.truncf %199 : vector<20x128xf32> to vector<20x128xbf16>
    %cst_75 = arith.constant dense<0.000000e+00> : vector<20x32xf32>
    %204 = tpu.matmul %203, %202, %cst_75 {dimension_numbers = #tpu.dot_dimension_numbers<[1], [0], [0], [1], [0, 0, 1, 1], [], []>} : vector<20x128xbf16>, vector<128x32xbf16>, vector<20x32xf32> -> vector<20x32xf32>
    %205 = arith.addf %150, %204 : vector<20x32xf32>
    %206 = arith.index_cast %c0_i32 : i32 to index
    %c0_76 = arith.constant 0 : index
    %c0_77 = arith.constant 0 : index
    %207 = vector.load %arg18[%206, %c0_76, %c0_77] : memref<2x1x32xf32, #tpu.memory_space<vmem>>, vector<1x1x32xf32>
    %208 = vector.shape_cast %207 : vector<1x1x32xf32> to vector<1x32xf32>
    %209 = vector.broadcast %208 : vector<1x32xf32> to vector<20x32xf32>
    %210 = arith.addf %205, %209 : vector<20x32xf32>
    %c1_i32 = arith.constant 1 : i32
    %211 = arith.index_cast %c1_i32 : i32 to index
    %c0_78 = arith.constant 0 : index
    %c0_79 = arith.constant 0 : index
    %212 = vector.load %arg7[%211, %c0_78, %c0_79] : memref<2x1x32xf32, #tpu.memory_space<vmem>>, vector<1x1x32xf32>
    %213 = vector.shape_cast %212 : vector<1x1x32xf32> to vector<1x32xf32>
    %214 = arith.index_cast %c1_i32 : i32 to index
    %c0_80 = arith.constant 0 : index
    %c0_81 = arith.constant 0 : index
    %215 = vector.load %arg8[%214, %c0_80, %c0_81] : memref<2x1x32xf32, #tpu.memory_space<vmem>>, vector<1x1x32xf32>
    %216 = vector.shape_cast %215 : vector<1x1x32xf32> to vector<1x32xf32>
    %cst_82 = arith.constant dense<0.000000e+00> : vector<20xf32>
    %217 = vector.multi_reduction <add>, %210, %cst_82 [1] : vector<20x32xf32> to vector<20xf32>
    %218 = vector.shape_cast %217 : vector<20xf32> to vector<20x1xf32>
    %cst_83 = arith.constant 3.200000e+01 : f32
    %219 = vector.broadcast %cst_83 : f32 to vector<20x1xf32>
    %220 = arith.divf %218, %219 : vector<20x1xf32>
    %221 = vector.broadcast %220 : vector<20x1xf32> to vector<20x32xf32>
    %222 = arith.subf %210, %221 : vector<20x32xf32>
    %223 = arith.mulf %222, %222 : vector<20x32xf32>
    %cst_84 = arith.constant dense<0.000000e+00> : vector<20xf32>
    %224 = vector.multi_reduction <add>, %223, %cst_84 [1] : vector<20x32xf32> to vector<20xf32>
    %225 = vector.shape_cast %224 : vector<20xf32> to vector<20x1xf32>
    %cst_85 = arith.constant 3.200000e+01 : f32
    %226 = vector.broadcast %cst_85 : f32 to vector<20x1xf32>
    %227 = arith.divf %225, %226 : vector<20x1xf32>
    %cst_86 = arith.constant 9.99999997E-7 : f32
    %228 = vector.broadcast %cst_86 : f32 to vector<20x1xf32>
    %229 = arith.addf %227, %228 : vector<20x1xf32>
    %230 = math.rsqrt %229 : vector<20x1xf32>
    %231 = vector.broadcast %230 : vector<20x1xf32> to vector<20x32xf32>
    %232 = arith.mulf %222, %231 : vector<20x32xf32>
    %233 = vector.broadcast %213 : vector<1x32xf32> to vector<20x32xf32>
    %234 = arith.mulf %232, %233 : vector<20x32xf32>
    %235 = vector.broadcast %216 : vector<1x32xf32> to vector<20x32xf32>
    %236 = arith.addf %234, %235 : vector<20x32xf32>
    %237 = arith.index_cast %c1_i32 : i32 to index
    %c0_87 = arith.constant 0 : index
    %c0_88 = arith.constant 0 : index
    %238 = vector.load %arg9[%237, %c0_87, %c0_88] : memref<2x32x96xbf16, #tpu.memory_space<vmem>>, vector<1x32x96xbf16>
    %239 = vector.shape_cast %238 : vector<1x32x96xbf16> to vector<32x96xbf16>
    %240 = arith.truncf %236 : vector<20x32xf32> to vector<20x32xbf16>
    %cst_89 = arith.constant dense<0.000000e+00> : vector<20x96xf32>
    %241 = tpu.matmul %240, %239, %cst_89 {dimension_numbers = #tpu.dot_dimension_numbers<[1], [0], [0], [1], [0, 0, 1, 1], [], []>} : vector<20x32xbf16>, vector<32x96xbf16>, vector<20x96xf32> -> vector<20x96xf32>
    %242 = arith.index_cast %c1_i32 : i32 to index
    %c0_90 = arith.constant 0 : index
    %c0_91 = arith.constant 0 : index
    %243 = vector.load %arg10[%242, %c0_90, %c0_91] : memref<2x1x96xf32, #tpu.memory_space<vmem>>, vector<1x1x96xf32>
    %244 = vector.shape_cast %243 : vector<1x1x96xf32> to vector<1x96xf32>
    %245 = vector.broadcast %244 : vector<1x96xf32> to vector<20x96xf32>
    %246 = arith.addf %241, %245 : vector<20x96xf32>
    %247 = vector.extract_strided_slice %246 {offsets = [0, 0], sizes = [20, 8], strides = [1, 1]} : vector<20x96xf32> to vector<20x8xf32>
    %248 = vector.extract_strided_slice %246 {offsets = [0, 32], sizes = [20, 8], strides = [1, 1]} : vector<20x96xf32> to vector<20x8xf32>
    %249 = vector.extract_strided_slice %246 {offsets = [0, 64], sizes = [20, 8], strides = [1, 1]} : vector<20x96xf32> to vector<20x8xf32>
    %250 = arith.truncf %247 : vector<20x8xf32> to vector<20x8xbf16>
    %251 = arith.truncf %248 : vector<20x8xf32> to vector<20x8xbf16>
    %cst_92 = arith.constant dense<0.000000e+00> : vector<20x20xf32>
    %252 = tpu.matmul %250, %251, %cst_92 {dimension_numbers = #tpu.dot_dimension_numbers<[1], [1], [0], [0], [0, 0, 1, 0], [], []>} : vector<20x8xbf16>, vector<20x8xbf16>, vector<20x20xf32> -> vector<20x20xf32>
    %cst_93 = arith.constant 0.353553385 : f32
    %253 = vector.broadcast %cst_93 : f32 to vector<20x20xf32>
    %254 = arith.mulf %252, %253 : vector<20x20xf32>
    %255 = arith.addf %254, %0 : vector<20x20xf32>
    %cst_94 = arith.constant dense<0xFF800000> : vector<20xf32>
    %256 = vector.multi_reduction <maximumf>, %255, %cst_94 [1] : vector<20x20xf32> to vector<20xf32>
    %257 = vector.shape_cast %256 : vector<20xf32> to vector<20x1xf32>
    %258 = vector.broadcast %257 : vector<20x1xf32> to vector<20x20xf32>
    %259 = arith.subf %255, %258 : vector<20x20xf32>
    %260 = math.exp %259 : vector<20x20xf32>
    %cst_95 = arith.constant dense<0.000000e+00> : vector<20xf32>
    %261 = vector.multi_reduction <add>, %260, %cst_95 [1] : vector<20x20xf32> to vector<20xf32>
    %262 = vector.shape_cast %261 : vector<20xf32> to vector<20x1xf32>
    %263 = tpu.reciprocal %262 {approx = true} : vector<20x1xf32> -> vector<20x1xf32>
    %264 = vector.broadcast %263 : vector<20x1xf32> to vector<20x20xf32>
    %265 = arith.mulf %260, %264 : vector<20x20xf32>
    %266 = arith.truncf %265 : vector<20x20xf32> to vector<20x20xbf16>
    %267 = arith.truncf %249 : vector<20x8xf32> to vector<20x8xbf16>
    %cst_96 = arith.constant dense<0.000000e+00> : vector<20x8xf32>
    %268 = tpu.matmul %266, %267, %cst_96 {dimension_numbers = #tpu.dot_dimension_numbers<[1], [0], [0], [1], [0, 0, 1, 1], [], []>} : vector<20x20xbf16>, vector<20x8xbf16>, vector<20x8xf32> -> vector<20x8xf32>
    %269 = vector.extract_strided_slice %246 {offsets = [0, 8], sizes = [20, 8], strides = [1, 1]} : vector<20x96xf32> to vector<20x8xf32>
    %270 = vector.extract_strided_slice %246 {offsets = [0, 40], sizes = [20, 8], strides = [1, 1]} : vector<20x96xf32> to vector<20x8xf32>
    %271 = vector.extract_strided_slice %246 {offsets = [0, 72], sizes = [20, 8], strides = [1, 1]} : vector<20x96xf32> to vector<20x8xf32>
    %272 = arith.truncf %269 : vector<20x8xf32> to vector<20x8xbf16>
    %273 = arith.truncf %270 : vector<20x8xf32> to vector<20x8xbf16>
    %cst_97 = arith.constant dense<0.000000e+00> : vector<20x20xf32>
    %274 = tpu.matmul %272, %273, %cst_97 {dimension_numbers = #tpu.dot_dimension_numbers<[1], [1], [0], [0], [0, 0, 1, 0], [], []>} : vector<20x8xbf16>, vector<20x8xbf16>, vector<20x20xf32> -> vector<20x20xf32>
    %cst_98 = arith.constant 0.353553385 : f32
    %275 = vector.broadcast %cst_98 : f32 to vector<20x20xf32>
    %276 = arith.mulf %274, %275 : vector<20x20xf32>
    %277 = arith.addf %276, %0 : vector<20x20xf32>
    %cst_99 = arith.constant dense<0xFF800000> : vector<20xf32>
    %278 = vector.multi_reduction <maximumf>, %277, %cst_99 [1] : vector<20x20xf32> to vector<20xf32>
    %279 = vector.shape_cast %278 : vector<20xf32> to vector<20x1xf32>
    %280 = vector.broadcast %279 : vector<20x1xf32> to vector<20x20xf32>
    %281 = arith.subf %277, %280 : vector<20x20xf32>
    %282 = math.exp %281 : vector<20x20xf32>
    %cst_100 = arith.constant dense<0.000000e+00> : vector<20xf32>
    %283 = vector.multi_reduction <add>, %282, %cst_100 [1] : vector<20x20xf32> to vector<20xf32>
    %284 = vector.shape_cast %283 : vector<20xf32> to vector<20x1xf32>
    %285 = tpu.reciprocal %284 {approx = true} : vector<20x1xf32> -> vector<20x1xf32>
    %286 = vector.broadcast %285 : vector<20x1xf32> to vector<20x20xf32>
    %287 = arith.mulf %282, %286 : vector<20x20xf32>
    %288 = arith.truncf %287 : vector<20x20xf32> to vector<20x20xbf16>
    %289 = arith.truncf %271 : vector<20x8xf32> to vector<20x8xbf16>
    %cst_101 = arith.constant dense<0.000000e+00> : vector<20x8xf32>
    %290 = tpu.matmul %288, %289, %cst_101 {dimension_numbers = #tpu.dot_dimension_numbers<[1], [0], [0], [1], [0, 0, 1, 1], [], []>} : vector<20x20xbf16>, vector<20x8xbf16>, vector<20x8xf32> -> vector<20x8xf32>
    %291 = vector.extract_strided_slice %246 {offsets = [0, 16], sizes = [20, 8], strides = [1, 1]} : vector<20x96xf32> to vector<20x8xf32>
    %292 = vector.extract_strided_slice %246 {offsets = [0, 48], sizes = [20, 8], strides = [1, 1]} : vector<20x96xf32> to vector<20x8xf32>
    %293 = vector.extract_strided_slice %246 {offsets = [0, 80], sizes = [20, 8], strides = [1, 1]} : vector<20x96xf32> to vector<20x8xf32>
    %294 = arith.truncf %291 : vector<20x8xf32> to vector<20x8xbf16>
    %295 = arith.truncf %292 : vector<20x8xf32> to vector<20x8xbf16>
    %cst_102 = arith.constant dense<0.000000e+00> : vector<20x20xf32>
    %296 = tpu.matmul %294, %295, %cst_102 {dimension_numbers = #tpu.dot_dimension_numbers<[1], [1], [0], [0], [0, 0, 1, 0], [], []>} : vector<20x8xbf16>, vector<20x8xbf16>, vector<20x20xf32> -> vector<20x20xf32>
    %cst_103 = arith.constant 0.353553385 : f32
    %297 = vector.broadcast %cst_103 : f32 to vector<20x20xf32>
    %298 = arith.mulf %296, %297 : vector<20x20xf32>
    %299 = arith.addf %298, %0 : vector<20x20xf32>
    %cst_104 = arith.constant dense<0xFF800000> : vector<20xf32>
    %300 = vector.multi_reduction <maximumf>, %299, %cst_104 [1] : vector<20x20xf32> to vector<20xf32>
    %301 = vector.shape_cast %300 : vector<20xf32> to vector<20x1xf32>
    %302 = vector.broadcast %301 : vector<20x1xf32> to vector<20x20xf32>
    %303 = arith.subf %299, %302 : vector<20x20xf32>
    %304 = math.exp %303 : vector<20x20xf32>
    %cst_105 = arith.constant dense<0.000000e+00> : vector<20xf32>
    %305 = vector.multi_reduction <add>, %304, %cst_105 [1] : vector<20x20xf32> to vector<20xf32>
    %306 = vector.shape_cast %305 : vector<20xf32> to vector<20x1xf32>
    %307 = tpu.reciprocal %306 {approx = true} : vector<20x1xf32> -> vector<20x1xf32>
    %308 = vector.broadcast %307 : vector<20x1xf32> to vector<20x20xf32>
    %309 = arith.mulf %304, %308 : vector<20x20xf32>
    %310 = arith.truncf %309 : vector<20x20xf32> to vector<20x20xbf16>
    %311 = arith.truncf %293 : vector<20x8xf32> to vector<20x8xbf16>
    %cst_106 = arith.constant dense<0.000000e+00> : vector<20x8xf32>
    %312 = tpu.matmul %310, %311, %cst_106 {dimension_numbers = #tpu.dot_dimension_numbers<[1], [0], [0], [1], [0, 0, 1, 1], [], []>} : vector<20x20xbf16>, vector<20x8xbf16>, vector<20x8xf32> -> vector<20x8xf32>
    %313 = vector.extract_strided_slice %246 {offsets = [0, 24], sizes = [20, 8], strides = [1, 1]} : vector<20x96xf32> to vector<20x8xf32>
    %314 = vector.extract_strided_slice %246 {offsets = [0, 56], sizes = [20, 8], strides = [1, 1]} : vector<20x96xf32> to vector<20x8xf32>
    %315 = vector.extract_strided_slice %246 {offsets = [0, 88], sizes = [20, 8], strides = [1, 1]} : vector<20x96xf32> to vector<20x8xf32>
    %316 = arith.truncf %313 : vector<20x8xf32> to vector<20x8xbf16>
    %317 = arith.truncf %314 : vector<20x8xf32> to vector<20x8xbf16>
    %cst_107 = arith.constant dense<0.000000e+00> : vector<20x20xf32>
    %318 = tpu.matmul %316, %317, %cst_107 {dimension_numbers = #tpu.dot_dimension_numbers<[1], [1], [0], [0], [0, 0, 1, 0], [], []>} : vector<20x8xbf16>, vector<20x8xbf16>, vector<20x20xf32> -> vector<20x20xf32>
    %cst_108 = arith.constant 0.353553385 : f32
    %319 = vector.broadcast %cst_108 : f32 to vector<20x20xf32>
    %320 = arith.mulf %318, %319 : vector<20x20xf32>
    %321 = arith.addf %320, %0 : vector<20x20xf32>
    %cst_109 = arith.constant dense<0xFF800000> : vector<20xf32>
    %322 = vector.multi_reduction <maximumf>, %321, %cst_109 [1] : vector<20x20xf32> to vector<20xf32>
    %323 = vector.shape_cast %322 : vector<20xf32> to vector<20x1xf32>
    %324 = vector.broadcast %323 : vector<20x1xf32> to vector<20x20xf32>
    %325 = arith.subf %321, %324 : vector<20x20xf32>
    %326 = math.exp %325 : vector<20x20xf32>
    %cst_110 = arith.constant dense<0.000000e+00> : vector<20xf32>
    %327 = vector.multi_reduction <add>, %326, %cst_110 [1] : vector<20x20xf32> to vector<20xf32>
    %328 = vector.shape_cast %327 : vector<20xf32> to vector<20x1xf32>
    %329 = tpu.reciprocal %328 {approx = true} : vector<20x1xf32> -> vector<20x1xf32>
    %330 = vector.broadcast %329 : vector<20x1xf32> to vector<20x20xf32>
    %331 = arith.mulf %326, %330 : vector<20x20xf32>
    %332 = arith.truncf %331 : vector<20x20xf32> to vector<20x20xbf16>
    %333 = arith.truncf %315 : vector<20x8xf32> to vector<20x8xbf16>
    %cst_111 = arith.constant dense<0.000000e+00> : vector<20x8xf32>
    %334 = tpu.matmul %332, %333, %cst_111 {dimension_numbers = #tpu.dot_dimension_numbers<[1], [0], [0], [1], [0, 0, 1, 1], [], []>} : vector<20x20xbf16>, vector<20x8xbf16>, vector<20x8xf32> -> vector<20x8xf32>
    %335 = tpu.concatenate %268, %290, %312, %334 in 1 : vector<20x8xf32>, vector<20x8xf32>, vector<20x8xf32>, vector<20x8xf32> -> vector<20x32xf32>
    %336 = arith.index_cast %c1_i32 : i32 to index
    %c0_112 = arith.constant 0 : index
    %c0_113 = arith.constant 0 : index
    %337 = vector.load %arg11[%336, %c0_112, %c0_113] : memref<2x32x32xbf16, #tpu.memory_space<vmem>>, vector<1x32x32xbf16>
    %338 = vector.shape_cast %337 : vector<1x32x32xbf16> to vector<32x32xbf16>
    %339 = arith.truncf %335 : vector<20x32xf32> to vector<20x32xbf16>
    %cst_114 = arith.constant dense<0.000000e+00> : vector<20x32xf32>
    %340 = tpu.matmul %339, %338, %cst_114 {dimension_numbers = #tpu.dot_dimension_numbers<[1], [0], [0], [1], [0, 0, 1, 1], [], []>} : vector<20x32xbf16>, vector<32x32xbf16>, vector<20x32xf32> -> vector<20x32xf32>
    %341 = arith.addf %210, %340 : vector<20x32xf32>
    %342 = arith.index_cast %c1_i32 : i32 to index
    %c0_115 = arith.constant 0 : index
    %c0_116 = arith.constant 0 : index
    %343 = vector.load %arg12[%342, %c0_115, %c0_116] : memref<2x1x32xf32, #tpu.memory_space<vmem>>, vector<1x1x32xf32>
    %344 = vector.shape_cast %343 : vector<1x1x32xf32> to vector<1x32xf32>
    %345 = vector.broadcast %344 : vector<1x32xf32> to vector<20x32xf32>
    %346 = arith.addf %341, %345 : vector<20x32xf32>
    %347 = arith.index_cast %c1_i32 : i32 to index
    %c0_117 = arith.constant 0 : index
    %c0_118 = arith.constant 0 : index
    %348 = vector.load %arg13[%347, %c0_117, %c0_118] : memref<2x1x32xf32, #tpu.memory_space<vmem>>, vector<1x1x32xf32>
    %349 = vector.shape_cast %348 : vector<1x1x32xf32> to vector<1x32xf32>
    %350 = arith.index_cast %c1_i32 : i32 to index
    %c0_119 = arith.constant 0 : index
    %c0_120 = arith.constant 0 : index
    %351 = vector.load %arg14[%350, %c0_119, %c0_120] : memref<2x1x32xf32, #tpu.memory_space<vmem>>, vector<1x1x32xf32>
    %352 = vector.shape_cast %351 : vector<1x1x32xf32> to vector<1x32xf32>
    %cst_121 = arith.constant dense<0.000000e+00> : vector<20xf32>
    %353 = vector.multi_reduction <add>, %346, %cst_121 [1] : vector<20x32xf32> to vector<20xf32>
    %354 = vector.shape_cast %353 : vector<20xf32> to vector<20x1xf32>
    %cst_122 = arith.constant 3.200000e+01 : f32
    %355 = vector.broadcast %cst_122 : f32 to vector<20x1xf32>
    %356 = arith.divf %354, %355 : vector<20x1xf32>
    %357 = vector.broadcast %356 : vector<20x1xf32> to vector<20x32xf32>
    %358 = arith.subf %346, %357 : vector<20x32xf32>
    %359 = arith.mulf %358, %358 : vector<20x32xf32>
    %cst_123 = arith.constant dense<0.000000e+00> : vector<20xf32>
    %360 = vector.multi_reduction <add>, %359, %cst_123 [1] : vector<20x32xf32> to vector<20xf32>
    %361 = vector.shape_cast %360 : vector<20xf32> to vector<20x1xf32>
    %cst_124 = arith.constant 3.200000e+01 : f32
    %362 = vector.broadcast %cst_124 : f32 to vector<20x1xf32>
    %363 = arith.divf %361, %362 : vector<20x1xf32>
    %cst_125 = arith.constant 9.99999997E-7 : f32
    %364 = vector.broadcast %cst_125 : f32 to vector<20x1xf32>
    %365 = arith.addf %363, %364 : vector<20x1xf32>
    %366 = math.rsqrt %365 : vector<20x1xf32>
    %367 = vector.broadcast %366 : vector<20x1xf32> to vector<20x32xf32>
    %368 = arith.mulf %358, %367 : vector<20x32xf32>
    %369 = vector.broadcast %349 : vector<1x32xf32> to vector<20x32xf32>
    %370 = arith.mulf %368, %369 : vector<20x32xf32>
    %371 = vector.broadcast %352 : vector<1x32xf32> to vector<20x32xf32>
    %372 = arith.addf %370, %371 : vector<20x32xf32>
    %373 = arith.index_cast %c1_i32 : i32 to index
    %c0_126 = arith.constant 0 : index
    %c0_127 = arith.constant 0 : index
    %374 = vector.load %arg15[%373, %c0_126, %c0_127] : memref<2x32x128xbf16, #tpu.memory_space<vmem>>, vector<1x32x128xbf16>
    %375 = vector.shape_cast %374 : vector<1x32x128xbf16> to vector<32x128xbf16>
    %376 = arith.truncf %372 : vector<20x32xf32> to vector<20x32xbf16>
    %cst_128 = arith.constant dense<0.000000e+00> : vector<20x128xf32>
    %377 = tpu.matmul %376, %375, %cst_128 {dimension_numbers = #tpu.dot_dimension_numbers<[1], [0], [0], [1], [0, 0, 1, 1], [], []>} : vector<20x32xbf16>, vector<32x128xbf16>, vector<20x128xf32> -> vector<20x128xf32>
    %378 = arith.index_cast %c1_i32 : i32 to index
    %c0_129 = arith.constant 0 : index
    %c0_130 = arith.constant 0 : index
    %379 = vector.load %arg16[%378, %c0_129, %c0_130] : memref<2x1x128xf32, #tpu.memory_space<vmem>>, vector<1x1x128xf32>
    %380 = vector.shape_cast %379 : vector<1x1x128xf32> to vector<1x128xf32>
    %381 = vector.broadcast %380 : vector<1x128xf32> to vector<20x128xf32>
    %382 = arith.addf %377, %381 : vector<20x128xf32>
    %383 = arith.mulf %382, %382 : vector<20x128xf32>
    %384 = arith.mulf %382, %383 : vector<20x128xf32>
    %cst_131 = arith.constant 4.471500e-02 : f32
    %385 = vector.broadcast %cst_131 : f32 to vector<20x128xf32>
    %386 = arith.mulf %385, %384 : vector<20x128xf32>
    %387 = arith.addf %382, %386 : vector<20x128xf32>
    %cst_132 = arith.constant 0.797884583 : f32
    %388 = vector.broadcast %cst_132 : f32 to vector<20x128xf32>
    %389 = arith.mulf %388, %387 : vector<20x128xf32>
    %390 = math.tanh %389 : vector<20x128xf32>
    %cst_133 = arith.constant 1.000000e+00 : f32
    %391 = vector.broadcast %cst_133 : f32 to vector<20x128xf32>
    %392 = arith.addf %391, %390 : vector<20x128xf32>
    %cst_134 = arith.constant 5.000000e-01 : f32
    %393 = vector.broadcast %cst_134 : f32 to vector<20x128xf32>
    %394 = arith.mulf %393, %392 : vector<20x128xf32>
    %395 = arith.mulf %382, %394 : vector<20x128xf32>
    %396 = arith.index_cast %c1_i32 : i32 to index
    %c0_135 = arith.constant 0 : index
    %c0_136 = arith.constant 0 : index
    %397 = vector.load %arg17[%396, %c0_135, %c0_136] : memref<2x128x32xbf16, #tpu.memory_space<vmem>>, vector<1x128x32xbf16>
    %398 = vector.shape_cast %397 : vector<1x128x32xbf16> to vector<128x32xbf16>
    %399 = arith.truncf %395 : vector<20x128xf32> to vector<20x128xbf16>
    %cst_137 = arith.constant dense<0.000000e+00> : vector<20x32xf32>
    %400 = tpu.matmul %399, %398, %cst_137 {dimension_numbers = #tpu.dot_dimension_numbers<[1], [0], [0], [1], [0, 0, 1, 1], [], []>} : vector<20x128xbf16>, vector<128x32xbf16>, vector<20x32xf32> -> vector<20x32xf32>
    %401 = arith.addf %346, %400 : vector<20x32xf32>
    %402 = arith.index_cast %c1_i32 : i32 to index
    %c0_138 = arith.constant 0 : index
    %c0_139 = arith.constant 0 : index
    %403 = vector.load %arg18[%402, %c0_138, %c0_139] : memref<2x1x32xf32, #tpu.memory_space<vmem>>, vector<1x1x32xf32>
    %404 = vector.shape_cast %403 : vector<1x1x32xf32> to vector<1x32xf32>
    %405 = vector.broadcast %404 : vector<1x32xf32> to vector<20x32xf32>
    %406 = arith.addf %401, %405 : vector<20x32xf32>
    %c2_i32 = arith.constant 2 : i32
    %407 = vector.extract_strided_slice %406 {offsets = [16, 0], sizes = [4, 32], strides = [1, 1]} : vector<20x32xf32> to vector<4x32xf32>
    %c0_140 = arith.constant 0 : index
    %c0_141 = arith.constant 0 : index
    %408 = vector.load %arg19[%c0_140, %c0_141] : memref<1x32xf32, #tpu.memory_space<vmem>>, vector<1x32xf32>
    %c0_142 = arith.constant 0 : index
    %c0_143 = arith.constant 0 : index
    %409 = vector.load %arg20[%c0_142, %c0_143] : memref<1x32xf32, #tpu.memory_space<vmem>>, vector<1x32xf32>
    %cst_144 = arith.constant dense<0.000000e+00> : vector<4xf32>
    %410 = vector.multi_reduction <add>, %407, %cst_144 [1] : vector<4x32xf32> to vector<4xf32>
    %411 = vector.shape_cast %410 : vector<4xf32> to vector<4x1xf32>
    %cst_145 = arith.constant 3.200000e+01 : f32
    %412 = vector.broadcast %cst_145 : f32 to vector<4x1xf32>
    %413 = arith.divf %411, %412 : vector<4x1xf32>
    %414 = vector.broadcast %413 : vector<4x1xf32> to vector<4x32xf32>
    %415 = arith.subf %407, %414 : vector<4x32xf32>
    %416 = arith.mulf %415, %415 : vector<4x32xf32>
    %cst_146 = arith.constant dense<0.000000e+00> : vector<4xf32>
    %417 = vector.multi_reduction <add>, %416, %cst_146 [1] : vector<4x32xf32> to vector<4xf32>
    %418 = vector.shape_cast %417 : vector<4xf32> to vector<4x1xf32>
    %cst_147 = arith.constant 3.200000e+01 : f32
    %419 = vector.broadcast %cst_147 : f32 to vector<4x1xf32>
    %420 = arith.divf %418, %419 : vector<4x1xf32>
    %cst_148 = arith.constant 9.99999997E-7 : f32
    %421 = vector.broadcast %cst_148 : f32 to vector<4x1xf32>
    %422 = arith.addf %420, %421 : vector<4x1xf32>
    %423 = math.rsqrt %422 : vector<4x1xf32>
    %424 = vector.broadcast %423 : vector<4x1xf32> to vector<4x32xf32>
    %425 = arith.mulf %415, %424 : vector<4x32xf32>
    %426 = vector.broadcast %408 : vector<1x32xf32> to vector<4x32xf32>
    %427 = arith.mulf %425, %426 : vector<4x32xf32>
    %428 = vector.broadcast %409 : vector<1x32xf32> to vector<4x32xf32>
    %429 = arith.addf %427, %428 : vector<4x32xf32>
    %c0_149 = arith.constant 0 : index
    %c0_150 = arith.constant 0 : index
    %430 = vector.load %arg21[%c0_149, %c0_150] : memref<32x128xbf16, #tpu.memory_space<vmem>>, vector<32x128xbf16>
    %431 = arith.truncf %429 : vector<4x32xf32> to vector<4x32xbf16>
    %cst_151 = arith.constant dense<0.000000e+00> : vector<4x128xf32>
    %432 = tpu.matmul %431, %430, %cst_151 {dimension_numbers = #tpu.dot_dimension_numbers<[1], [0], [0], [1], [0, 0, 1, 1], [], []>} : vector<4x32xbf16>, vector<32x128xbf16>, vector<4x128xf32> -> vector<4x128xf32>
    %c0_152 = arith.constant 0 : index
    %c0_153 = arith.constant 0 : index
    %433 = vector.load %arg22[%c0_152, %c0_153] : memref<1x128xf32, #tpu.memory_space<vmem>>, vector<1x128xf32>
    %434 = vector.broadcast %433 : vector<1x128xf32> to vector<4x128xf32>
    %435 = arith.addf %432, %434 : vector<4x128xf32>
    %c0_154 = arith.constant 0 : index
    %c0_155 = arith.constant 0 : index
    %c0_156 = arith.constant 0 : index
    %436 = vector.load %arg23[%c0_154, %c0_155, %c0_156] : memref<1x4x128xf32, #tpu.memory_space<vmem>>, vector<1x4x128xf32>
    %437 = vector.shape_cast %436 : vector<1x4x128xf32> to vector<4x128xf32>
    %438 = vector.shape_cast %435 : vector<4x128xf32> to vector<1x4x128xf32>
    tpu.vector_store %arg23[%c0_154, %c0_155, %c0_156], %438 {strides = array<i32>} : memref<1x4x128xf32, #tpu.memory_space<vmem>>, vector<1x4x128xf32>,
    return
  }
  func.func @transform_0(%arg0: i32) -> (i32, i32) {
    %c0_i32 = arith.constant 0 : i32
    %c0_i32_0 = arith.constant 0 : i32
    return %arg0, %c0_i32 : i32, i32
  }
  func.func @transform_1(%arg0: i32) -> (i32, i32) {
    %c0_i32 = arith.constant 0 : i32
    %c0_i32_0 = arith.constant 0 : i32
    %c0_i32_1 = arith.constant 0 : i32
    return %c0_i32, %c0_i32_0 : i32, i32
  }
  func.func @transform_2(%arg0: i32) -> (i32, i32) {
    %c0_i32 = arith.constant 0 : i32
    %c0_i32_0 = arith.constant 0 : i32
    %c0_i32_1 = arith.constant 0 : i32
    return %c0_i32, %c0_i32_0 : i32, i32
  }
  func.func @transform_3(%arg0: i32) -> (i32, i32) {
    %c0_i32 = arith.constant 0 : i32
    %c0_i32_0 = arith.constant 0 : i32
    %c0_i32_1 = arith.constant 0 : i32
    return %c0_i32, %c0_i32_0 : i32, i32
  }
  func.func @transform_4(%arg0: i32) -> (i32, i32) {
    %c0_i32 = arith.constant 0 : i32
    %c0_i32_0 = arith.constant 0 : i32
    %c0_i32_1 = arith.constant 0 : i32
    return %c0_i32, %c0_i32_0 : i32, i32
  }
  func.func @transform_5(%arg0: i32) -> (i32, i32) {
    %c0_i32 = arith.constant 0 : i32
    %c0_i32_0 = arith.constant 0 : i32
    %c0_i32_1 = arith.constant 0 : i32
    return %c0_i32, %c0_i32_0 : i32, i32
  }
  func.func @transform_6(%arg0: i32) -> (i32, i32, i32) {
    %c0_i32 = arith.constant 0 : i32
    %c0_i32_0 = arith.constant 0 : i32
    %c0_i32_1 = arith.constant 0 : i32
    %c0_i32_2 = arith.constant 0 : i32
    return %c0_i32, %c0_i32_0, %c0_i32_1 : i32, i32, i32
  }
  func.func @transform_7(%arg0: i32) -> (i32, i32, i32) {
    %c0_i32 = arith.constant 0 : i32
    %c0_i32_0 = arith.constant 0 : i32
    %c0_i32_1 = arith.constant 0 : i32
    %c0_i32_2 = arith.constant 0 : i32
    return %c0_i32, %c0_i32_0, %c0_i32_1 : i32, i32, i32
  }
  func.func @transform_8(%arg0: i32) -> (i32, i32, i32) {
    %c0_i32 = arith.constant 0 : i32
    %c0_i32_0 = arith.constant 0 : i32
    %c0_i32_1 = arith.constant 0 : i32
    %c0_i32_2 = arith.constant 0 : i32
    return %c0_i32, %c0_i32_0, %c0_i32_1 : i32, i32, i32
  }
  func.func @transform_9(%arg0: i32) -> (i32, i32, i32) {
    %c0_i32 = arith.constant 0 : i32
    %c0_i32_0 = arith.constant 0 : i32
    %c0_i32_1 = arith.constant 0 : i32
    %c0_i32_2 = arith.constant 0 : i32
    return %c0_i32, %c0_i32_0, %c0_i32_1 : i32, i32, i32
  }
  func.func @transform_10(%arg0: i32) -> (i32, i32, i32) {
    %c0_i32 = arith.constant 0 : i32
    %c0_i32_0 = arith.constant 0 : i32
    %c0_i32_1 = arith.constant 0 : i32
    %c0_i32_2 = arith.constant 0 : i32
    return %c0_i32, %c0_i32_0, %c0_i32_1 : i32, i32, i32
  }
  func.func @transform_11(%arg0: i32) -> (i32, i32, i32) {
    %c0_i32 = arith.constant 0 : i32
    %c0_i32_0 = arith.constant 0 : i32
    %c0_i32_1 = arith.constant 0 : i32
    %c0_i32_2 = arith.constant 0 : i32
    return %c0_i32, %c0_i32_0, %c0_i32_1 : i32, i32, i32
  }
  func.func @transform_12(%arg0: i32) -> (i32, i32, i32) {
    %c0_i32 = arith.constant 0 : i32
    %c0_i32_0 = arith.constant 0 : i32
    %c0_i32_1 = arith.constant 0 : i32
    %c0_i32_2 = arith.constant 0 : i32
    return %c0_i32, %c0_i32_0, %c0_i32_1 : i32, i32, i32
  }
  func.func @transform_13(%arg0: i32) -> (i32, i32, i32) {
    %c0_i32 = arith.constant 0 : i32
    %c0_i32_0 = arith.constant 0 : i32
    %c0_i32_1 = arith.constant 0 : i32
    %c0_i32_2 = arith.constant 0 : i32
    return %c0_i32, %c0_i32_0, %c0_i32_1 : i32, i32, i32
  }
  func.func @transform_14(%arg0: i32) -> (i32, i32, i32) {
    %c0_i32 = arith.constant 0 : i32
    %c0_i32_0 = arith.constant 0 : i32
    %c0_i32_1 = arith.constant 0 : i32
    %c0_i32_2 = arith.constant 0 : i32
    return %c0_i32, %c0_i32_0, %c0_i32_1 : i32, i32, i32
  }
  func.func @transform_15(%arg0: i32) -> (i32, i32, i32) {
    %c0_i32 = arith.constant 0 : i32
    %c0_i32_0 = arith.constant 0 : i32
    %c0_i32_1 = arith.constant 0 : i32
    %c0_i32_2 = arith.constant 0 : i32
    return %c0_i32, %c0_i32_0, %c0_i32_1 : i32, i32, i32
  }
  func.func @transform_16(%arg0: i32) -> (i32, i32, i32) {
    %c0_i32 = arith.constant 0 : i32
    %c0_i32_0 = arith.constant 0 : i32
    %c0_i32_1 = arith.constant 0 : i32
    %c0_i32_2 = arith.constant 0 : i32
    return %c0_i32, %c0_i32_0, %c0_i32_1 : i32, i32, i32
  }
  func.func @transform_17(%arg0: i32) -> (i32, i32, i32) {
    %c0_i32 = arith.constant 0 : i32
    %c0_i32_0 = arith.constant 0 : i32
    %c0_i32_1 = arith.constant 0 : i32
    %c0_i32_2 = arith.constant 0 : i32
    return %c0_i32, %c0_i32_0, %c0_i32_1 : i32, i32, i32
  }
  func.func @transform_18(%arg0: i32) -> (i32, i32) {
    %c0_i32 = arith.constant 0 : i32
    %c0_i32_0 = arith.constant 0 : i32
    %c0_i32_1 = arith.constant 0 : i32
    return %c0_i32, %c0_i32_0 : i32, i32
  }
  func.func @transform_19(%arg0: i32) -> (i32, i32) {
    %c0_i32 = arith.constant 0 : i32
    %c0_i32_0 = arith.constant 0 : i32
    %c0_i32_1 = arith.constant 0 : i32
    return %c0_i32, %c0_i32_0 : i32, i32
  }
  func.func @transform_20(%arg0: i32) -> (i32, i32) {
    %c0_i32 = arith.constant 0 : i32
    %c0_i32_0 = arith.constant 0 : i32
    %c0_i32_1 = arith.constant 0 : i32
    return %c0_i32, %c0_i32_0 : i32, i32
  }
  func.func @transform_21(%arg0: i32) -> (i32, i32) {
    %c0_i32 = arith.constant 0 : i32
    %c0_i32_0 = arith.constant 0 : i32
    %c0_i32_1 = arith.constant 0 : i32
    return %c0_i32, %c0_i32_0 : i32, i32
  }
  func.func @transform_22(%arg0: i32) -> (i32, i32, i32) {
    %c0_i32 = arith.constant 0 : i32
    %c0_i32_0 = arith.constant 0 : i32
    %c0_i32_1 = arith.constant 0 : i32
    return %arg0, %c0_i32, %c0_i32_0 : i32, i32, i32
  }
}

</mosaic_0001>

<bundles_post_ra>
// kernel: tpu_custom_call.1
= control target key start
LH: loop header
LB: loop body
LE: loop exit
PB: predicated region body
PF: predicated region fallthrough
CT: control target
= control target key end

     0   :  { %s4429_s0 = inlined_call_operand.vmem [shape: bf16[32,192], index: 0, kind: input, shape index: {}]   ;;  %s4430_s1 = inlined_call_operand.vmem [shape: f32[20,20], index: 1, kind: input, shape index: {}]   ;;  %s4431_s2 = inlined_call_operand.vmem [shape: f32[1,32], index: 2, kind: input, shape index: {}]   ;;  %s4432_s3 = inlined_call_operand.vmem [shape: f32[16,32], index: 3, kind: input, shape index: {}]   ;;  %s4433_s4 = inlined_call_operand.vmem [shape: bf16[192,32], index: 4, kind: input, shape index: {}]   ;;  %s4434_s5 = inlined_call_operand.vmem [shape: f32[1,32], index: 5, kind: input, shape index: {}]   ;;  %s4435_s6 = inlined_call_operand.vmem [shape: f32[2,1,32], index: 6, kind: input, shape index: {}]   ;;  %s4436_s7 = inlined_call_operand.vmem [shape: f32[2,1,32], index: 7, kind: input, shape index: {}]   ;;  %s4437_s8 = inlined_call_operand.vmem [shape: bf16[2,32,96], index: 8, kind: input, shape index: {}]   ;;  %s4438_s9 = inlined_call_operand.vmem [shape: f32[2,1,96], index: 9, kind: input, shape index: {}]   ;;  %s4439_s10 = inlined_call_operand.vmem [shape: bf16[2,32,32], index: 10, kind: input, shape index: {}]   ;;  %s4440_s11 = inlined_call_operand.vmem [shape: f32[2,1,32], index: 11, kind: input, shape index: {}]   ;;  %s4441_s12 = inlined_call_operand.vmem [shape: f32[2,1,32], index: 12, kind: input, shape index: {}]   ;;  %s4442_s13 = inlined_call_operand.vmem [shape: f32[2,1,32], index: 13, kind: input, shape index: {}]   ;;  %s4443_s14 = inlined_call_operand.vmem [shape: bf16[2,32,128], index: 14, kind: input, shape index: {}]   ;;  %s4444_s15 = inlined_call_operand.vmem [shape: f32[2,1,128], index: 15, kind: input, shape index: {}]   ;;  %s4445_s16 = inlined_call_operand.vmem [shape: bf16[2,128,32], index: 16, kind: input, shape index: {}]   ;;  %s4446_s17 = inlined_call_operand.vmem [shape: f32[2,1,32], index: 17, kind: input, shape index: {}]   ;;  %s4447_s18 = inlined_call_operand.vmem [shape: f32[1,32], index: 18, kind: input, shape index: {}]   ;;  %s4448_s19 = inlined_call_operand.vmem [shape: f32[1,32], index: 19, kind: input, shape index: {}]   ;;  %s4449_s20 = inlined_call_operand.vmem [shape: bf16[32,128], index: 20, kind: input, shape index: {}]   ;;  %s4450_s21 = inlined_call_operand.vmem [shape: f32[1,128], index: 21, kind: input, shape index: {}]   ;;  %s4451_s22 = inlined_call_operand.hbm [shape: f32[2,4,128], index: 22, kind: output, shape index: {}]  }
   0x1   :  { %4491 = sst [smem:[#allocation13_spill]] %s4429_s0 }
   0x2   :  { %4492 = sst [smem:[#allocation14_spill]] %s4430_s1 }
   0x3   :  { %4493 = sst [smem:[#allocation15_spill]] %s4431_s2 }
   0x4   :  { %4494 = sst [smem:[#allocation16_spill]] %s4432_s3 }
   0x5   :  { %4495 = sst [smem:[#allocation17_spill]] %s4433_s4 }
   0x6   :  { %4496 = sst [smem:[#allocation18_spill]] %s4434_s5 }
   0x7   :  { %4497 = sst [smem:[#allocation19_spill]] %s4435_s6 }
   0x8   :  { %4498 = sst [smem:[#allocation20_spill]] %s4436_s7 }
   0x9   :  { %4499 = sst [smem:[#allocation21_spill]] %s4437_s8 }
   0xa   :  { %4500 = sst [smem:[#allocation22_spill]] %s4438_s9 }
   0xb   :  { %4501 = sst [smem:[#allocation23_spill]] %s4439_s10 }
   0xc   :  { %4502 = sst [smem:[#allocation24_spill]] %s4440_s11 }
   0xd   :  { %4503 = sst [smem:[#allocation25_spill]] %s4450_s21 }
   0xe   :  { %4504 = sst [smem:[#allocation26_spill]] %s4451_s22 }
   0xf   :  { %27 = vsyncpa [#allocation4], 0 }
  0x10   :  { %29 = vsyncpa [#allocation4 + $0x1], 0  ;;  %s3597_s3 = smov 0   ;;  %s3599_s28 = smov 0  }
  0x11   :  { %s3601_s29 = smov 0   ;;  %s3603_s30 = smov 0  }
  0x12 LB: > { %4505 = sst [smem:[#allocation6_spill]] %s3453_s3  ;;  %s3618_s4 = sadd.s32 4294967295, %s3465_s30   ;;  %s3465_s30 = sphi %s3603_s30, %s4547_s30   ;;  %s3461_s29 = sphi %s3601_s29, %s4549_s29   ;;  %s3457_s28 = sphi %s3599_s28, %s4551_s28   ;;  %s3453_s3 = sphi %s3597_s3, %s4550_s3  }
  0x13   : > { %4506 = sst [smem:[#allocation7_spill]] %s3461_s29  ;;  %s2842_s0 = sadd.s32 4294967294, %s3465_s30  }
  0x14   : > { %4507 = sst [smem:[#allocation8_spill]] %s3465_s30  ;;  %s3622_s23 = sadd.s32 1, %s3465_s30  }
  0x15   : > { %4508 = sst [smem:[#allocation9_spill]] %s3622_s23  ;;  %s509_s1 = sadd.s32 1, %s3461_s29 }
  0x16   : > { %s506_s5 = ssub.s32 %s3465_s30, %s3622_s23  ;;  %p519_p0 = scmp.ne.s32.totalorder %s3461_s29, %s3457_s28 }
  0x17   : > { %p507_p1 = scmp.eq.s32.totalorder %s506_s5, 0  ;;  %p520_p2 = scmp.eq.s32.totalorder %s3618_s4, 1 }
  0x18   : > { %p525_p3 = scmp.ne.s32.totalorder %s3457_s28, %s3453_s3  ;;  %p526_p4 = scmp.eq.s32.totalorder %s2842_s0, 1 }
  0x19   : > { %s3633_s24 = scalar_select %p507_p1, %s3461_s29, %s509_s1  }
  0x1a   : > { %p3635_p5 = por %p520_p2, %p519_p0  ;;  %p3639_p6 = por %p526_p4, %p525_p3 }
  0x1b   : > { %4509 = sst [smem:[#allocation10_spill]] %s3633_s24  ;;  %p2845_p7 = scmp.ge.s32.totalorder %s3465_s30, 1 }
  0x1c   : > { %s4510_s6 = scalar_select %p3635_p5, 1, 0 }
  0x1d   : > { %s4512_s25 = scalar_select %p3639_p6, 1, 0 }
  0x1e   : > { %4511 = sst [smem:[#allocation11_spill]] %s4510_s6  ;;  %p617_p8 = scmp.lt.s32.totalorder %s3465_s30, 3 }
  0x1f   : > { %4513 = sst [smem:[#allocation12_spill]] %s4512_s25 }
  0x20   : > { %p618_p9 = pnand %p2845_p7, %p617_p8 }
  0x21   : > { %s4514_s27 = sld [smem:[#allocation17_spill]] (!%p618_p9)  ;;  %s2847_s0 = sshll.u32 (!%p618_p9), %s3618_s4, 1 }
  0x22   : > { %621 = sbr.rel (%p618_p9) target bundleno = 4664 (0x1238), region = 108  ;;  %p681_p10 = scmp.lt.s32.totalorder (!%p618_p9), %s2847_s0, 3 }
  0x23   : > { %s4515_s30 = sld [smem:[#allocation13_spill]] (!%p618_p9)  ;;  %s3468_s6 = smov (!%p618_p9), 96  }
  0x24   : > { %s4516_s24 = sld [smem:[#allocation15_spill]] (!%p618_p9)  ;;  %s4489_s26 = smov (!%p618_p9), 88  }
  0x25   : > { %s4520_s8 = sld [smem:[#allocation21_spill]] (!%p618_p9)  ;;  %s4487_s2 = smov (!%p618_p9), 120  }
  0x26   : > { %s4521_s25 = sld [smem:[#allocation19_spill]] (!%p618_p9)  ;;  %s4477_s1 = smov (!%p618_p9), 80  }
  0x27   : > { %v3122_v0 = vld [vmem:[%s4514_s27 + $0x38] sm:$0xff]  ;;  %v3121_v2 = vld [vmem:[%s4514_s27 + $0x30] sm:$0xff]  ;;  %s4553_s0 = smov (!%p681_p10, %s2847_s0), 3  ;;  %v3120_v4 = vld [vmem:[%s4514_s27 + $0x28] sm:$0xff]  ;;  %vm802_vm0 = vcmask 523264   ;;  %vm845_vm1 = vcmask 257024  }
  0x28   : > { %v3126_v1 = vld [vmem:[%s4514_s27 + $0x58] sm:$0xff]  ;;  %806 = vmatpush.bf16.msra.mxu0 %v3122_v0  ;;  %v3125_v3 = vld [vmem:[%s4514_s27 + $0x50] sm:$0xff]  ;;  %s3112_s3 = sshll.u32 %s4553_s0, 3  ;;  %v3124_v5 = vld [vmem:[%s4514_s27 + $0x48] sm:$0xff]  ;;  %s4517_s0 = sld [smem:[#allocation18_spill]]  ;;  %vm838_vm2 = vcmask 261120  }
  0x29   : > { %824 = vmatpush.bf16.msra.mxu1 %v3126_v1  ;;  %s685_s21 = scalar_lea.vmem %s4515_s30, %s3112_s3  ;;  %v3119_v6 = vld [vmem:[%s4514_s27 + $0x20] sm:$0xff]  ;;  %v3118_v10 = vld [vmem:[%s4514_s27 + $0x18] sm:$0xff]  ;;  %v3117_v12 = vld [vmem:[%s4514_s27 + $0x10] sm:$0xff]  ;;  %s4518_s30 = sld [smem:[#allocation16_spill]]  ;;  %v3467_v38 = vmov 32.0   ;;  %vm991_vm13 = vcmask 64512  }
  0x2a   : > { %v3123_v7 = vld [vmem:[%s4514_s27 + $0x40] sm:$0xff]  ;;  %v2854_v9 = vld [vmem:[%s685_s21 + $0x8] sm:$0xf0]  ;;  %v3114_v16 = vld [vmem:[%s685_s21 + $0x4] sm:$0xf0]  ;;  %3264 = vrcp.f32 %v3467_v38  ;;  %s4522_s7 = sld [smem:[#allocation20_spill]] }
  0x2b   : > { %v3113_v8 = vld [vmem:[%s685_s21 + $0x4] sm:$0xf]  ;;  %v3116_v13 = vld [vmem:[%s4514_s27 + $0x8] sm:$0xff]  ;;  %v2852_v15 = vld [vmem:[%s685_s21] sm:$0xf]  ;;  %s4523_s9 = sld [smem:[#allocation22_spill]] }
  0x2c   : > { %807 = vmatpush.bf16.msra.mxu0 %v3121_v2  ;;  %v2857_v11 = vor.u32 %v3113_v8, %v2854_v9  ;;  %v3115_v14 = vld [vmem:[%s4514_s27] sm:$0xff]  ;;  %v2853_v17 = vor.u32 %v3114_v16, %v2852_v15  ;;  %v3128_v60 = vld [vmem:[%s4520_s8 + $0x8] sm:$0xff]  ;;  %s4485_s5 = smov 72   ;;  %s4475_s29 = smov 112   ;;  %vm1076_vm14 = vcmask 1041408   ;;  %vm1028_vm15 = vcmask 162816  }
  0x2d   : > { %825 = vmatpush.bf16.msra.mxu1 %v3125_v3  ;;  %v3244_v18 = vld [vmem:[%s4516_s24] ss:$0 sm:$0xff]  ;;  %971 = vmatpush.bf16.msra.mxu2 %v3128_v60  ;;  %s4465_s24 = smov 104   ;;  %s4473_s23 = smov 64  }
  0x2e   : > { %846 = vst.msk [vmem:[#allocation2 + $0x10] sm:$0xf] %vm845_vm1, %v3244_v18  ;;  %v3243_v19 = vld [vmem:[%s4517_s0] ss:$0 sm:$0xff]  ;;  %3157 = vmatpush.bf16.msra.mxu3 %v3128_v60  ;;  %s4524_s3 = sld [smem:[#allocation14_spill]]  ;;  %s4471_s21 = smov 56  }
  0x2f   : > { %s4519_s22 = smov %s4518_s30  ;;  %v834_v25 = vld [vmem:[%s4518_s30] sm:$0xff]  ;;  %s4467_s0 = smov 40  }
  0x30   : > { %808 = vmatpush.bf16.msra.mxu0 %v3120_v4  ;;  %v835_v31 = vld [vmem:[%s4519_s22 + $0x8] sm:$0xff]  ;;  %v3265_v39 = vpop.eup %3264  ;;  %v3127_v63 = vld [vmem:[%s4520_s8] sm:$0xff]  ;;  %s4483_s30 = smov 8   ;;  %s4526_s10 = sld [smem:[#allocation23_spill]] }
  0x31   : > { %826 = vmatpush.bf16.msra.mxu1 %v3124_v5  ;;  %v862_v40 = vmul.f32 32.0, %v3265_v39  ;;  %vm866_vm3 = vweird.f32 %v3265_v39  ;;  %972 = vmatpush.bf16.msra.mxu2 %v3127_v63  ;;  %s4527_s11 = sld [smem:[#allocation24_spill]] }
  0x32   : > { %3158 = vmatpush.bf16.msra.mxu3 %v3127_v63 }
  0x33   : > { %v863_v41 = vsub.f32 1.0, %v862_v40 }
  0x34   : > { %809 = vmatpush.bf16.msra.mxu0 %v3119_v6 }
  0x35   : > { %827 = vmatpush.bf16.msra.mxu1 %v3123_v7  ;;  %v3692_v20 = vld [vmem:[#allocation2 + $0x10] sm:$0xf]  ;;  %v864_v42 = vmul.f32 %v3265_v39, %v863_v41 }
  0x36   : > { %v858_v21 = vsel %vm845_vm1, %v3692_v20, 0.0 }
  0x37   : > { %859 = vadd.xlane.f32.xlu1 %v858_v21  ;;  %v865_v43 = vadd.f32 %v3265_v39, %v864_v42 }
  0x38   : > { %810 = vmatpush.bf16.msra.mxu0 %v3118_v10  ;;  %2906 = vmatmul.msk.bf16.vlgmr.msra.gmra.mxu1 %vm802_vm0, %v2857_v11  ;;  %vm1035_vm0 = vcmask 158720  }
  0x39   : > { %v3712_v44 = vsel %vm866_vm3, %v3265_v39, %v865_v43  ;;  %vm1470_vm3 = vcmask 130048  }
  0x3c   : > { %811 = vmatpush.bf16.msra.mxu0 %v3117_v12 }
  0x40   : > { %812 = vmatpush.bf16.msra.mxu0 %v3116_v13 }
  0x44   : > { %813 = vmatpush.bf16.msra.mxu0 %v3115_v14 }
  0x47   : > { %814 = vmatmul.bf16.vlgmr.msra.gmra.mxu0 %v2853_v17 }
  0xaa   : > { %v860_v49 = vpop.xlane.xlu1 %859 }
  0xab   : > { %v870_v53 = vmul.f32 %v3712_v44, %v860_v49 }
  0xad   : > { %v3721_v55 = vsub.f32 %v3692_v20, %v870_v53 }
  0xaf   : > { %v876_v58 = vmul.f32 %v3721_v55, %v3721_v55 }
  0xb1   : > { %v883_v59 = vsel %vm845_vm1, %v876_v58, 0.0 }
  0xb5   : > { %v829_v22 = vpop.f32.mrf.mxu1 }
  0xbd   : > { %v831_v30 = vpop.f32.mrf.mxu1 }
  0xc4   : > { %v815_v23 = vpop.f32.mrf.mxu0 }
  0xc5   : > { %v816_v24 = vadd.f32 %v3243_v19, %v815_v23 }
  0xc7   : > { %v830_v26 = vadd.f32 %v829_v22, %v816_v24  ;;  %v3245_v22 = vld [vmem:[%s4521_s25] ss:$0 sm:$0xff] }
  0xc9   : > { %v836_v27 = vadd.f32 %v834_v25, %v830_v26 }
  0xcb   : > { %839 = vst.msk [vmem:[#allocation2] sm:$0xff] %vm838_vm2, %v836_v27 }
  0xcc   : > { %v817_v28 = vpop.f32.mrf.mxu0 }
  0xcd   : > { %v818_v29 = vadd.f32 %v3243_v19, %v817_v28 }
  0xcf   : > { %v832_v32 = vadd.f32 %v831_v30, %v818_v29  ;;  %v3246_v29 = vld [vmem:[%s4522_s7] ss:$0 sm:$0xff] }
  0xd1   : > { %v837_v33 = vadd.f32 %v835_v31, %v832_v32 }
  0xd2   : > { %v3703_v34 = vld [vmem:[#allocation2] sm:$0xff] }
  0xd3   : > { %840 = vst.msk [vmem:[#allocation2 + $0x8] sm:$0xff] %vm838_vm2, %v837_v33  ;;  %v852_v35 = vsel %vm838_vm2, %v3703_v34, 0.0 }
  0xd4   : > { %853 = vadd.xlane.f32.xlu0 %v852_v35 }
  0xda   : > { %v3708_v36 = vld [vmem:[#allocation2 + $0x8] sm:$0xff] }
  0xdb   : > { %v855_v37 = vsel %vm838_vm2, %v3708_v36, 0.0 }
  0xdc   : > { %856 = vadd.xlane.f32.xlu0 %v855_v37 }
 0x147   : > { %v854_v45 = vpop.xlane.xlu0 %853 }
 0x148   : > { %v868_v46 = vmul.f32 %v3712_v44, %v854_v45 }
 0x14a   : > { %v871_v47 = vsub.f32 %v3703_v34, %v868_v46  ;;  %v3247_v46 = vld [vmem:[%s4523_s9] ss:$0 sm:$0xff] }
 0x14c   : > { %v874_v48 = vmul.f32 %v871_v47, %v871_v47 }
 0x14e   : > { %v877_v50 = vsel %vm838_vm2, %v874_v48, 0.0 }
 0x14f   : > { %878 = vadd.xlane.f32.xlu1 %v877_v50  ;;  %v857_v51 = vpop.xlane.xlu0 %856 }
 0x150   : > { %v869_v52 = vmul.f32 %v3712_v44, %v857_v51 }
 0x152   : > { %v872_v54 = vsub.f32 %v3708_v36, %v869_v52 }
 0x154   : > { %v875_v56 = vmul.f32 %v872_v54, %v872_v54 }
 0x156   : > { %v880_v57 = vsel %vm838_vm2, %v875_v56, 0.0 }
 0x157   : > { %881 = vadd.xlane.f32.xlu2 %v880_v57 }
 0x15f   : > { %884 = vadd.xlane.f32.xlu2 %v883_v59 }
 0x1c2   : > { %v879_v61 = vpop.xlane.xlu1 %878 }
 0x1c3   : > { %v886_v62 = vmul.f32 %v879_v61, %v3712_v44 }
 0x1c5   : > { %v889_v0 = vadd.f32 1e-06, %v886_v62 }
 0x1c7   : > { %3266 = vrsqrt.f32 %v889_v0  ;;  %vm898_vm5 = vweird.f32 %v889_v0 }
 0x1ca   : > { %v882_v1 = vpop.xlane.xlu2 %881 }
 0x1cb   : > { %v887_v2 = vmul.f32 %v882_v1, %v3712_v44 }
 0x1cd   : > { %v3267_v3 = vpop.eup %3266  ;;  %v890_v4 = vadd.f32 1e-06, %v887_v2 }
 0x1ce   : > { %v893_v5 = vmul.f32 %v3267_v3, %v889_v0  ;;  %vm899_vm4 = vweird.f32 %v3267_v3 }
 0x1cf   : > { %3268 = vrsqrt.f32 %v890_v4  ;;  %vm900_vm6 = vmor %vm898_vm5, %vm899_vm4  ;;  %vm908_vm8 = vweird.f32 %v890_v4  ;;  %vm1474_vm4 = vcmask 195584  }
 0x1d0   : > { %v894_v6 = vmul.f32 %v3267_v3, %v893_v5 }
 0x1d2   : > { %v895_v7 = vmul.f32 0.5, %v894_v6  ;;  %v885_v8 = vpop.xlane.xlu2 %884 }
 0x1d3   : > { %v888_v9 = vmul.f32 %v885_v8, %v3712_v44 }
 0x1d4   : > { %v896_v10 = vsub.f32 1.5, %v895_v7 }
 0x1d5   : > { %v3269_v11 = vpop.eup %3268  ;;  %v891_v12 = vadd.f32 1e-06, %v888_v9 }
 0x1d6   : > { %v897_v13 = vmul.f32 %v3267_v3, %v896_v10  ;;  %v903_v14 = vmul.f32 %v3269_v11, %v890_v4  ;;  %vm909_vm7 = vweird.f32 %v3269_v11 }
 0x1d7   : > { %3270 = vrsqrt.f32 %v891_v12  ;;  %vm910_vm9 = vmor %vm908_vm8, %vm909_vm7  ;;  %vm918_vm11 = vweird.f32 %v891_v12 }
 0x1d8   : > { %v904_v15 = vmul.f32 %v3269_v11, %v903_v14  ;;  %v901_v16 = vsel %vm900_vm6, %v3267_v3, %v897_v13 }
 0x1d9   : > { %v922_v21 = vmul.f32 %v901_v16, %v871_v47 }
 0x1da   : > { %v905_v17 = vmul.f32 0.5, %v904_v15 }
 0x1db   : > { %v928_v28 = vmul.f32 %v3245_v22, %v922_v21 }
 0x1dc   : > { %v906_v18 = vsub.f32 1.5, %v905_v17  ;;  %v688_v17 = vld [vmem:[%s4524_s3] sm:$0xff] }
 0x1dd   : > { %v3271_v19 = vpop.eup %3270  ;;  %v934_v33 = vadd.f32 %v3246_v29, %v928_v28 }
 0x1de   : > { %v907_v23 = vmul.f32 %v3269_v11, %v906_v18  ;;  %v913_v24 = vmul.f32 %v3271_v19, %v891_v12  ;;  %vm919_vm10 = vweird.f32 %v3271_v19 }
 0x1df   : > { %vm920_vm12 = vmor %vm918_vm11, %vm919_vm10 }
 0x1e0   : > { %v911_v25 = vsel %vm910_vm9, %v3269_v11, %v907_v23  ;;  %v914_v26 = vmul.f32 %v3271_v19, %v913_v24 }
 0x1e1   : > { %v923_v27 = vmul.f32 %v911_v25, %v872_v54 }
 0x1e2   : > { %v915_v30 = vmul.f32 0.5, %v914_v26 }
 0x1e3   : > { %v929_v31 = vmul.f32 %v3245_v22, %v923_v27 }
 0x1e4   : > { %v916_v32 = vsub.f32 1.5, %v915_v30 }
 0x1e5   : > { %v935_v35 = vadd.f32 %v3246_v29, %v929_v31 }
 0x1e6   : > { %v917_v37 = vmul.f32 %v3271_v19, %v916_v32 }
 0x1e7   : > { %v941_v38 = vpack.c.bf16 %v935_v35, %v934_v33 }
 0x1e8   : > { %v921_v39 = vsel %vm920_vm12, %v3271_v19, %v917_v37 }
 0x1e9   : > { %2915 = vmatmul.msk.bf16.vlgmr.msra.gmra.mxu2 %vm838_vm2, %v941_v38  ;;  %v924_v40 = vmul.f32 %v921_v39, %v3721_v55 }
 0x1eb   : > { %v930_v41 = vmul.f32 %v3245_v22, %v924_v40 }
 0x1ed   : > { %v936_v42 = vadd.f32 %v3246_v29, %v930_v41 }
 0x1ef   : > { %v942_v43 = vpack.c.bf16 %v936_v42, %v936_v42 }
 0x1f1   : > { %2916 = vmatmul.msk.bf16.vlgmr.msra.gmra.mxu3 %vm838_vm2, %v942_v43 }
 0x26c   : > { %v974_v45 = vpop.f32.mrf.mxu2 }
 0x26d   : > { %v975_v49 = vadd.f32 %v3247_v46, %v974_v45 }
 0x274   : > { %v976_v47 = vpop.f32.mrf.mxu2  ;;  %v979_v48 = vpop.f32.mrf.mxu3 }
 0x275   : > { %v977_v50 = vadd.f32 %v3247_v46, %v976_v47  ;;  %v980_v51 = vadd.f32 %v3247_v46, %v979_v48 }
 0x277   : > { %v3748_v52 = vpack.c.bf16 %v977_v50, %v975_v49  ;;  %v3750_v53 = vpack.c.bf16 %v980_v51, %v980_v51 }
 0x279   : > { %987 = vrot.lane.b32.xlu2 %v3748_v52, %s3468_s6  ;;  %1104 = vrot.lane.b32.xlu1 %v3750_v53, %s4489_s26 }
 0x27a   : > { %989 = vrot.lane.b32.xlu0 %v3750_v53, %s3468_s6 }
 0x27c   : > { %v981_v54 = vpop.f32.mrf.mxu3 }
 0x281   : > { %1098 = vrot.lane.b32.xlu2 %v3748_v52, %s4487_s2  ;;  %1215 = vrot.lane.b32.xlu1 %v3750_v53, %s4477_s1 }
 0x282   : > { %1102 = vrot.lane.b32.xlu0 %v3748_v52, %s4489_s26 }
 0x289   : > { %1326 = vrot.lane.b32.xlu2 %v3750_v53, %s4485_s5  ;;  %1213 = vrot.lane.b32.xlu1 %v3748_v52, %s4477_s1  ;;  %s4530_s1 = smov 72  }
 0x28a   : > { %1100 = vrot.lane.b32.xlu0 %v3750_v53, %s4487_s2 }
 0x291   : > { %1209 = vrot.lane.b32.xlu2 %v3748_v52, %s4475_s29  ;;  %1320 = vrot.lane.b32.xlu1 %v3748_v52, %s4465_s24 }
 0x292   : > { %1324 = vrot.lane.b32.xlu0 %v3748_v52, %s4485_s5  ;;  %s4535_s5 = smov 56  }
 0x299   : > { %1322 = vrot.lane.b32.xlu2 %v3750_v53, %s4465_s24  ;;  %s4525_s24 = smov %s4524_s3  ;;  %s4469_s3 = smov 48  }
 0x29a   : > { %1211 = vrot.lane.b32.xlu0 %v3750_v53, %s4475_s29  ;;  %v689_v27 = vld [vmem:[%s4525_s24 + $0x8] sm:$0xff]  ;;  %v690_v50 = vld [vmem:[%s4525_s24 + $0x10] sm:$0xf]  ;;  %s4531_s29 = smov 80  }
 0x2a1   : > { %1067 = vrot.lane.b32.xlu2 %v3750_v53, %s4473_s23 }
 0x2d3   : > { %v988_v55 = vpop.permute.xlu2 %987 }
 0x2d4   : > { %v999_v3 = vsel %vm991_vm13, %v988_v55, 0 }
 0x2db   : > { %v1099_v56 = vpop.permute.xlu2 %1098 }
 0x2e3   : > { %v1327_v57 = vpop.permute.xlu2 %1326 }
 0x2e4   : > { %v1338_v5 = vsel %vm991_vm13, %v1327_v57, 0 }
 0x2eb   : > { %v1105_v58 = vpop.permute.xlu1 %1104  ;;  %v1210_v59 = vpop.permute.xlu2 %1209 }
 0x2ec   : > { %v990_v60 = vpop.permute.xlu0 %989  ;;  %v1116_v61 = vsel %vm991_vm13, %v1105_v58, 0 }
 0x2ed   : > { %v1002_v62 = vsel %vm991_vm13, %v990_v60, 0  ;;  %1124 = vmatpush.bf16.xpose.msrb.mxu2 %v1116_v61 }
 0x2ee   : > { %1010 = vmatpush.bf16.xpose.msrb.mxu3 %v1002_v62 }
 0x2f3   : > { %v1216_v63 = vpop.permute.xlu1 %1215  ;;  %v1323_v0 = vpop.permute.xlu2 %1322 }
 0x2f4   : > { %v1227_v1 = vsel %vm991_vm13, %v1216_v63, 0  ;;  %v1103_v2 = vpop.permute.xlu0 %1102 }
 0x2f5   : > { %v1113_v4 = vsel %vm991_vm13, %v1103_v2, 0 }
 0x2f6   : > { %1011 = vmatpush.bf16.xpose.msrb.mxu3 %v999_v3  ;;  %1125 = vmatpush.bf16.xpose.msrb.mxu2 %v1113_v4 }
 0x2fb   : > { %v1214_v6 = vpop.permute.xlu1 %1213  ;;  %v1068_v7 = vpop.permute.xlu2 %1067 }
 0x2fc   : > { %v1224_v8 = vsel %vm991_vm13, %v1214_v6, 0  ;;  %v1101_v9 = vpop.permute.xlu0 %1100  ;;  %v1078_v10 = vsel %vm1076_vm14, %v1068_v7, 0 }
 0x2fd   : > { %2917 = vmatmul.msk.bf16.vlgmr.msrb.gmra.mxu3 %vm991_vm13, %v3748_v52  ;;  %2921 = vmatmul.msk.bf16.vlgmr.msrb.gmra.mxu2 %vm991_vm13, %v1099_v56 }
 0x2fe   : > { %1235 = vmatpush.bf16.xpose.msra.mxu3 %v1227_v1  ;;  %1346 = vmatpush.bf16.xpose.msra.mxu2 %v1338_v5 }
 0x2ff   : > { %1086 = vmatpush.bf16.msrb.mxu1 %v1078_v10 }
 0x303   : > { %v1321_v13 = vpop.permute.xlu1 %1320 }
 0x304   : > { %v1325_v11 = vpop.permute.xlu0 %1324 }
 0x305   : > { %v1335_v12 = vsel %vm991_vm13, %v1325_v11, 0 }
 0x306   : > { %1236 = vmatpush.bf16.xpose.msra.mxu3 %v1224_v8  ;;  %1347 = vmatpush.bf16.xpose.msra.mxu2 %v1335_v12 }
 0x30c   : > { %v1212_v14 = vpop.permute.xlu0 %1211 }
 0x30d   : > { %2918 = vmatmul.msk.bf16.gmra.mxu3 %vm991_vm13, %v3750_v53  ;;  %2922 = vmatmul.msk.bf16.gmra.mxu2 %vm991_vm13, %v1101_v9 }
 0x31d   : > { %2925 = vmatmul.msk.bf16.vlgmr.msra.gmra.mxu3 %vm991_vm13, %v1210_v59  ;;  %2929 = vmatmul.msk.bf16.vlgmr.msra.gmra.mxu2 %vm991_vm13, %v1321_v13 }
 0x32d   : > { %2926 = vmatmul.msk.bf16.gmra.mxu3 %vm991_vm13, %v1212_v14  ;;  %2930 = vmatmul.msk.bf16.gmra.mxu2 %vm991_vm13, %v1323_v0 }
 0x380   : > { %v1013_v15 = vpop.f32.mrf.mxu3  ;;  %v1127_v16 = vpop.f32.mrf.mxu2 }
 0x381   : > { %v1022_v18 = vmul.f32 0.35355338, %v1013_v15  ;;  %v1136_v19 = vmul.f32 0.35355338, %v1127_v16 }
 0x383   : > { %v3804_v21 = vadd.f32 %v1022_v18, %v688_v17  ;;  %v3806_v22 = vadd.f32 %v1136_v19, %v688_v17 }
 0x385   : > { %v1029_v23 = vsel %vm1028_vm15, %v3804_v21, -inf  ;;  %v1142_v24 = vsel %vm1028_vm15, %v3806_v22, -inf }
 0x386   : > { %1030 = vmax.xlane.f32.xlu1 %v1029_v23  ;;  %1143 = vmax.xlane.f32.xlu2 %v1142_v24 }
 0x388   : > { %v1015_v25 = vpop.f32.mrf.mxu3  ;;  %v1129_v26 = vpop.f32.mrf.mxu2 }
 0x389   : > { %v1023_v28 = vmul.f32 0.35355338, %v1015_v25  ;;  %v1137_v29 = vmul.f32 0.35355338, %v1129_v26 }
 0x38b   : > { %v3815_v30 = vadd.f32 %v1023_v28, %v689_v27  ;;  %v3817_v31 = vadd.f32 %v1137_v29, %v689_v27 }
 0x38d   : > { %v1032_v32 = vsel %vm1028_vm15, %v3815_v30, -inf  ;;  %v1145_v33 = vsel %vm1028_vm15, %v3817_v31, -inf }
 0x38e   : > { %1033 = vmax.xlane.f32.xlu0 %v1032_v32  ;;  %1146 = vmax.xlane.f32.xlu1 %v1145_v33 }
 0x390   : > { %v1018_v35 = vpop.f32.mrf.mxu3  ;;  %v1132_v37 = vpop.f32.mrf.mxu2 }
 0x391   : > { %v1138_v49 = vmul.f32 0.35355338, %v1132_v37  ;;  %v1024_v54 = vmul.f32 0.35355338, %v1018_v35 }
 0x393   : > { %v3832_v51 = vadd.f32 %v1138_v49, %v690_v50  ;;  %v3836_v57 = vadd.f32 %v1024_v54, %v690_v50 }
 0x395   : > { %v1148_v56 = vsel %vm1035_vm0, %v3832_v51, -inf  ;;  %v1036_v61 = vsel %vm1035_vm0, %v3836_v57, -inf }
 0x398   : > { %v1020_v38 = vpop.f32.mrf.mxu3  ;;  %v1134_v39 = vpop.f32.mrf.mxu2 }
 0x39e   : > { %1177 = vrot.lane.b32.xlu2 %v3748_v52, %s4471_s21 }
 0x3a0   : > { %v1238_v40 = vpop.f32.mrf.mxu3  ;;  %v1349_v41 = vpop.f32.mrf.mxu2 }
 0x3a1   : > { %v1358_v55 = vmul.f32 0.35355338, %v1349_v41  ;;  %v1247_v58 = vmul.f32 0.35355338, %v1238_v40 }
 0x3a2   : > { %1065 = vrot.lane.b32.xlu0 %v3748_v52, %s4473_s23  ;;  %s4528_s23 = smov 88  }
 0x3a3   : > { %v3838_v59 = vadd.f32 %v1358_v55, %v688_v17  ;;  %v3842_v62 = vadd.f32 %v1247_v58, %v688_v17 }
 0x3a5   : > { %v1364_v0 = vsel %vm1028_vm15, %v3838_v59, -inf  ;;  %v1253_v3 = vsel %vm1028_vm15, %v3842_v62, -inf }
 0x3a7   : > { %1179 = vrot.lane.b32.xlu1 %v3750_v53, %s4471_s21  ;;  %s4529_s21 = smov 120  }
 0x3a8   : > { %v1240_v42 = vpop.f32.mrf.mxu3  ;;  %v1351_v43 = vpop.f32.mrf.mxu2 }
 0x3a9   : > { %v1248_v60 = vmul.f32 0.35355338, %v1240_v42  ;;  %v1359_v2 = vmul.f32 0.35355338, %v1351_v43 }
 0x3ab   : > { %v3846_v1 = vadd.f32 %v1248_v60, %v689_v27  ;;  %v3854_v7 = vadd.f32 %v1359_v2, %v689_v27 }
 0x3ad   : > { %v1256_v6 = vsel %vm1028_vm15, %v3846_v1, -inf  ;;  %v1367_v10 = vsel %vm1028_vm15, %v3854_v7, -inf }
 0x3b0   : > { %v1243_v45 = vpop.f32.mrf.mxu3  ;;  %v1354_v46 = vpop.f32.mrf.mxu2 }
 0x3b1   : > { %v1249_v63 = vmul.f32 0.35355338, %v1243_v45  ;;  %v1360_v5 = vmul.f32 0.35355338, %v1354_v46 }
 0x3b3   : > { %v3850_v4 = vadd.f32 %v1249_v63, %v690_v50  ;;  %v3858_v9 = vadd.f32 %v1360_v5, %v690_v50 }
 0x3b5   : > { %v1259_v8 = vsel %vm1035_vm0, %v3850_v4, -inf  ;;  %v1370_v11 = vsel %vm1035_vm0, %v3858_v9, -inf }
 0x3b8   : > { %v1245_v47 = vpop.f32.mrf.mxu3  ;;  %v1356_v48 = vpop.f32.mrf.mxu2 }
 0x3c7   : > { %1149 = vmax.xlane.f32.xlu2 %v1148_v56 }
 0x3cc   : > { %1037 = vmax.xlane.f32.xlu0 %v1036_v61 }
 0x3cf   : > { %1365 = vmax.xlane.f32.xlu2 %v1364_v0 }
 0x3d1   : > { %1254 = vmax.xlane.f32.xlu1 %v1253_v3 }
 0x3d4   : > { %1257 = vmax.xlane.f32.xlu0 %v1256_v6 }
 0x3d7   : > { %1260 = vmax.xlane.f32.xlu2 %v1259_v8 }
 0x3d9   : > { %1368 = vmax.xlane.f32.xlu1 %v1367_v10 }
 0x3dc   : > { %1371 = vmax.xlane.f32.xlu0 %v1370_v11 }
 0x3f9   : > { %v1031_v12 = vpop.xlane.xlu1 %1030  ;;  %v1144_v13 = vpop.xlane.xlu2 %1143 }
 0x3fa   : > { %v1039_v14 = vsub.f32 %v3804_v21, %v1031_v12  ;;  %v1151_v15 = vsub.f32 %v3806_v22, %v1144_v13 }
 0x3fc   : > { %v1042_v16 = vmul.f32 1.442695, %v1039_v14  ;;  %v1154_v17 = vmul.f32 1.442695, %v1151_v15 }
 0x3fe   : > { %3272 = vpow2.f32 %v1042_v16 }
 0x3ff   : > { %3274 = vpow2.f32 %v1154_v17 }
 0x401   : > { %v1034_v18 = vpop.xlane.xlu0 %1033  ;;  %v1147_v19 = vpop.xlane.xlu1 %1146 }
 0x402   : > { %v1040_v23 = vsub.f32 %v3815_v30, %v1034_v18  ;;  %v1152_v24 = vsub.f32 %v3817_v31, %v1147_v19  ;;  %v1178_v38 = vpop.permute.xlu2 %1177 }
 0x404   : > { %v3868_v25 = vpop.eup %3272  ;;  %v1044_v26 = vmul.f32 1.442695, %v1040_v23  ;;  %v1156_v27 = vmul.f32 1.442695, %v1152_v24 }
 0x405   : > { %v3870_v28 = vpop.eup %3274  ;;  %v1048_v21 = vsel %vm1028_vm15, %v3868_v25, 0.0 }
 0x406   : > { %3276 = vpow2.f32 %v1044_v26  ;;  %1049 = vadd.xlane.f32.xlu0 %v1048_v21  ;;  %v1160_v22 = vsel %vm1028_vm15, %v3870_v28, 0.0 }
 0x407   : > { %3278 = vpow2.f32 %v1156_v27  ;;  %1161 = vadd.xlane.f32.xlu1 %v1160_v22 }
 0x40c   : > { %v3876_v29 = vpop.eup %3276 }
 0x40d   : > { %v3878_v30 = vpop.eup %3278  ;;  %v1051_v31 = vsel %vm1028_vm15, %v3876_v29, 0.0 }
 0x40e   : > { %1052 = vadd.xlane.f32.xlu2 %v1051_v31  ;;  %v1163_v32 = vsel %vm1028_vm15, %v3878_v30, 0.0 }
 0x40f   : > { %1164 = vadd.xlane.f32.xlu0 %v1163_v32 }
 0x414   : > { %v1066_v33 = vpop.permute.xlu0 %1065 }
 0x415   : > { %1087 = vmatpush.bf16.msrb.mxu1 %v1066_v33 }
 0x419   : > { %v1180_v35 = vpop.permute.xlu1 %1179 }
 0x41a   : > { %v1189_v37 = vsel %vm1076_vm14, %v1180_v35, 0 }
 0x41b   : > { %1197 = vmatpush.bf16.msrb.mxu0 %v1189_v37 }
 0x41f   : > { %1198 = vmatpush.bf16.msrb.mxu0 %v1178_v38 }
 0x43a   : > { %v1150_v39 = vpop.xlane.xlu2 %1149 }
 0x43b   : > { %v1153_v40 = vsub.f32 %v3832_v51, %v1150_v39 }
 0x43d   : > { %v1158_v41 = vmul.f32 1.442695, %v1153_v40 }
 0x43f   : > { %3280 = vpow2.f32 %v1158_v41  ;;  %v1038_v42 = vpop.xlane.xlu0 %1037 }
 0x440   : > { %v1041_v43 = vsub.f32 %v3836_v57, %v1038_v42 }
 0x442   : > { %v1046_v45 = vmul.f32 1.442695, %v1041_v43  ;;  %v1366_v46 = vpop.xlane.xlu2 %1365 }
 0x443   : > { %v1373_v47 = vsub.f32 %v3838_v59, %v1366_v46 }
 0x444   : > { %3282 = vpow2.f32 %v1046_v45  ;;  %v1255_v48 = vpop.xlane.xlu1 %1254 }
 0x445   : > { %v3888_v49 = vpop.eup %3280  ;;  %v1262_v50 = vsub.f32 %v3842_v62, %v1255_v48  ;;  %v1376_v54 = vmul.f32 1.442695, %v1373_v47 }
 0x446   : > { %v1166_v55 = vsel %vm1035_vm0, %v3888_v49, 0.0 }
 0x447   : > { %v1265_v51 = vmul.f32 1.442695, %v1262_v50  ;;  %v1258_v56 = vpop.xlane.xlu0 %1257  ;;  %1167 = vadd.xlane.f32.xlu1 %v1166_v55 }
 0x448   : > { %v1263_v58 = vsub.f32 %v3846_v1, %v1258_v56 }
 0x449   : > { %3284 = vpow2.f32 %v1265_v51 }
 0x44a   : > { %v3894_v57 = vpop.eup %3282  ;;  %3286 = vpow2.f32 %v1376_v54  ;;  %v1267_v59 = vmul.f32 1.442695, %v1263_v58  ;;  %v1261_v11 = vpop.xlane.xlu2 %1260 }
 0x44b   : > { %v1054_v60 = vsel %vm1035_vm0, %v3894_v57, 0.0  ;;  %v1264_v16 = vsub.f32 %v3850_v4, %v1261_v11 }
 0x44c   : > { %3288 = vpow2.f32 %v1267_v59  ;;  %v1369_v61 = vpop.xlane.xlu1 %1368  ;;  %1055 = vadd.xlane.f32.xlu0 %v1054_v60 }
 0x44d   : > { %v1374_v62 = vsub.f32 %v3854_v7, %v1369_v61  ;;  %v1269_v18 = vmul.f32 1.442695, %v1264_v16 }
 0x44f   : > { %v3899_v63 = vpop.eup %3284  ;;  %v1378_v0 = vmul.f32 1.442695, %v1374_v62  ;;  %v1372_v10 = vpop.xlane.xlu0 %1371 }
 0x450   : > { %v3901_v2 = vpop.eup %3286  ;;  %v1271_v1 = vsel %vm1028_vm15, %v3899_v63, 0.0  ;;  %v1375_v26 = vsub.f32 %v3858_v9, %v1372_v10 }
 0x451   : > { %3290 = vpow2.f32 %v1378_v0  ;;  %1272 = vadd.xlane.f32.xlu1 %v1271_v1  ;;  %v1382_v6 = vsel %vm1028_vm15, %v3901_v2, 0.0 }
 0x452   : > { %v3905_v3 = vpop.eup %3288  ;;  %v1380_v4 = vmul.f32 1.442695, %v1375_v26 }
 0x453   : > { %v1274_v5 = vsel %vm1028_vm15, %v3905_v3, 0.0 }
 0x454   : > { %1275 = vadd.xlane.f32.xlu2 %v1274_v5  ;;  %1383 = vadd.xlane.f32.xlu0 %v1382_v6 }
 0x457   : > { %v3911_v7 = vpop.eup %3290 }
 0x458   : > { %v1385_v8 = vsel %vm1028_vm15, %v3911_v7, 0.0 }
 0x459   : > { %1386 = vadd.xlane.f32.xlu1 %v1385_v8 }
 0x468   : > { %1401 = vrot.lane.b32.xlu0 %v3750_v53, %s4467_s0 }
 0x46c   : > { %1290 = vrot.lane.b32.xlu2 %v3750_v53, %s4469_s3 }
 0x470   : > { %1399 = vrot.lane.b32.xlu0 %v3748_v52, %s4467_s0  ;;  %s4481_s0 = smov 16  }
 0x472   : > { %1288 = vrot.lane.b32.xlu1 %v3748_v52, %s4469_s3  ;;  %s4479_s3 = smov 24  }
 0x479   : > { %v1050_v12 = vpop.xlane.xlu0 %1049 }
 0x47a   : > { %v1162_v13 = vpop.xlane.xlu1 %1161  ;;  %3292 = vrcp.f32 %v1050_v12 }
 0x47b   : > { %3294 = vrcp.f32 %v1162_v13 }
 0x480   : > { %v3293_v17 = vpop.eup %3292 }
 0x481   : > { %v1053_v14 = vpop.xlane.xlu2 %1052  ;;  %v3295_v53 = vpop.eup %3294  ;;  %v1060_v24 = vmul.f32 %v3293_v17, %v3868_v25 }
 0x482   : > { %v1165_v15 = vpop.xlane.xlu0 %1164  ;;  %3296 = vrcp.f32 %v1053_v14  ;;  %v1172_v27 = vmul.f32 %v3295_v53, %v3870_v28 }
 0x483   : > { %3298 = vrcp.f32 %v1165_v15 }
 0x484   : > { %3300 = vpow2.f32 %v1269_v18 }
 0x485   : > { %3302 = vpow2.f32 %v1380_v4 }
 0x488   : > { %v3297_v19 = vpop.eup %3296 }
 0x489   : > { %v3299_v23 = vpop.eup %3298  ;;  %v1061_v52 = vmul.f32 %v3297_v19, %v3876_v29 }
 0x48a   : > { %v1173_v21 = vmul.f32 %v3299_v23, %v3878_v30  ;;  %v3301_v32 = vpop.eup %3300 }
 0x48b   : > { %v1063_v22 = vpack.c.bf16 %v1061_v52, %v1060_v24  ;;  %v1277_v25 = vsel %vm1035_vm0, %v3301_v32, 0.0  ;;  %v3303_v29 = vpop.eup %3302 }
 0x48c   : > { %v1175_v31 = vpack.c.bf16 %v1173_v21, %v1172_v27  ;;  %v1388_v9 = vsel %vm1035_vm0, %v3303_v29, 0.0  ;;  %v3130_v27 = vld [vmem:[%s4526_s10 + $0x8] sm:$0xff] }
 0x48d   : > { %2919 = vmatmul.msk.bf16.vlgmr.msrb.gmra.mxu1 %vm1028_vm15, %v1063_v22  ;;  %1508 = vmatpush.bf16.msrb.mxu3 %v3130_v27 }
 0x48e   : > { %2923 = vmatmul.msk.bf16.vlgmr.msrb.gmra.mxu0 %vm1028_vm15, %v1175_v31 }
 0x495   : > { %1278 = vadd.xlane.f32.xlu2 %v1277_v25 }
 0x49c   : > { %1389 = vadd.xlane.f32.xlu1 %v1388_v9 }
 0x4ba   : > { %v1168_v28 = vpop.xlane.xlu1 %1167 }
 0x4bb   : > { %3304 = vrcp.f32 %v1168_v28 }
 0x4bf   : > { %v1056_v30 = vpop.xlane.xlu0 %1055 }
 0x4c0   : > { %3306 = vrcp.f32 %v1056_v30 }
 0x4c1   : > { %v3305_v33 = vpop.eup %3304 }
 0x4c2   : > { %v1174_v35 = vmul.f32 %v3305_v33, %v3888_v49 }
 0x4c4   : > { %v1176_v37 = vpack.c.bf16 %v1174_v35, %v1174_v35  ;;  %v1273_v42 = vpop.xlane.xlu1 %1272 }
 0x4c6   : > { %v3307_v38 = vpop.eup %3306  ;;  %2924 = vmatmul.msk.bf16.gmra.mxu0 %vm1028_vm15, %v1176_v37 }
 0x4c7   : > { %v1276_v39 = vpop.xlane.xlu2 %1275  ;;  %v1062_v40 = vmul.f32 %v3307_v38, %v3894_v57  ;;  %v1384_v46 = vpop.xlane.xlu0 %1383 }
 0x4c9   : > { %v1064_v41 = vpack.c.bf16 %v1062_v40, %v1062_v40 }
 0x4cb   : > { %2920 = vmatmul.msk.bf16.gmra.mxu1 %vm1028_vm15, %v1064_v41 }
 0x4cc   : > { %v1387_v47 = vpop.xlane.xlu1 %1386 }
 0x4cd   : > { %3308 = vrcp.f32 %v1387_v47 }
 0x4ce   : > { %3310 = vrcp.f32 %v1384_v46 }
 0x4cf   : > { %v1291_v43 = vpop.permute.xlu2 %1290  ;;  %3312 = vrcp.f32 %v1276_v39 }
 0x4d0   : > { %v1300_v45 = vsel %vm1076_vm14, %v1291_v43, 0  ;;  %3314 = vrcp.f32 %v1273_v42 }
 0x4d1   : > { %1308 = vmatpush.bf16.msra.mxu1 %v1300_v45 }
 0x4d3   : > { %v3309_v50 = vpop.eup %3308 }
 0x4d4   : > { %v3311_v54 = vpop.eup %3310  ;;  %v1395_v51 = vmul.f32 %v3309_v50, %v3911_v7 }
 0x4d5   : > { %v3313_v55 = vpop.eup %3312  ;;  %v1394_v58 = vmul.f32 %v3311_v54, %v3901_v2 }
 0x4d6   : > { %v3315_v56 = vpop.eup %3314  ;;  %v1284_v57 = vmul.f32 %v3313_v55, %v3905_v3 }
 0x4d7   : > { %v1283_v60 = vmul.f32 %v3315_v56, %v3899_v63  ;;  %v1397_v61 = vpack.c.bf16 %v1395_v51, %v1394_v58  ;;  %v3248_v56 = vld [vmem:[%s4527_s11] ss:$0 sm:$0xff] }
 0x4d9   : > { %v1286_v0 = vpack.c.bf16 %v1284_v57, %v1283_v60 }
 0x4da   : > { %v1402_v48 = vpop.permute.xlu0 %1401 }
 0x4db   : > { %v1411_v49 = vsel %vm1076_vm14, %v1402_v48, 0 }
 0x4dc   : > { %1419 = vmatpush.bf16.msra.mxu0 %v1411_v49 }
 0x4e2   : > { %v1400_v59 = vpop.permute.xlu0 %1399 }
 0x4e3   : > { %1420 = vmatpush.bf16.msra.mxu0 %v1400_v59 }
 0x4e4   : > { %v1289_v62 = vpop.permute.xlu1 %1288 }
 0x4e5   : > { %1309 = vmatpush.bf16.msra.mxu1 %v1289_v62 }
 0x4e6   : > { %2931 = vmatmul.msk.bf16.vlgmr.msra.gmra.mxu0 %vm1028_vm15, %v1397_v61 }
 0x4e8   : > { %2927 = vmatmul.msk.bf16.vlgmr.msra.gmra.mxu1 %vm1028_vm15, %v1286_v0 }
 0x508   : > { %v1279_v1 = vpop.xlane.xlu2 %1278 }
 0x509   : > { %3316 = vrcp.f32 %v1279_v1 }
 0x50a   : > { %v1089_v13 = vpop.f32.mrf.mxu1 }
 0x50b   : > { %v1200_v5 = vpop.f32.mrf.mxu0 }
 0x50f   : > { %v3317_v6 = vpop.eup %3316  ;;  %v1390_v7 = vpop.xlane.xlu1 %1389 }
 0x510   : > { %3318 = vrcp.f32 %v1390_v7  ;;  %v1285_v2 = vmul.f32 %v3317_v6, %v3301_v32  ;;  %v3129_v32 = vld [vmem:[%s4526_s10] sm:$0xff] }
 0x511   : > { %1509 = vmatpush.bf16.msrb.mxu3 %v3129_v32 }
 0x512   : > { %v1287_v3 = vpack.c.bf16 %v1285_v2, %v1285_v2  ;;  %v1091_v14 = vpop.f32.mrf.mxu1 }
 0x513   : > { %v1202_v8 = vpop.f32.mrf.mxu0 }
 0x514   : > { %v3213_v10 = vpack.i.bf16 %v1202_v8, %v1200_v5  ;;  %2928 = vmatmul.msk.bf16.gmra.mxu1 %vm1028_vm15, %v1287_v3 }
 0x516   : > { %v3319_v63 = vpop.eup %3318  ;;  %3214 = vrot.lane.b32.xlu0 %v3213_v10, %s4483_s30 }
 0x517   : > { %v1396_v11 = vmul.f32 %v3319_v63, %v3303_v29 }
 0x519   : > { %v1398_v12 = vpack.c.bf16 %v1396_v11, %v1396_v11 }
 0x51b   : > { %2932 = vmatmul.msk.bf16.gmra.mxu0 %vm1028_vm15, %v1398_v12 }
 0x543   : > { %v1205_v15 = vpop.f32.mrf.mxu0 }
 0x548   : > { %v1094_v16 = vpop.f32.mrf.mxu1 }
 0x54b   : > { %v1207_v17 = vpop.f32.mrf.mxu0 }
 0x550   : > { %v1096_v53 = vpop.f32.mrf.mxu1 }
 0x563   : > { %v1422_v19 = vpop.f32.mrf.mxu0 }
 0x565   : > { %v1311_v18 = vpop.f32.mrf.mxu1 }
 0x56b   : > { %v1424_v52 = vpop.f32.mrf.mxu0 }
 0x56c   : > { %v3223_v26 = vpack.i.bf16 %v1424_v52, %v1422_v19  ;;  %v3132_v19 = vld [vmem:[%s4443_s14 + $0x8] sm:$0xff] }
 0x56d   : > { %v1313_v23 = vpop.f32.mrf.mxu1  ;;  %1644 = vmatpush.bf16.msrb.mxu1 %v3132_v19 }
 0x56e   : > { %v3218_v24 = vpack.i.bf16 %v1313_v23, %v1311_v18 }
 0x570   : > { %3219 = vrot.lane.b32.xlu0 %v3218_v24, %s4481_s0 }
 0x578   : > { %3224 = vrot.lane.b32.xlu0 %v3223_v26, %s4479_s3  ;;  %v3131_v26 = vld [vmem:[%s4443_s14] sm:$0xff] }
 0x579   : > { %1645 = vmatpush.bf16.msrb.mxu1 %v3131_v26 }
 0x580   : > { %1438 = vrot.lane.b32.xlu0 %v1205_v15, %s4483_s30 }
 0x588   : > { %v3215_v25 = vpop.permute.xlu0 %3214 }
 0x589   : > { %v3217_v9 = vunpack.i.h.bf16 %v3215_v25  ;;  %v3216_v28 = vunpack.i.l.bf16 %v3215_v25 }
 0x58b   : > { %v1467_v37 = vsel %vm991_vm13, %v1089_v13, %v3216_v28  ;;  %v1468_v38 = vsel %vm991_vm13, %v1091_v14, %v3217_v9 }
 0x591   : > { %v1316_v21 = vpop.f32.mrf.mxu1 }
 0x592   : > { %1450 = vrot.lane.b32.xlu0 %v1316_v21, %s4481_s0  ;;  %s4533_s0 = smov 64  }
 0x598   : > { %v1427_v22 = vpop.f32.mrf.mxu0 }
 0x599   : > { %1462 = vrot.lane.b32.xlu2 %v1427_v22, %s4479_s3  ;;  %v1318_v31 = vpop.f32.mrf.mxu1  ;;  %s4534_s3 = smov 104  }
 0x5a0   : > { %v1429_v4 = vpop.f32.mrf.mxu0 }
 0x5e2   : > { %v3220_v29 = vpop.permute.xlu0 %3219 }
 0x5e3   : > { %v3222_v30 = vunpack.i.h.bf16 %v3220_v29  ;;  %v3221_v33 = vunpack.i.l.bf16 %v3220_v29 }
 0x5e5   : > { %v1472_v41 = vsel %vm1470_vm3, %v1468_v38, %v3222_v30  ;;  %v1471_v42 = vsel %vm1470_vm3, %v1467_v37, %v3221_v33 }
 0x5ea   : > { %v3225_v35 = vpop.permute.xlu0 %3224 }
 0x5eb   : > { %v3227_v39 = vunpack.i.h.bf16 %v3225_v35  ;;  %v3226_v40 = vunpack.i.l.bf16 %v3225_v35 }
 0x5ed   : > { %v1475_v43 = vsel %vm1474_vm4, %v1471_v42, %v3226_v40  ;;  %v1476_v45 = vsel %vm1474_vm4, %v1472_v41, %v3227_v39  ;;  %v3249_v41 = vld [vmem:[%s4441_s12] ss:$0 sm:$0xff] }
 0x5ee   : > { %v1482_v46 = vpack.c.bf16 %v1476_v45, %v1475_v43 }
 0x5f0   : > { %2941 = vmatmul.msk.bf16.vlgmr.msrb.gmra.mxu3 %vm838_vm2, %v1482_v46 }
 0x5f2   : > { %v1439_v47 = vpop.permute.xlu0 %1438 }
 0x5f3   : > { %v1469_v48 = vsel %vm991_vm13, %v1094_v16, %v1439_v47  ;;  %v1463_v50 = vpop.permute.xlu2 %1462  ;;  %v3250_v47 = vld [vmem:[%s4442_s13] ss:$0 sm:$0xff] }
 0x604   : > { %v1451_v49 = vpop.permute.xlu0 %1450 }
 0x605   : > { %v1473_v54 = vsel %vm1470_vm3, %v1469_v48, %v1451_v49 }
 0x606   : > { %v1477_v55 = vsel %vm1474_vm4, %v1473_v54, %v1463_v50 }
 0x607   : > { %v1483_v51 = vpack.c.bf16 %v1477_v55, %v1477_v55 }
 0x609   : > { %2942 = vmatmul.msk.bf16.gmra.mxu3 %vm838_vm2, %v1483_v51 }
 0x673   : > { %v1511_v58 = vpop.f32.mrf.mxu3 }
 0x674   : > { %v1520_v57 = vadd.f32 %v1511_v58, %v3703_v34 }
 0x676   : > { %v3974_v59 = vadd.f32 %v3248_v56, %v1520_v57 }
 0x678   : > { %v1532_v60 = vsel %vm838_vm2, %v3974_v59, 0.0 }
 0x679   : > { %1533 = vadd.xlane.f32.xlu0 %v1532_v60 }
 0x67b   : > { %v1513_v61 = vpop.f32.mrf.mxu3 }
 0x67c   : > { %v1521_v62 = vadd.f32 %v1513_v61, %v3708_v36 }
 0x67e   : > { %v3979_v0 = vadd.f32 %v3248_v56, %v1521_v62 }
 0x680   : > { %v1535_v1 = vsel %vm838_vm2, %v3979_v0, 0.0 }
 0x681   : > { %1536 = vadd.xlane.f32.xlu1 %v1535_v1 }
 0x68c   : > { %v1516_v5 = vpop.f32.mrf.mxu3 }
 0x68d   : > { %v1522_v6 = vadd.f32 %v1516_v5, %v3692_v20 }
 0x68f   : > { %v3984_v7 = vadd.f32 %v3248_v56, %v1522_v6 }
 0x691   : > { %v1538_v34 = vsel %vm845_vm1, %v3984_v7, 0.0 }
 0x692   : > { %1539 = vadd.xlane.f32.xlu1 %v1538_v34 }
 0x694   : > { %v1518_v2 = vpop.f32.mrf.mxu3 }
 0x6ec   : > { %v1534_v3 = vpop.xlane.xlu0 %1533 }
 0x6ed   : > { %v1541_v8 = vmul.f32 %v1534_v3, %v3712_v44  ;;  %v3140_v3 = vld [vmem:[%s4445_s16 + $0x38] sm:$0xff] }
 0x6ee   : > { %1749 = vmatpush.bf16.msrb.mxu2 %v3140_v3 }
 0x6ef   : > { %v1544_v36 = vsub.f32 %v3974_v59, %v1541_v8  ;;  %v3139_v8 = vld [vmem:[%s4445_s16 + $0x30] sm:$0xff] }
 0x6f1   : > { %v1547_v10 = vmul.f32 %v1544_v36, %v1544_v36 }
 0x6f2   : > { %1750 = vmatpush.bf16.msrb.mxu2 %v3139_v8 }
 0x6f3   : > { %v1550_v63 = vsel %vm838_vm2, %v1547_v10, 0.0  ;;  %v3137_v10 = vld [vmem:[%s4445_s16 + $0x20] sm:$0xff] }
 0x6f4   : > { %v1537_v11 = vpop.xlane.xlu1 %1536  ;;  %1551 = vadd.xlane.f32.xlu1 %v1550_v63  ;;  %v3136_v63 = vld [vmem:[%s4445_s16 + $0x18] sm:$0xff] }
 0x6f5   : > { %v1542_v12 = vmul.f32 %v1537_v11, %v3712_v44  ;;  %v3135_v11 = vld [vmem:[%s4445_s16 + $0x10] sm:$0xff] }
 0x6f7   : > { %v1545_v20 = vsub.f32 %v3979_v0, %v1542_v12  ;;  %v3134_v12 = vld [vmem:[%s4445_s16 + $0x8] sm:$0xff] }
 0x6f9   : > { %v1548_v13 = vmul.f32 %v1545_v20, %v1545_v20 }
 0x6fb   : > { %v1553_v14 = vsel %vm838_vm2, %v1548_v13, 0.0 }
 0x6fc   : > { %1554 = vadd.xlane.f32.xlu2 %v1553_v14  ;;  %v3133_v14 = vld [vmem:[%s4445_s16] sm:$0xff] }
 0x705   : > { %v1540_v15 = vpop.xlane.xlu1 %1539 }
 0x706   : > { %v1543_v16 = vmul.f32 %v1540_v15, %v3712_v44 }
 0x708   : > { %v1546_v17 = vsub.f32 %v3984_v7, %v1543_v16 }
 0x70a   : > { %v1549_v53 = vmul.f32 %v1546_v17, %v1546_v17 }
 0x70c   : > { %v1556_v18 = vsel %vm845_vm1, %v1549_v53, 0.0 }
 0x70d   : > { %1557 = vadd.xlane.f32.xlu1 %v1556_v18 }
 0x767   : > { %v1552_v23 = vpop.xlane.xlu1 %1551 }
 0x768   : > { %v1559_v24 = vmul.f32 %v1552_v23, %v3712_v44 }
 0x76a   : > { %v1562_v52 = vadd.f32 1e-06, %v1559_v24 }
 0x76c   : > { %3320 = vrsqrt.f32 %v1562_v52  ;;  %vm1571_vm6 = vweird.f32 %v1562_v52 }
 0x76f   : > { %v1555_v27 = vpop.xlane.xlu2 %1554 }
 0x770   : > { %v1560_v21 = vmul.f32 %v1555_v27, %v3712_v44 }
 0x772   : > { %v3321_v22 = vpop.eup %3320  ;;  %v1563_v31 = vadd.f32 1e-06, %v1560_v21 }
 0x773   : > { %v1566_v4 = vmul.f32 %v3321_v22, %v1562_v52  ;;  %vm1572_vm5 = vweird.f32 %v3321_v22 }
 0x774   : > { %3322 = vrsqrt.f32 %v1563_v31  ;;  %vm1573_vm7 = vmor %vm1571_vm6, %vm1572_vm5  ;;  %vm1581_vm9 = vweird.f32 %v1563_v31 }
 0x775   : > { %v1567_v32 = vmul.f32 %v3321_v22, %v1566_v4 }
 0x777   : > { %v1568_v25 = vmul.f32 0.5, %v1567_v32 }
 0x779   : > { %v1569_v29 = vsub.f32 1.5, %v1568_v25 }
 0x77a   : > { %v3323_v9 = vpop.eup %3322 }
 0x77b   : > { %v1570_v28 = vmul.f32 %v3321_v22, %v1569_v29  ;;  %v1576_v30 = vmul.f32 %v3323_v9, %v1563_v31  ;;  %vm1582_vm8 = vweird.f32 %v3323_v9 }
 0x77c   : > { %vm1583_vm10 = vmor %vm1581_vm9, %vm1582_vm8 }
 0x77d   : > { %v1577_v33 = vmul.f32 %v3323_v9, %v1576_v30  ;;  %v1574_v35 = vsel %vm1573_vm7, %v3321_v22, %v1570_v28 }
 0x77e   : > { %v1595_v42 = vmul.f32 %v1574_v35, %v1544_v36  ;;  %v3138_v36 = vld [vmem:[%s4445_s16 + $0x28] sm:$0xff] }
 0x77f   : > { %v1578_v37 = vmul.f32 0.5, %v1577_v33  ;;  %1751 = vmatpush.bf16.msrb.mxu2 %v3138_v36 }
 0x780   : > { %v1558_v38 = vpop.xlane.xlu1 %1557  ;;  %v1601_v48 = vmul.f32 %v3249_v41, %v1595_v42 }
 0x781   : > { %v1579_v39 = vsub.f32 1.5, %v1578_v37  ;;  %v1561_v40 = vmul.f32 %v1558_v38, %v3712_v44 }
 0x782   : > { %v1607_v54 = vadd.f32 %v3250_v47, %v1601_v48 }
 0x783   : > { %v1580_v43 = vmul.f32 %v3323_v9, %v1579_v39  ;;  %v1564_v45 = vadd.f32 1e-06, %v1561_v40  ;;  %1752 = vmatpush.bf16.msrb.mxu2 %v3137_v10 }
 0x785   : > { %v1584_v46 = vsel %vm1583_vm10, %v3323_v9, %v1580_v43  ;;  %3324 = vrsqrt.f32 %v1564_v45  ;;  %vm1591_vm12 = vweird.f32 %v1564_v45 }
 0x786   : > { %v1596_v49 = vmul.f32 %v1584_v46, %v1545_v20  ;;  %v3251_v20 = vld [vmem:[%s4444_s15] ss:$0 sm:$0xff] }
 0x787   : > { %1753 = vmatpush.bf16.msrb.mxu2 %v3136_v63 }
 0x788   : > { %v1602_v50 = vmul.f32 %v3249_v41, %v1596_v49 }
 0x78a   : > { %v1608_v55 = vadd.f32 %v3250_v47, %v1602_v50  ;;  %v3252_v50 = vld [vmem:[%s4446_s17] ss:$0 sm:$0xff] }
 0x78b   : > { %v3325_v51 = vpop.eup %3324  ;;  %1754 = vmatpush.bf16.msrb.mxu2 %v3135_v11 }
 0x78c   : > { %v1586_v56 = vmul.f32 %v3325_v51, %v1564_v45  ;;  %v1614_v58 = vpack.c.bf16 %v1608_v55, %v1607_v54  ;;  %vm1592_vm11 = vweird.f32 %v3325_v51 }
 0x78d   : > { %vm1593_vm5 = vmor %vm1591_vm12, %vm1592_vm11 }
 0x78e   : > { %v1587_v57 = vmul.f32 %v3325_v51, %v1586_v56  ;;  %2951 = vmatmul.msk.bf16.vlgmr.msrb.gmra.mxu1 %vm838_vm2, %v1614_v58 }
 0x78f   : > { %1755 = vmatpush.bf16.msrb.mxu2 %v3134_v12 }
 0x790   : > { %v1588_v60 = vmul.f32 0.5, %v1587_v57 }
 0x792   : > { %v1589_v61 = vsub.f32 1.5, %v1588_v60 }
 0x793   : > { %1756 = vmatpush.bf16.msrb.mxu2 %v3133_v14 }
 0x794   : > { %v1590_v62 = vmul.f32 %v3325_v51, %v1589_v61 }
 0x796   : > { %v1594_v1 = vsel %vm1593_vm5, %v3325_v51, %v1590_v62 }
 0x797   : > { %v1597_v5 = vmul.f32 %v1594_v1, %v1546_v17 }
 0x799   : > { %v1603_v6 = vmul.f32 %v3249_v41, %v1597_v5 }
 0x79b   : > { %v1609_v34 = vadd.f32 %v3250_v47, %v1603_v6 }
 0x79d   : > { %v1615_v2 = vpack.c.bf16 %v1609_v34, %v1609_v34 }
 0x79f   : > { %2952 = vmatmul.msk.bf16.gmra.mxu1 %vm838_vm2, %v1615_v2 }
 0x80b   : > { %v1647_v13 = vpop.f32.mrf.mxu1 }
 0x80c   : > { %v1648_v15 = vadd.f32 %v3251_v20, %v1647_v13 }
 0x80e   : > { %v1656_v16 = vmul.f32 %v1648_v15, %v1648_v15 }
 0x810   : > { %v1659_v17 = vmul.f32 %v1656_v16, %v1648_v15  ;;  %v3142_v16 = vld [vmem:[%s4520_s8 + $0x18] sm:$0xff] }
 0x811   : > { %1895 = vmatpush.bf16.msrb.mxu0 %v3142_v16 }
 0x812   : > { %v1662_v53 = vmul.f32 0.044715, %v1659_v17 }
 0x813   : > { %v1649_v18 = vpop.f32.mrf.mxu1 }
 0x814   : > { %v1665_v19 = vadd.f32 %v1662_v53, %v1648_v15  ;;  %v1650_v23 = vadd.f32 %v3251_v20, %v1649_v18 }
 0x816   : > { %v1668_v24 = vmul.f32 0.7978846, %v1665_v19  ;;  %v1657_v52 = vmul.f32 %v1650_v23, %v1650_v23  ;;  %v3141_v19 = vld [vmem:[%s4520_s8 + $0x10] sm:$0xff]  ;;  %s4543_s8 = sld [smem:[#allocation25_spill]] }
 0x817   : > { %1896 = vmatpush.bf16.msrb.mxu0 %v3141_v19 }
 0x818   : > { %v1660_v26 = vmul.f32 %v1657_v52, %v1650_v23  ;;  %3326 = vtanh.f32 %v1668_v24 }
 0x81a   : > { %v1663_v27 = vmul.f32 0.044715, %v1660_v26 }
 0x81c   : > { %v1666_v21 = vadd.f32 %v1663_v27, %v1650_v23  ;;  %v1652_v22 = vpop.f32.mrf.mxu1 }
 0x81d   : > { %v1653_v31 = vadd.f32 %v3251_v20, %v1652_v22 }
 0x81e   : > { %v1669_v4 = vmul.f32 0.7978846, %v1666_v21  ;;  %v3327_v25 = vpop.eup %3326 }
 0x81f   : > { %v1658_v32 = vmul.f32 %v1653_v31, %v1653_v31  ;;  %v1674_v9 = vadd.f32 1.0, %v3327_v25 }
 0x820   : > { %3328 = vtanh.f32 %v1669_v4 }
 0x821   : > { %v1661_v29 = vmul.f32 %v1658_v32, %v1653_v31  ;;  %v1677_v37 = vmul.f32 0.5, %v1674_v9 }
 0x823   : > { %v1664_v28 = vmul.f32 0.044715, %v1661_v29  ;;  %v1680_v41 = vmul.f32 %v1677_v37, %v1648_v15 }
 0x824   : > { %v1654_v30 = vpop.f32.mrf.mxu1 }
 0x825   : > { %v1667_v33 = vadd.f32 %v1664_v28, %v1653_v31 }
 0x826   : > { %v3329_v35 = vpop.eup %3328 }
 0x827   : > { %v1675_v38 = vadd.f32 1.0, %v3329_v35  ;;  %v1670_v39 = vmul.f32 0.7978846, %v1667_v33 }
 0x829   : > { %v1678_v40 = vmul.f32 0.5, %v1675_v38  ;;  %3330 = vtanh.f32 %v1670_v39  ;;  %v3253_v39 = vld [vmem:[%s4521_s25 + $0x1] ss:$0 sm:$0xff] }
 0x82b   : > { %v1681_v42 = vmul.f32 %v1678_v40, %v1650_v23 }
 0x82d   : > { %v1699_v43 = vpack.c.bf16 %v1681_v42, %v1680_v41 }
 0x82f   : > { %v3331_v45 = vpop.eup %3330  ;;  %1757 = vmatmul.bf16.vlgmr.msrb.gmra.mxu2 %v1699_v43 }
 0x830   : > { %v1676_v46 = vadd.f32 1.0, %v3331_v45 }
 0x832   : > { %v1679_v47 = vmul.f32 0.5, %v1676_v46  ;;  %v3254_v46 = vld [vmem:[%s4522_s7 + $0x1] ss:$0 sm:$0xff] }
 0x834   : > { %v1682_v48 = vmul.f32 %v1679_v47, %v1653_v31 }
 0x836   : > { %v1700_v49 = vpack.c.bf16 %v1682_v48, %v1682_v48 }
 0x83f   : > { %1762 = vmatmul.bf16.gmra.mxu2 %v1700_v49 }
 0x8b2   : > { %v1758_v54 = vpop.f32.mrf.mxu2 }
 0x8b3   : > { %v1767_v55 = vadd.f32 %v1758_v54, %v3974_v59 }
 0x8b5   : > { %v4045_v51 = vadd.f32 %v3252_v50, %v1767_v55 }
 0x8b7   : > { %v1781_v56 = vsel %vm838_vm2, %v4045_v51, 0.0 }
 0x8b8   : > { %1782 = vadd.xlane.f32.xlu1 %v1781_v56 }
 0x8ba   : > { %v1760_v58 = vpop.f32.mrf.mxu2 }
 0x8bb   : > { %v1768_v57 = vadd.f32 %v1760_v58, %v3979_v0 }
 0x8bd   : > { %v4050_v60 = vadd.f32 %v3252_v50, %v1768_v57 }
 0x8bf   : > { %v1784_v61 = vsel %vm838_vm2, %v4050_v60, 0.0 }
 0x8c0   : > { %1785 = vadd.xlane.f32.xlu1 %v1784_v61 }
 0x8c2   : > { %v1763_v62 = vpop.f32.mrf.mxu2 }
 0x8c3   : > { %v1769_v1 = vadd.f32 %v1763_v62, %v3984_v7 }
 0x8c5   : > { %v4055_v5 = vadd.f32 %v3252_v50, %v1769_v1 }
 0x8c7   : > { %v1787_v59 = vsel %vm845_vm1, %v4055_v5, 0.0 }
 0x8c8   : > { %1788 = vadd.xlane.f32.xlu0 %v1787_v59 }
 0x8ca   : > { %v1765_v6 = vpop.f32.mrf.mxu2 }
 0x92b   : > { %v1783_v34 = vpop.xlane.xlu1 %1782 }
 0x92c   : > { %v1790_v2 = vmul.f32 %v1783_v34, %v3712_v44 }
 0x92e   : > { %v1793_v0 = vsub.f32 %v4045_v51, %v1790_v2  ;;  %v3255_v2 = vld [vmem:[%s4523_s9 + $0x1] ss:$0 sm:$0xff] }
 0x930   : > { %v1796_v3 = vmul.f32 %v1793_v0, %v1793_v0 }
 0x932   : > { %v1799_v8 = vsel %vm838_vm2, %v1796_v3, 0.0 }
 0x933   : > { %1800 = vadd.xlane.f32.xlu1 %v1799_v8  ;;  %v1786_v36 = vpop.xlane.xlu1 %1785 }
 0x934   : > { %v1791_v10 = vmul.f32 %v1786_v36, %v3712_v44 }
 0x936   : > { %v1794_v7 = vsub.f32 %v4050_v60, %v1791_v10 }
 0x938   : > { %v1797_v63 = vmul.f32 %v1794_v7, %v1794_v7 }
 0x93a   : > { %v1802_v11 = vsel %vm838_vm2, %v1797_v63, 0.0 }
 0x93b   : > { %1803 = vadd.xlane.f32.xlu0 %v1802_v11  ;;  %v1789_v12 = vpop.xlane.xlu0 %1788 }
 0x93c   : > { %v1792_v20 = vmul.f32 %v1789_v12, %v3712_v44 }
 0x93e   : > { %v1795_v13 = vsub.f32 %v4055_v5, %v1792_v20 }
 0x940   : > { %v1798_v14 = vmul.f32 %v1795_v13, %v1795_v13 }
 0x942   : > { %v1805_v15 = vsel %vm845_vm1, %v1798_v14, 0.0 }
 0x943   : > { %1806 = vadd.xlane.f32.xlu1 %v1805_v15 }
 0x9a6   : > { %v1801_v17 = vpop.xlane.xlu1 %1800 }
 0x9a7   : > { %v1808_v53 = vmul.f32 %v1801_v17, %v3712_v44 }
 0x9a9   : > { %v1811_v18 = vadd.f32 1e-06, %v1808_v53 }
 0x9ab   : > { %3332 = vrsqrt.f32 %v1811_v18  ;;  %vm1820_vm7 = vweird.f32 %v1811_v18 }
 0x9ae   : > { %v1804_v23 = vpop.xlane.xlu0 %1803 }
 0x9af   : > { %v1809_v24 = vmul.f32 %v1804_v23, %v3712_v44 }
 0x9b1   : > { %v3333_v52 = vpop.eup %3332  ;;  %v1812_v26 = vadd.f32 1e-06, %v1809_v24 }
 0x9b2   : > { %v1815_v27 = vmul.f32 %v3333_v52, %v1811_v18  ;;  %vm1821_vm6 = vweird.f32 %v3333_v52 }
 0x9b3   : > { %3334 = vrsqrt.f32 %v1812_v26  ;;  %vm1822_vm8 = vmor %vm1820_vm7, %vm1821_vm6  ;;  %vm1830_vm10 = vweird.f32 %v1812_v26 }
 0x9b4   : > { %v1816_v21 = vmul.f32 %v3333_v52, %v1815_v27 }
 0x9b6   : > { %v1817_v22 = vmul.f32 0.5, %v1816_v21  ;;  %v1807_v31 = vpop.xlane.xlu1 %1806 }
 0x9b7   : > { %v1810_v4 = vmul.f32 %v1807_v31, %v3712_v44 }
 0x9b8   : > { %v1818_v32 = vsub.f32 1.5, %v1817_v22 }
 0x9b9   : > { %v3335_v25 = vpop.eup %3334  ;;  %v1813_v29 = vadd.f32 1e-06, %v1810_v4 }
 0x9ba   : > { %v1819_v9 = vmul.f32 %v3333_v52, %v1818_v32  ;;  %v1825_v28 = vmul.f32 %v3335_v25, %v1812_v26  ;;  %vm1831_vm9 = vweird.f32 %v3335_v25 }
 0x9bb   : > { %3336 = vrsqrt.f32 %v1813_v29  ;;  %vm1832_vm11 = vmor %vm1830_vm10, %vm1831_vm9  ;;  %vm1840_vm5 = vweird.f32 %v1813_v29 }
 0x9bc   : > { %v1826_v30 = vmul.f32 %v3335_v25, %v1825_v28  ;;  %v1823_v33 = vsel %vm1822_vm8, %v3333_v52, %v1819_v9 }
 0x9bd   : > { %v1844_v40 = vmul.f32 %v1823_v33, %v1793_v0 }
 0x9be   : > { %v1827_v35 = vmul.f32 0.5, %v1826_v30 }
 0x9bf   : > { %v1850_v47 = vmul.f32 %v3253_v39, %v1844_v40 }
 0x9c0   : > { %v1828_v37 = vsub.f32 1.5, %v1827_v35 }
 0x9c1   : > { %v3337_v38 = vpop.eup %3336  ;;  %v1856_v55 = vadd.f32 %v3254_v46, %v1850_v47 }
 0x9c2   : > { %v1829_v41 = vmul.f32 %v3335_v25, %v1828_v37  ;;  %v1835_v42 = vmul.f32 %v3337_v38, %v1813_v29  ;;  %vm1841_vm12 = vweird.f32 %v3337_v38 }
 0x9c3   : > { %vm1842_vm6 = vmor %vm1840_vm5, %vm1841_vm12 }
 0x9c4   : > { %v1833_v43 = vsel %vm1832_vm11, %v3335_v25, %v1829_v41  ;;  %v1836_v45 = vmul.f32 %v3337_v38, %v1835_v42  ;;  %v3400_v41 = vld [vmem:[%s4525_s24] sm:$0xff] }
 0x9c5   : > { %v1845_v48 = vmul.f32 %v1833_v43, %v1794_v7 }
 0x9c6   : > { %v1837_v49 = vmul.f32 0.5, %v1836_v45 }
 0x9c7   : > { %v1851_v50 = vmul.f32 %v3253_v39, %v1845_v48 }
 0x9c8   : > { %v1838_v54 = vsub.f32 1.5, %v1837_v49 }
 0x9c9   : > { %v1857_v56 = vadd.f32 %v3254_v46, %v1851_v50 }
 0x9ca   : > { %v1839_v58 = vmul.f32 %v3337_v38, %v1838_v54  ;;  %v3401_v54 = vld [vmem:[%s4525_s24 + $0x8] sm:$0xff] }
 0x9cb   : > { %v1864_v57 = vpack.c.bf16 %v1857_v56, %v1856_v55 }
 0x9cc   : > { %v1843_v61 = vsel %vm1842_vm6, %v3337_v38, %v1839_v58 }
 0x9cd   : > { %3000 = vmatmul.msk.bf16.vlgmr.msrb.gmra.mxu0 %vm838_vm2, %v1864_v57  ;;  %v1846_v62 = vmul.f32 %v1843_v61, %v1795_v13 }
 0x9cf   : > { %v1852_v1 = vmul.f32 %v3253_v39, %v1846_v62 }
 0x9d1   : > { %v1858_v59 = vadd.f32 %v3254_v46, %v1852_v1 }
 0x9d3   : > { %v1865_v6 = vpack.c.bf16 %v1858_v59, %v1858_v59  ;;  %v3402_v59 = vld [vmem:[%s4525_s24 + $0x10] sm:$0xf] }
 0x9dd   : > { %3001 = vmatmul.msk.bf16.gmra.mxu0 %vm838_vm2, %v1865_v6 }
 0xa4a   : > { %v1898_v34 = vpop.f32.mrf.mxu0 }
 0xa4b   : > { %v1899_v3 = vadd.f32 %v3255_v2, %v1898_v34 }
 0xa52   : > { %v1900_v0 = vpop.f32.mrf.mxu0 }
 0xa53   : > { %v1901_v8 = vadd.f32 %v3255_v2, %v1900_v0 }
 0xa55   : > { %v4088_v36 = vpack.c.bf16 %v1901_v8, %v1899_v3 }
 0xa57   : > { %1911 = vrot.lane.b32.xlu1 %v4088_v36, %s3468_s6 }
 0xa5a   : > { %v1903_v10 = vpop.f32.mrf.mxu0 }
 0xa5b   : > { %v1904_v7 = vadd.f32 %v3255_v2, %v1903_v10 }
 0xa5d   : > { %v4092_v63 = vpack.c.bf16 %v1904_v7, %v1904_v7 }
 0xa5f   : > { %2024 = vrot.lane.b32.xlu2 %v4092_v63, %s4528_s23  ;;  %1913 = vrot.lane.b32.xlu0 %v4092_v63, %s3468_s6  ;;  %s4532_s6 = smov 112  }
 0xa60   : > { %2020 = vrot.lane.b32.xlu1 %v4092_v63, %s4529_s21 }
 0xa62   : > { %v1905_v11 = vpop.f32.mrf.mxu0 }
 0xa67   : > { %2018 = vrot.lane.b32.xlu2 %v4088_v36, %s4529_s21  ;;  %2022 = vrot.lane.b32.xlu0 %v4088_v36, %s4528_s23  ;;  %s4541_s23 = sld [smem:[#allocation26_spill]] }
 0xa68   : > { %2244 = vrot.lane.b32.xlu1 %v4088_v36, %s4530_s1 }
 0xa6d   : > { %s3423_s7 = scalar_lea.hbm %s4541_s23, 8 }
 0xa6f   : > { %2246 = vrot.lane.b32.xlu2 %v4092_v63, %s4530_s1  ;;  %2135 = vrot.lane.b32.xlu0 %v4092_v63, %s4531_s29 }
 0xa70   : > { %2131 = vrot.lane.b32.xlu1 %v4092_v63, %s4532_s6 }
 0xa77   : > { %2129 = vrot.lane.b32.xlu2 %v4088_v36, %s4532_s6  ;;  %2133 = vrot.lane.b32.xlu0 %v4088_v36, %s4531_s29  ;;  %s4536_s29 = smov 48   ;;  %s4537_s6 = smov 40  }
 0xa78   : > { %1986 = vrot.lane.b32.xlu1 %v4088_v36, %s4533_s0 }
 0xa7f   : > { %2242 = vrot.lane.b32.xlu2 %v4092_v63, %s4534_s3  ;;  %2240 = vrot.lane.b32.xlu0 %v4088_v36, %s4534_s3  ;;  %s4539_s3 = smov 16  }
 0xa87   : > { %1988 = vrot.lane.b32.xlu2 %v4092_v63, %s4533_s0  ;;  %2099 = vrot.lane.b32.xlu0 %v4092_v63, %s4535_s5  ;;  %s4538_s0 = smov 8  }
 0xab9   : > { %v2025_v12 = vpop.permute.xlu2 %2024 }
 0xaba   : > { %v2036_v20 = vsel %vm991_vm13, %v2025_v12, 0 }
 0xabb   : > { %2044 = vmatpush.bf16.xpose.msra.mxu2 %v2036_v20 }
 0xac1   : > { %v2019_v13 = vpop.permute.xlu2 %2018 }
 0xac9   : > { %v2247_v14 = vpop.permute.xlu2 %2246  ;;  %v1912_v15 = vpop.permute.xlu1 %1911 }
 0xaca   : > { %v1922_v24 = vsel %vm991_vm13, %v1912_v15, 0  ;;  %v2258_v27 = vsel %vm991_vm13, %v2247_v14, 0 }
 0xad1   : > { %v1914_v16 = vpop.permute.xlu0 %1913  ;;  %v2130_v17 = vpop.permute.xlu2 %2129 }
 0xad2   : > { %v1925_v53 = vsel %vm991_vm13, %v1914_v16, 0  ;;  %v2021_v18 = vpop.permute.xlu1 %2020 }
 0xad3   : > { %1933 = vmatpush.bf16.xpose.msra.mxu3 %v1925_v53 }
 0xad9   : > { %v2243_v19 = vpop.permute.xlu2 %2242  ;;  %v2023_v23 = vpop.permute.xlu0 %2022 }
 0xada   : > { %v2033_v52 = vsel %vm991_vm13, %v2023_v23, 0  ;;  %v2245_v26 = vpop.permute.xlu1 %2244 }
 0xadb   : > { %1934 = vmatpush.bf16.xpose.msra.mxu3 %v1922_v24  ;;  %2045 = vmatpush.bf16.xpose.msra.mxu2 %v2033_v52  ;;  %v2255_v25 = vsel %vm991_vm13, %v2245_v26, 0 }
 0xae1   : > { %v1989_v21 = vpop.permute.xlu2 %1988  ;;  %v2136_v22 = vpop.permute.xlu0 %2135 }
 0xae2   : > { %v1998_v31 = vsel %vm1076_vm14, %v1989_v21, 0  ;;  %v2147_v4 = vsel %vm991_vm13, %v2136_v22, 0  ;;  %v2132_v32 = vpop.permute.xlu1 %2131  ;;  %3002 = vmatmul.msk.bf16.vlgmr.msra.gmra.mxu3 %vm991_vm13, %v4088_v36  ;;  %3006 = vmatmul.msk.bf16.vlgmr.msra.gmra.mxu2 %vm991_vm13, %v2019_v13 }
 0xae3   : > { %2266 = vmatpush.bf16.xpose.msrb.mxu2 %v2258_v27  ;;  %2006 = vmatpush.bf16.msra.mxu1 %v1998_v31 }
 0xae4   : > { %2155 = vmatpush.bf16.xpose.msrb.mxu3 %v2147_v4 }
 0xae9   : > { %v2134_v29 = vpop.permute.xlu0 %2133 }
 0xaea   : > { %v2144_v9 = vsel %vm991_vm13, %v2134_v29, 0  ;;  %v1987_v28 = vpop.permute.xlu1 %1986 }
 0xaeb   : > { %2267 = vmatpush.bf16.xpose.msrb.mxu2 %v2255_v25  ;;  %2007 = vmatpush.bf16.msra.mxu1 %v1987_v28 }
 0xaec   : > { %2156 = vmatpush.bf16.xpose.msrb.mxu3 %v2144_v9 }
 0xaf1   : > { %v2241_v30 = vpop.permute.xlu0 %2240 }
 0xaf2   : > { %3003 = vmatmul.msk.bf16.gmra.mxu3 %vm991_vm13, %v4092_v63  ;;  %3007 = vmatmul.msk.bf16.gmra.mxu2 %vm991_vm13, %v2021_v18 }
 0xaf9   : > { %v2100_v33 = vpop.permute.xlu0 %2099 }
 0xafa   : > { %v2109_v35 = vsel %vm1076_vm14, %v2100_v33, 0 }
 0xafb   : > { %2117 = vmatpush.bf16.msra.mxu0 %v2109_v35 }
 0xb02   : > { %3010 = vmatmul.msk.bf16.vlgmr.msrb.gmra.mxu3 %vm991_vm13, %v2130_v17  ;;  %3014 = vmatmul.msk.bf16.vlgmr.msrb.gmra.mxu2 %vm991_vm13, %v2241_v30 }
 0xb12   : > { %3011 = vmatmul.msk.bf16.gmra.mxu3 %vm991_vm13, %v2132_v32  ;;  %3015 = vmatmul.msk.bf16.gmra.mxu2 %vm991_vm13, %v2243_v19 }
 0xb65   : > { %v1936_v37 = vpop.f32.mrf.mxu3  ;;  %v2047_v38 = vpop.f32.mrf.mxu2 }
 0xb66   : > { %v1945_v39 = vmul.f32 0.35355338, %v1936_v37  ;;  %v2056_v40 = vmul.f32 0.35355338, %v2047_v38 }
 0xb68   : > { %v4149_v42 = vadd.f32 %v3400_v41, %v1945_v39  ;;  %v4151_v43 = vadd.f32 %v3400_v41, %v2056_v40 }
 0xb6a   : > { %v1951_v45 = vsel %vm1028_vm15, %v4149_v42, -inf  ;;  %v2062_v46 = vsel %vm1028_vm15, %v4151_v43, -inf }
 0xb6b   : > { %1952 = vmax.xlane.f32.xlu0 %v1951_v45  ;;  %2063 = vmax.xlane.f32.xlu2 %v2062_v46 }
 0xb6d   : > { %v1938_v47 = vpop.f32.mrf.mxu3  ;;  %v2049_v48 = vpop.f32.mrf.mxu2 }
 0xb6e   : > { %v1946_v49 = vmul.f32 0.35355338, %v1938_v47  ;;  %v2057_v50 = vmul.f32 0.35355338, %v2049_v48 }
 0xb70   : > { %v4160_v55 = vadd.f32 %v3401_v54, %v1946_v49  ;;  %v4162_v56 = vadd.f32 %v3401_v54, %v2057_v50 }
 0xb72   : > { %v1954_v58 = vsel %vm1028_vm15, %v4160_v55, -inf  ;;  %v2065_v57 = vsel %vm1028_vm15, %v4162_v56, -inf }
 0xb73   : > { %1955 = vmax.xlane.f32.xlu1 %v1954_v58  ;;  %2066 = vmax.xlane.f32.xlu0 %v2065_v57 }
 0xb75   : > { %v1941_v61 = vpop.f32.mrf.mxu3  ;;  %v2052_v62 = vpop.f32.mrf.mxu2 }
 0xb76   : > { %v1947_v1 = vmul.f32 0.35355338, %v1941_v61  ;;  %v2058_v19 = vmul.f32 0.35355338, %v2052_v62 }
 0xb78   : > { %v4171_v6 = vadd.f32 %v3402_v59, %v1947_v1  ;;  %v4187_v23 = vadd.f32 %v3402_v59, %v2058_v19 }
 0xb7a   : > { %v1957_v34 = vsel %vm1035_vm0, %v4171_v6, -inf  ;;  %v2068_v26 = vsel %vm1035_vm0, %v4187_v23, -inf }
 0xb7b   : > { %1958 = vmax.xlane.f32.xlu1 %v1957_v34 }
 0xb7d   : > { %v1943_v2 = vpop.f32.mrf.mxu3  ;;  %v2054_v0 = vpop.f32.mrf.mxu2 }
 0xb83   : > { %2210 = vrot.lane.b32.xlu2 %v4092_v63, %s4536_s29 }
 0xb85   : > { %v2158_v3 = vpop.f32.mrf.mxu3  ;;  %v2269_v8 = vpop.f32.mrf.mxu2 }
 0xb86   : > { %v2167_v24 = vmul.f32 0.35355338, %v2158_v3  ;;  %v2278_v52 = vmul.f32 0.35355338, %v2269_v8 }
 0xb87   : > { %2097 = vrot.lane.b32.xlu0 %v4088_v36, %s4535_s5  ;;  %s4540_s5 = smov 24  }
 0xb88   : > { %v4191_v27 = vadd.f32 %v3400_v41, %v2167_v24  ;;  %v4193_v21 = vadd.f32 %v3400_v41, %v2278_v52 }
 0xb8a   : > { %v2173_v31 = vsel %vm1028_vm15, %v4191_v27, -inf  ;;  %v2284_v32 = vsel %vm1028_vm15, %v4193_v21, -inf }
 0xb8d   : > { %v2160_v10 = vpop.f32.mrf.mxu3  ;;  %v2271_v7 = vpop.f32.mrf.mxu2 }
 0xb8e   : > { %v2168_v11 = vmul.f32 0.35355338, %v2160_v10  ;;  %v2279_v22 = vmul.f32 0.35355338, %v2271_v7 }
 0xb90   : > { %v4179_v12 = vadd.f32 %v3401_v54, %v2168_v11  ;;  %v4199_v25 = vadd.f32 %v3401_v54, %v2279_v22 }
 0xb92   : > { %v2176_v20 = vsel %vm1028_vm15, %v4179_v12, -inf  ;;  %v2287_v9 = vsel %vm1028_vm15, %v4199_v25, -inf }
 0xb93   : > { %2177 = vmax.xlane.f32.xlu1 %v2176_v20 }
 0xb95   : > { %v2163_v13 = vpop.f32.mrf.mxu3  ;;  %v2274_v14 = vpop.f32.mrf.mxu2 }
 0xb96   : > { %v2169_v15 = vmul.f32 0.35355338, %v2163_v13  ;;  %v2280_v4 = vmul.f32 0.35355338, %v2274_v14 }
 0xb98   : > { %v4183_v16 = vadd.f32 %v3402_v59, %v2169_v15  ;;  %v4201_v29 = vadd.f32 %v3402_v59, %v2280_v4 }
 0xb9a   : > { %v2179_v17 = vsel %vm1035_vm0, %v4183_v16, -inf  ;;  %v2290_v28 = vsel %vm1035_vm0, %v4201_v29, -inf }
 0xb9b   : > { %2180 = vmax.xlane.f32.xlu1 %v2179_v17 }
 0xb9d   : > { %v2165_v53 = vpop.f32.mrf.mxu3  ;;  %v2276_v18 = vpop.f32.mrf.mxu2 }
 0xbac   : > { %2069 = vmax.xlane.f32.xlu2 %v2068_v26 }
 0xbb1   : > { %2174 = vmax.xlane.f32.xlu0 %v2173_v31 }
 0xbb4   : > { %2285 = vmax.xlane.f32.xlu2 %v2284_v32 }
 0xbb9   : > { %2288 = vmax.xlane.f32.xlu0 %v2287_v9 }
 0xbbc   : > { %2291 = vmax.xlane.f32.xlu2 %v2290_v28 }
 0xbde   : > { %v1953_v30 = vpop.xlane.xlu0 %1952  ;;  %v2064_v33 = vpop.xlane.xlu2 %2063 }
 0xbdf   : > { %v1960_v35 = vsub.f32 %v4149_v42, %v1953_v30  ;;  %v2071_v37 = vsub.f32 %v4151_v43, %v2064_v33 }
 0xbe1   : > { %v1963_v38 = vmul.f32 1.442695, %v1960_v35  ;;  %v2074_v39 = vmul.f32 1.442695, %v2071_v37 }
 0xbe3   : > { %3338 = vpow2.f32 %v1963_v38 }
 0xbe4   : > { %3340 = vpow2.f32 %v2074_v39 }
 0xbe6   : > { %v1956_v40 = vpop.xlane.xlu1 %1955  ;;  %v2211_v41 = vpop.permute.xlu2 %2210 }
 0xbe7   : > { %v1961_v45 = vsub.f32 %v4160_v55, %v1956_v40  ;;  %v2220_v46 = vsel %vm1076_vm14, %v2211_v41, 0  ;;  %v2067_v47 = vpop.xlane.xlu0 %2066 }
 0xbe8   : > { %v2072_v48 = vsub.f32 %v4162_v56, %v2067_v47  ;;  %2228 = vmatpush.bf16.msrb.mxu1 %v2220_v46 }
 0xbe9   : > { %v4212_v49 = vpop.eup %3338  ;;  %v1965_v50 = vmul.f32 1.442695, %v1961_v45 }
 0xbea   : > { %v4214_v42 = vpop.eup %3340  ;;  %v2076_v43 = vmul.f32 1.442695, %v2072_v48  ;;  %v1969_v54 = vsel %vm1028_vm15, %v4212_v49, 0.0 }
 0xbeb   : > { %3342 = vpow2.f32 %v1965_v50  ;;  %1970 = vadd.xlane.f32.xlu1 %v1969_v54  ;;  %v2080_v55 = vsel %vm1028_vm15, %v4214_v42, 0.0 }
 0xbec   : > { %3344 = vpow2.f32 %v2076_v43  ;;  %2081 = vadd.xlane.f32.xlu0 %v2080_v55 }
 0xbee   : > { %v1959_v58 = vpop.xlane.xlu1 %1958 }
 0xbef   : > { %v1962_v56 = vsub.f32 %v4171_v6, %v1959_v58 }
 0xbf1   : > { %v4221_v57 = vpop.eup %3342  ;;  %v1967_v61 = vmul.f32 1.442695, %v1962_v56 }
 0xbf2   : > { %v4223_v62 = vpop.eup %3344  ;;  %v1972_v1 = vsel %vm1028_vm15, %v4221_v57, 0.0 }
 0xbf3   : > { %3346 = vpow2.f32 %v1967_v61  ;;  %v2083_v59 = vsel %vm1028_vm15, %v4223_v62, 0.0  ;;  %1973 = vadd.xlane.f32.xlu2 %v1972_v1 }
 0xbf4   : > { %2084 = vadd.xlane.f32.xlu1 %v2083_v59 }
 0xbf9   : > { %v4229_v34 = vpop.eup %3346  ;;  %v2098_v2 = vpop.permute.xlu0 %2097 }
 0xbfa   : > { %2118 = vmatpush.bf16.msra.mxu0 %v2098_v2  ;;  %v1975_v6 = vsel %vm1035_vm0, %v4229_v34, 0.0 }
 0xbfb   : > { %1976 = vadd.xlane.f32.xlu2 %v1975_v6 }
 0xc06   : > { %v2178_v0 = vpop.xlane.xlu1 %2177 }
 0xc07   : > { %v2183_v3 = vsub.f32 %v4179_v12, %v2178_v0 }
 0xc09   : > { %v2187_v8 = vmul.f32 1.442695, %v2183_v3 }
 0xc0b   : > { %3348 = vpow2.f32 %v2187_v8 }
 0xc11   : > { %v4234_v10 = vpop.eup %3348 }
 0xc12   : > { %v2194_v7 = vsel %vm1028_vm15, %v4234_v10, 0.0 }
 0xc13   : > { %2195 = vadd.xlane.f32.xlu2 %v2194_v7 }
 0xc1f   : > { %v2070_v11 = vpop.xlane.xlu2 %2069 }
 0xc20   : > { %v2073_v20 = vsub.f32 %v4187_v23, %v2070_v11 }
 0xc22   : > { %v2078_v13 = vmul.f32 1.442695, %v2073_v20 }
 0xc24   : > { %3350 = vpow2.f32 %v2078_v13  ;;  %v2175_v14 = vpop.xlane.xlu0 %2174 }
 0xc25   : > { %v2182_v15 = vsub.f32 %v4191_v27, %v2175_v14 }
 0xc27   : > { %v2185_v17 = vmul.f32 1.442695, %v2182_v15  ;;  %v2286_v53 = vpop.xlane.xlu2 %2285 }
 0xc28   : > { %v2293_v12 = vsub.f32 %v4193_v21, %v2286_v53 }
 0xc29   : > { %3352 = vpow2.f32 %v2185_v17 }
 0xc2a   : > { %v4241_v18 = vpop.eup %3350  ;;  %v2296_v19 = vmul.f32 1.442695, %v2293_v12 }
 0xc2b   : > { %2319 = vrot.lane.b32.xlu2 %v4088_v36, %s4537_s6  ;;  %v2086_v24 = vsel %vm1035_vm0, %v4241_v18, 0.0 }
 0xc2c   : > { %3354 = vpow2.f32 %v2296_v19  ;;  %2087 = vadd.xlane.f32.xlu0 %v2086_v24  ;;  %v2289_v23 = vpop.xlane.xlu0 %2288 }
 0xc2d   : > { %v2294_v52 = vsub.f32 %v4199_v25, %v2289_v23  ;;  %v2181_v25 = vpop.xlane.xlu1 %2180 }
 0xc2e   : > { %v2184_v33 = vsub.f32 %v4183_v16, %v2181_v25 }
 0xc2f   : > { %v2298_v26 = vmul.f32 1.442695, %v2294_v52  ;;  %v4248_v27 = vpop.eup %3352  ;;  %v2292_v9 = vpop.xlane.xlu2 %2291 }
 0xc30   : > { %v2191_v31 = vsel %vm1028_vm15, %v4248_v27, 0.0  ;;  %v2295_v38 = vsub.f32 %v4201_v29, %v2292_v9  ;;  %v2189_v39 = vmul.f32 1.442695, %v2184_v33 }
 0xc31   : > { %3356 = vpow2.f32 %v2298_v26 }
 0xc32   : > { %v4250_v22 = vpop.eup %3354  ;;  %v2300_v41 = vmul.f32 1.442695, %v2295_v38 }
 0xc33   : > { %v2302_v21 = vsel %vm1028_vm15, %v4250_v22, 0.0 }
 0xc34   : > { %2303 = vadd.xlane.f32.xlu1 %v2302_v21  ;;  %2192 = vadd.xlane.f32.xlu0 %v2191_v31 }
 0xc37   : > { %v4256_v4 = vpop.eup %3356 }
 0xc38   : > { %v2305_v32 = vsel %vm1028_vm15, %v4256_v4, 0.0 }
 0xc3c   : > { %2306 = vadd.xlane.f32.xlu0 %v2305_v32 }
 0xc4d   : > { %2321 = vrot.lane.b32.xlu1 %v4092_v63, %s4537_s6 }
 0xc50   : > { %2208 = vrot.lane.b32.xlu0 %v4088_v36, %s4536_s29 }
 0xc5e   : > { %v1971_v28 = vpop.xlane.xlu1 %1970 }
 0xc5f   : > { %v2082_v30 = vpop.xlane.xlu0 %2081  ;;  %3358 = vrcp.f32 %v1971_v28 }
 0xc60   : > { %3360 = vrcp.f32 %v2082_v30 }
 0xc65   : > { %v3359_v40 = vpop.eup %3358 }
 0xc66   : > { %v1974_v35 = vpop.xlane.xlu2 %1973  ;;  %v3361_v63 = vpop.eup %3360  ;;  %v1981_v46 = vmul.f32 %v3359_v40, %v4212_v49 }
 0xc67   : > { %v2085_v37 = vpop.xlane.xlu1 %2084  ;;  %3362 = vrcp.f32 %v1974_v35  ;;  %v2092_v16 = vmul.f32 %v3361_v63, %v4214_v42 }
 0xc68   : > { %3364 = vrcp.f32 %v2085_v37 }
 0xc69   : > { %3366 = vpow2.f32 %v2189_v39 }
 0xc6a   : > { %3368 = vpow2.f32 %v2300_v41 }
 0xc6d   : > { %v3363_v45 = vpop.eup %3362 }
 0xc6e   : > { %v3365_v36 = vpop.eup %3364  ;;  %v1982_v47 = vmul.f32 %v3363_v45, %v4221_v57  ;;  %v1977_v43 = vpop.xlane.xlu2 %1976 }
 0xc6f   : > { %v2093_v48 = vmul.f32 %v3365_v36, %v4223_v62  ;;  %v3367_v54 = vpop.eup %3366  ;;  %3370 = vrcp.f32 %v1977_v43 }
 0xc70   : > { %v1984_v50 = vpack.c.bf16 %v1982_v47, %v1981_v46  ;;  %v3369_v55 = vpop.eup %3368  ;;  %v2197_v58 = vsel %vm1035_vm0, %v3367_v54, 0.0 }
 0xc71   : > { %v2095_v29 = vpack.c.bf16 %v2093_v48, %v2092_v16  ;;  %v2308_v56 = vsel %vm1035_vm0, %v3369_v55, 0.0  ;;  %v3144_v48 = vld [vmem:[%s4526_s10 + $0x18] sm:$0xff] }
 0xc72   : > { %3004 = vmatmul.msk.bf16.vlgmr.msra.gmra.mxu1 %vm1028_vm15, %v1984_v50  ;;  %2427 = vmatpush.bf16.msra.mxu3 %v3144_v48  ;;  %v3143_v50 = vld [vmem:[%s4526_s10 + $0x10] sm:$0xff] }
 0xc73   : > { %3008 = vmatmul.msk.bf16.vlgmr.msra.gmra.mxu0 %vm1028_vm15, %v2095_v29 }
 0xc75   : > { %v3371_v49 = vpop.eup %3370 }
 0xc76   : > { %v1983_v42 = vmul.f32 %v3371_v49, %v4229_v34  ;;  %2428 = vmatpush.bf16.msra.mxu3 %v3143_v50 }
 0xc77   : > { %2198 = vadd.xlane.f32.xlu1 %v2197_v58 }
 0xc78   : > { %v1985_v57 = vpack.c.bf16 %v1983_v42, %v1983_v42 }
 0xc7a   : > { %2309 = vadd.xlane.f32.xlu0 %v2308_v56 }
 0xc82   : > { %3005 = vmatmul.msk.bf16.gmra.mxu1 %vm1028_vm15, %v1985_v57 }
 0xc86   : > { %v2196_v6 = vpop.xlane.xlu2 %2195 }
 0xc8e   : > { %v2320_v12 = vpop.permute.xlu2 %2319 }
 0xc9f   : > { %v2088_v61 = vpop.xlane.xlu0 %2087 }
 0xca0   : > { %3372 = vrcp.f32 %v2088_v61 }
 0xca6   : > { %v3373_v62 = vpop.eup %3372 }
 0xca7   : > { %v2094_v1 = vmul.f32 %v3373_v62, %v4241_v18  ;;  %v2193_v2 = vpop.xlane.xlu0 %2192  ;;  %v2304_v3 = vpop.xlane.xlu1 %2303 }
 0xca8   : > { %3374 = vrcp.f32 %v2193_v2 }
 0xca9   : > { %v2096_v59 = vpack.c.bf16 %v2094_v1, %v2094_v1  ;;  %3376 = vrcp.f32 %v2196_v6 }
 0xcab   : > { %3009 = vmatmul.msk.bf16.gmra.mxu0 %vm1028_vm15, %v2096_v59 }
 0xcae   : > { %v3375_v34 = vpop.eup %3374 }
 0xcaf   : > { %v2307_v0 = vpop.xlane.xlu0 %2306  ;;  %v3377_v8 = vpop.eup %3376  ;;  %v2203_v20 = vmul.f32 %v3375_v34, %v4248_v27 }
 0xcb0   : > { %3378 = vrcp.f32 %v2307_v0  ;;  %v2204_v15 = vmul.f32 %v3377_v8, %v4234_v10 }
 0xcb1   : > { %3380 = vrcp.f32 %v2304_v3 }
 0xcb2   : > { %v2206_v19 = vpack.c.bf16 %v2204_v15, %v2203_v20 }
 0xcb6   : > { %v3379_v7 = vpop.eup %3378 }
 0xcb7   : > { %v3381_v14 = vpop.eup %3380  ;;  %v2315_v17 = vmul.f32 %v3379_v7, %v4256_v4 }
 0xcb8   : > { %v2314_v18 = vmul.f32 %v3381_v14, %v4250_v22  ;;  %v3256_v14 = vld [vmem:[%s4527_s11 + $0x1] ss:$0 sm:$0xff] }
 0xcba   : > { %v2317_v24 = vpack.c.bf16 %v2315_v17, %v2314_v18 }
 0xcbf   : > { %v2322_v11 = vpop.permute.xlu1 %2321 }
 0xcc0   : > { %v2331_v13 = vsel %vm1076_vm14, %v2322_v11, 0 }
 0xcc1   : > { %2339 = vmatpush.bf16.msrb.mxu0 %v2331_v13 }
 0xcc2   : > { %v2209_v53 = vpop.permute.xlu0 %2208 }
 0xcc3   : > { %2229 = vmatpush.bf16.msrb.mxu1 %v2209_v53 }
 0xcc5   : > { %2340 = vmatpush.bf16.msrb.mxu0 %v2320_v12 }
 0xcc6   : > { %3012 = vmatmul.msk.bf16.vlgmr.msrb.gmra.mxu1 %vm1028_vm15, %v2206_v19 }
 0xcc8   : > { %3016 = vmatmul.msk.bf16.vlgmr.msrb.gmra.mxu0 %vm1028_vm15, %v2317_v24 }
 0xcea   : > { %v2199_v23 = vpop.xlane.xlu1 %2198 }
 0xceb   : > { %3382 = vrcp.f32 %v2199_v23 }
 0xced   : > { %v2310_v52 = vpop.xlane.xlu0 %2309 }
 0xcee   : > { %3384 = vrcp.f32 %v2310_v52 }
 0xcef   : > { %v2009_v26 = vpop.f32.mrf.mxu1 }
 0xcf0   : > { %v2120_v10 = vpop.f32.mrf.mxu0 }
 0xcf1   : > { %v3383_v27 = vpop.eup %3382 }
 0xcf2   : > { %v2205_v21 = vmul.f32 %v3383_v27, %v3367_v54 }
 0xcf4   : > { %v3385_v31 = vpop.eup %3384  ;;  %v2207_v4 = vpack.c.bf16 %v2205_v21, %v2205_v21 }
 0xcf5   : > { %v2316_v32 = vmul.f32 %v3385_v31, %v3369_v55 }
 0xcf6   : > { %3013 = vmatmul.msk.bf16.gmra.mxu1 %vm1028_vm15, %v2207_v4 }
 0xcf7   : > { %v2011_v22 = vpop.f32.mrf.mxu1  ;;  %v2318_v25 = vpack.c.bf16 %v2316_v32, %v2316_v32 }
 0xcf8   : > { %v2122_v9 = vpop.f32.mrf.mxu0 }
 0xcf9   : > { %v3228_v28 = vpack.i.bf16 %v2122_v9, %v2120_v10  ;;  %3017 = vmatmul.msk.bf16.gmra.mxu0 %vm1028_vm15, %v2318_v25 }
 0xcfb   : > { %3229 = vrot.lane.b32.xlu2 %v3228_v28, %s4538_s0 }
 0xcff   : > { %v2014_v30 = vpop.f32.mrf.mxu1 }
 0xd07   : > { %v2016_v33 = vpop.f32.mrf.mxu1 }
 0xd28   : > { %v2125_v35 = vpop.f32.mrf.mxu0 }
 0xd30   : > { %v2127_v37 = vpop.f32.mrf.mxu0 }
 0xd43   : > { %v2231_v38 = vpop.f32.mrf.mxu1 }
 0xd45   : > { %v2342_v39 = vpop.f32.mrf.mxu0 }
 0xd4b   : > { %v2233_v40 = vpop.f32.mrf.mxu1 }
 0xd4c   : > { %v3233_v63 = vpack.i.bf16 %v2233_v40, %v2231_v38 }
 0xd4d   : > { %v2344_v41 = vpop.f32.mrf.mxu0 }
 0xd4e   : > { %3234 = vrot.lane.b32.xlu2 %v3233_v63, %s4539_s3  ;;  %v3238_v45 = vpack.i.bf16 %v2344_v41, %v2342_v39  ;;  %v3146_v39 = vld [vmem:[%s4443_s14 + $0x18] sm:$0xff] }
 0xd4f   : > { %2568 = vmatpush.bf16.msra.mxu1 %v3146_v39 }
 0xd55   : > { %v3230_v43 = vpop.permute.xlu2 %3229 }
 0xd56   : > { %3239 = vrot.lane.b32.xlu2 %v3238_v45, %s4540_s5  ;;  %v3232_v54 = vunpack.i.h.bf16 %v3230_v43  ;;  %v3231_v55 = vunpack.i.l.bf16 %v3230_v43  ;;  %v3145_v45 = vld [vmem:[%s4443_s14 + $0x10] sm:$0xff] }
 0xd57   : > { %2569 = vmatpush.bf16.msra.mxu1 %v3145_v45 }
 0xd58   : > { %v2388_v42 = vsel %vm991_vm13, %v2011_v22, %v3232_v54  ;;  %v2387_v57 = vsel %vm991_vm13, %v2009_v26, %v3231_v55 }
 0xd5e   : > { %2358 = vrot.lane.b32.xlu2 %v2125_v35, %s4538_s0 }
 0xd73   : > { %v2236_v36 = vpop.f32.mrf.mxu1 }
 0xd74   : > { %2370 = vrot.lane.b32.xlu2 %v2236_v36, %s4539_s3  ;;  %s677_s3 = sand.u32 1, %s3457_s28  }
 0xd75   : > { %s2846_s30 = sshll.u32 %s677_s3, 2  ;;  %s2768_s10 = scalar_lea.sflag [#allocation4], %s677_s3 }
 0xd76   : > { %v2347_v46 = vpop.f32.mrf.mxu0  ;;  %s679_s9 = scalar_lea.vmem [#allocation3], %s2846_s30 }
 0xd77   : > { %2382 = vrot.lane.b32.xlu1 %v2347_v46, %s4540_s5  ;;  %s3109_s5 = sshll.u32 %s3618_s4, 2  ;;  %s2780_s6 = sshll.u32 %s679_s9, 4  ;;  %s2781_s6 = int_to_ptr.vmem [resolvable:$true] %s2780_s6 }
 0xd78   : > { %s2778_s1 = scalar_lea.hbm %s4541_s23, %s3109_s5 }
 0xd79   : > { %s2782_s0 = sshll.u32 %s2778_s1, 4  ;;  %s2783_s0 = int_to_ptr.hbm [resolvable:$true] %s2782_s0 }
 0xd7a   : > { %s3417_s4 = sshra.s32 %s2783_s0, 4  ;;  %s3418_s4 = int_to_ptr.hbm [resolvable:$true] %s3417_s4 }
 0xd7b   : > { %v2238_v47 = vpop.f32.mrf.mxu1  ;;  %s3419_s11 = scalar_lea.hbm %s3418_s4, 4  ;;  %p3424_p0 = scmp.lt.s32.totalorder %s3418_s4, %s4541_s23 }
 0xd7c   : > { %p3420_p11 = scmp.ne.s32.totalorder %s3418_s4, %s3419_s11  ;;  %p3425_p1 = scmp.lt.s32.totalorder %s3423_s7, %s3419_s11 }
 0xd7e   : > { %v2349_v16 = vpop.f32.mrf.mxu0  ;;  %p3421_p12 = pnand %p3420_p11, %p3635_p5  ;;  %p3426_p2 = por %p3425_p1, %p3424_p0 }
 0xd80   : > { %p3422_p13 = pneg %p3421_p12 }
 0xd82   : > { %p3427_p3 = pnand %p3426_p2, %p3422_p13 }
 0xda8   : > { %v3235_v29 = vpop.permute.xlu2 %3234 }
 0xda9   : > { %v3237_v58 = vunpack.i.h.bf16 %v3235_v29  ;;  %v3236_v49 = vunpack.i.l.bf16 %v3235_v29 }
 0xdab   : > { %v2390_v1 = vsel %vm1470_vm3, %v2387_v57, %v3236_v49  ;;  %v2391_v59 = vsel %vm1470_vm3, %v2388_v42, %v3237_v58 }
 0xdb0   : > { %v3240_v56 = vpop.permute.xlu2 %3239 }
 0xdb1   : > { %v3242_v61 = vunpack.i.h.bf16 %v3240_v56  ;;  %v3241_v62 = vunpack.i.l.bf16 %v3240_v56 }
 0xdb3   : > { %v2393_v2 = vsel %vm1474_vm4, %v2390_v1, %v3241_v62  ;;  %v2394_v6 = vsel %vm1474_vm4, %v2391_v59, %v3242_v61  ;;  %v3257_v61 = vld [vmem:[%s4441_s12 + $0x1] ss:$0 sm:$0xff] }
 0xdb4   : > { %v2401_v0 = vpack.c.bf16 %v2394_v6, %v2393_v2  ;;  %v3258_v2 = vld [vmem:[%s4442_s13 + $0x1] ss:$0 sm:$0xff] }
 0xdb6   : > { %3030 = vmatmul.msk.bf16.vlgmr.msra.gmra.mxu3 %vm838_vm2, %v2401_v0 }
 0xdb8   : > { %v2359_v3 = vpop.permute.xlu2 %2358 }
 0xdb9   : > { %v2389_v8 = vsel %vm991_vm13, %v2014_v30, %v2359_v3 }
 0xdce   : > { %v2371_v34 = vpop.permute.xlu2 %2370 }
 0xdcf   : > { %v2392_v7 = vsel %vm1470_vm3, %v2389_v8, %v2371_v34 }
 0xde9   : > { %v2383_v11 = vpop.permute.xlu1 %2382 }
 0xdea   : > { %v2395_v20 = vsel %vm1474_vm4, %v2392_v7, %v2383_v11 }
 0xdeb   : > { %v2402_v13 = vpack.c.bf16 %v2395_v20, %v2395_v20 }
 0xded   : > { %3031 = vmatmul.msk.bf16.gmra.mxu3 %vm838_vm2, %v2402_v13 }
 0xe39   : > { %v2430_v15 = vpop.f32.mrf.mxu3 }
 0xe3a   : > { %v2439_v17 = vadd.f32 %v2430_v15, %v4045_v51 }
 0xe3c   : > { %v2447_v53 = vadd.f32 %v3256_v14, %v2439_v17 }
 0xe3e   : > { %v2454_v12 = vsel %vm838_vm2, %v2447_v53, 0.0 }
 0xe3f   : > { %2455 = vadd.xlane.f32.xlu0 %v2454_v12 }
 0xe41   : > { %v2432_v18 = vpop.f32.mrf.mxu3 }
 0xe42   : > { %v2440_v19 = vadd.f32 %v2432_v18, %v4050_v60 }
 0xe44   : > { %v2448_v24 = vadd.f32 %v3256_v14, %v2440_v19 }
 0xe46   : > { %v2457_v23 = vsel %vm838_vm2, %v2448_v24, 0.0 }
 0xe47   : > { %2458 = vadd.xlane.f32.xlu2 %v2457_v23 }
 0xe70   : > { %v2435_v52 = vpop.f32.mrf.mxu3 }
 0xe71   : > { %v2441_v26 = vadd.f32 %v2435_v52, %v4055_v5 }
 0xe73   : > { %v4318_v10 = vadd.f32 %v3256_v14, %v2441_v26 }
 0xe75   : > { %v2460_v27 = vsel %vm845_vm1, %v4318_v10, 0.0 }
 0xe76   : > { %2461 = vadd.xlane.f32.xlu0 %v2460_v27  ;;  %v3154_v27 = vld [vmem:[%s4445_s16 + $0x78] sm:$0xff] }
 0xe77   : > { %2674 = vmatpush.bf16.msra.mxu2 %v3154_v27 }
 0xe78   : > { %v2437_v51 = vpop.f32.mrf.mxu3 }
 0xe79   : > { %v3153_v51 = vld [vmem:[%s4445_s16 + $0x70] sm:$0xff] }
 0xe7b   : > { %2675 = vmatpush.bf16.msra.mxu2 %v3153_v51 }
 0xeb2   : > { %v2456_v21 = vpop.xlane.xlu0 %2455 }
 0xeb3   : > { %v2463_v31 = vmul.f32 %v2456_v21, %v3712_v44  ;;  %v3152_v21 = vld [vmem:[%s4445_s16 + $0x68] sm:$0xff] }
 0xeb4   : > { %2676 = vmatpush.bf16.msra.mxu2 %v3152_v21 }
 0xeb5   : > { %v2466_v4 = vsub.f32 %v2447_v53, %v2463_v31  ;;  %v3151_v31 = vld [vmem:[%s4445_s16 + $0x60] sm:$0xff] }
 0xeb7   : > { %v2469_v32 = vmul.f32 %v2466_v4, %v2466_v4 }
 0xeb8   : > { %2677 = vmatpush.bf16.msra.mxu2 %v3151_v31 }
 0xeb9   : > { %v2472_v60 = vsel %vm838_vm2, %v2469_v32, 0.0  ;;  %v3149_v32 = vld [vmem:[%s4445_s16 + $0x50] sm:$0xff] }
 0xeba   : > { %v2459_v22 = vpop.xlane.xlu2 %2458  ;;  %2473 = vadd.xlane.f32.xlu0 %v2472_v60  ;;  %v3148_v60 = vld [vmem:[%s4445_s16 + $0x48] sm:$0xff] }
 0xebb   : > { %v2464_v25 = vmul.f32 %v2459_v22, %v3712_v44  ;;  %v3259_v22 = vld [vmem:[%s4444_s15 + $0x1] ss:$0 sm:$0xff] }
 0xebd   : > { %v2467_v9 = vsub.f32 %v2448_v24, %v2464_v25 }
 0xebf   : > { %v2470_v5 = vmul.f32 %v2467_v9, %v2467_v9 }
 0xec1   : > { %v2475_v28 = vsel %vm838_vm2, %v2470_v5, 0.0 }
 0xec2   : > { %2476 = vadd.xlane.f32.xlu1 %v2475_v28 }
 0xee9   : > { %v2462_v30 = vpop.xlane.xlu0 %2461 }
 0xeea   : > { %v2465_v33 = vmul.f32 %v2462_v30, %v3712_v44 }
 0xeec   : > { %v2468_v35 = vsub.f32 %v4318_v10, %v2465_v33 }
 0xeee   : > { %v2471_v37 = vmul.f32 %v2468_v35, %v2468_v35 }
 0xef0   : > { %v2478_v38 = vsel %vm845_vm1, %v2471_v37, 0.0 }
 0xef1   : > { %2479 = vadd.xlane.f32.xlu0 %v2478_v38 }
 0xf2d   : > { %v2474_v40 = vpop.xlane.xlu0 %2473 }
 0xf2e   : > { %v2481_v63 = vmul.f32 %v2474_v40, %v3712_v44 }
 0xf30   : > { %v2484_v41 = vadd.f32 1e-06, %v2481_v63 }
 0xf32   : > { %3386 = vrsqrt.f32 %v2484_v41  ;;  %vm2493_vm14 = vweird.f32 %v2484_v41 }
 0xf35   : > { %v2477_v36 = vpop.xlane.xlu1 %2476 }
 0xf36   : > { %v2482_v46 = vmul.f32 %v2477_v36, %v3712_v44 }
 0xf38   : > { %v3387_v47 = vpop.eup %3386  ;;  %v2485_v16 = vadd.f32 1e-06, %v2482_v46 }
 0xf39   : > { %v2488_v48 = vmul.f32 %v3387_v47, %v2484_v41  ;;  %vm2494_vm13 = vweird.f32 %v3387_v47 }
 0xf3a   : > { %3388 = vrsqrt.f32 %v2485_v16  ;;  %vm2495_vm15 = vmor %vm2493_vm14, %vm2494_vm13  ;;  %vm2503_vm3 = vweird.f32 %v2485_v16 }
 0xf3b   : > { %v2489_v50 = vmul.f32 %v3387_v47, %v2488_v48 }
 0xf3d   : > { %v2490_v43 = vmul.f32 0.5, %v2489_v50 }
 0xf3f   : > { %v2491_v29 = vsub.f32 1.5, %v2490_v43 }
 0xf40   : > { %v3389_v54 = vpop.eup %3388 }
 0xf41   : > { %v2492_v55 = vmul.f32 %v3387_v47, %v2491_v29  ;;  %v2498_v58 = vmul.f32 %v3389_v54, %v2485_v16  ;;  %vm2504_vm0 = vweird.f32 %v3389_v54 }
 0xf42   : > { %vm2505_vm4 = vmor %vm2503_vm3, %vm2504_vm0 }
 0xf43   : > { %v2499_v49 = vmul.f32 %v3389_v54, %v2498_v58  ;;  %v2496_v56 = vsel %vm2495_vm15, %v3387_v47, %v2492_v55 }
 0xf44   : > { %v2517_v62 = vmul.f32 %v2496_v56, %v2466_v4  ;;  %v3150_v4 = vld [vmem:[%s4445_s16 + $0x58] sm:$0xff] }
 0xf45   : > { %v2500_v42 = vmul.f32 0.5, %v2499_v49  ;;  %2678 = vmatpush.bf16.msra.mxu2 %v3150_v4 }
 0xf46   : > { %v2523_v6 = vmul.f32 %v3257_v61, %v2517_v62 }
 0xf47   : > { %v2501_v57 = vsub.f32 1.5, %v2500_v42 }
 0xf48   : > { %v2529_v34 = vadd.f32 %v3258_v2, %v2523_v6 }
 0xf49   : > { %v2502_v1 = vmul.f32 %v3389_v54, %v2501_v57  ;;  %2679 = vmatpush.bf16.msra.mxu2 %v3149_v32 }
 0xf4b   : > { %v2506_v59 = vsel %vm2505_vm4, %v3389_v54, %v2502_v1 }
 0xf4c   : > { %v2518_v0 = vmul.f32 %v2506_v59, %v2467_v9  ;;  %v3147_v9 = vld [vmem:[%s4445_s16 + $0x40] sm:$0xff] }
 0xf4d   : > { %2680 = vmatpush.bf16.msra.mxu2 %v3148_v60  ;;  %v3261_v60 = vld [vmem:[%s4447_s18] ss:$0 sm:$0xff] }
 0xf4e   : > { %v2524_v3 = vmul.f32 %v3257_v61, %v2518_v0 }
 0xf50   : > { %v2530_v8 = vadd.f32 %v3258_v2, %v2524_v3 }
 0xf51   : > { %2681 = vmatpush.bf16.msra.mxu2 %v3147_v9 }
 0xf52   : > { %v2537_v7 = vpack.c.bf16 %v2530_v8, %v2529_v34 }
 0xf54   : > { %3048 = vmatmul.msk.bf16.vlgmr.msra.gmra.mxu1 %vm838_vm2, %v2537_v7  ;;  %v3260_v7 = vld [vmem:[%s4446_s17 + $0x1] ss:$0 sm:$0xff] }
 0xf64   : > { %v2480_v11 = vpop.xlane.xlu0 %2479 }
 0xf65   : > { %v2483_v20 = vmul.f32 %v2480_v11, %v3712_v44 }
 0xf67   : > { %v2486_v13 = vadd.f32 1e-06, %v2483_v20 }
 0xf69   : > { %3390 = vrsqrt.f32 %v2486_v13  ;;  %vm2513_vm8 = vweird.f32 %v2486_v13 }
 0xf6f   : > { %v3391_v14 = vpop.eup %3390 }
 0xf70   : > { %v2508_v15 = vmul.f32 %v3391_v14, %v2486_v13  ;;  %vm2514_vm7 = vweird.f32 %v3391_v14 }
 0xf71   : > { %vm2515_vm9 = vmor %vm2513_vm8, %vm2514_vm7 }
 0xf72   : > { %v2509_v17 = vmul.f32 %v3391_v14, %v2508_v15 }
 0xf74   : > { %v2510_v53 = vmul.f32 0.5, %v2509_v17 }
 0xf76   : > { %v2511_v12 = vsub.f32 1.5, %v2510_v53 }
 0xf78   : > { %v2512_v18 = vmul.f32 %v3391_v14, %v2511_v12 }
 0xf7a   : > { %v2516_v19 = vsel %vm2515_vm9, %v3391_v14, %v2512_v18 }
 0xf7b   : > { %v2519_v24 = vmul.f32 %v2516_v19, %v2468_v35 }
 0xf7d   : > { %v2525_v23 = vmul.f32 %v3257_v61, %v2519_v24  ;;  %v3156_v24 = vld [vmem:[%s4449_s20 + $0x8] sm:$0xff] }
 0xf7e   : > { %2759 = vmatpush.bf16.msra.mxu0 %v3156_v24 }
 0xf7f   : > { %v2531_v52 = vadd.f32 %v3258_v2, %v2525_v23 }
 0xf81   : > { %v2538_v26 = vpack.c.bf16 %v2531_v52, %v2531_v52 }
 0xf83   : > { %3049 = vmatmul.msk.bf16.gmra.mxu1 %vm838_vm2, %v2538_v26 }
 0xfd1   : > { %v2571_v25 = vpop.f32.mrf.mxu1 }
 0xfd2   : > { %v2572_v5 = vadd.f32 %v3259_v22, %v2571_v25 }
 0xfd4   : > { %v2580_v28 = vmul.f32 %v2572_v5, %v2572_v5 }
 0xfd6   : > { %v2583_v30 = vmul.f32 %v2580_v28, %v2572_v5 }
 0xfd8   : > { %v2586_v33 = vmul.f32 0.044715, %v2583_v30  ;;  %v3263_v30 = vld [vmem:[%s4543_s8] ss:$0 sm:$0xff] }
 0xfd9   : > { %v2573_v35 = vpop.f32.mrf.mxu1 }
 0xfda   : > { %v2589_v37 = vadd.f32 %v2586_v33, %v2572_v5  ;;  %v2574_v38 = vadd.f32 %v3259_v22, %v2573_v35 }
 0xfdc   : > { %v2592_v39 = vmul.f32 0.7978846, %v2589_v37  ;;  %v2581_v40 = vmul.f32 %v2574_v38, %v2574_v38 }
 0xfde   : > { %v2584_v63 = vmul.f32 %v2581_v40, %v2574_v38  ;;  %3392 = vtanh.f32 %v2592_v39 }
 0xfe0   : > { %v2587_v41 = vmul.f32 0.044715, %v2584_v63 }
 0xfe2   : > { %v2590_v45 = vadd.f32 %v2587_v41, %v2574_v38 }
 0xfe4   : > { %v2593_v36 = vmul.f32 0.7978846, %v2590_v45  ;;  %v3393_v46 = vpop.eup %3392 }
 0xfe5   : > { %v2598_v47 = vadd.f32 1.0, %v3393_v46 }
 0xfe6   : > { %3394 = vtanh.f32 %v2593_v36 }
 0xfe7   : > { %v2601_v48 = vmul.f32 0.5, %v2598_v47 }
 0xfe9   : > { %v2604_v29 = vmul.f32 %v2601_v48, %v2572_v5 }
 0xfec   : > { %v3395_v16 = vpop.eup %3394 }
 0xfed   : > { %v2599_v50 = vadd.f32 1.0, %v3395_v16 }
 0xfef   : > { %v2602_v43 = vmul.f32 0.5, %v2599_v50 }
 0xff1   : > { %v2605_v54 = vmul.f32 %v2602_v43, %v2574_v38 }
 0xff3   : > { %v2624_v55 = vpack.c.bf16 %v2605_v54, %v2604_v29 }
 0xff5   : > { %2682 = vmatmul.bf16.vlgmr.msra.gmra.mxu2 %v2624_v55 }
0x1000   : > { %v2576_v58 = vpop.f32.mrf.mxu1 }
0x1001   : > { %v2577_v49 = vadd.f32 %v3259_v22, %v2576_v58 }
0x1003   : > { %v2582_v56 = vmul.f32 %v2577_v49, %v2577_v49 }
0x1005   : > { %v2585_v42 = vmul.f32 %v2582_v56, %v2577_v49 }
0x1007   : > { %v2588_v57 = vmul.f32 0.044715, %v2585_v42 }
0x1008   : > { %v2578_v61 = vpop.f32.mrf.mxu1 }
0x1009   : > { %v2591_v62 = vadd.f32 %v2588_v57, %v2577_v49 }
0x100b   : > { %v2594_v1 = vmul.f32 0.7978846, %v2591_v62 }
0x100d   : > { %3396 = vtanh.f32 %v2594_v1 }
0x1013   : > { %v3397_v59 = vpop.eup %3396 }
0x1014   : > { %v2600_v2 = vadd.f32 1.0, %v3397_v59 }
0x1016   : > { %v2603_v6 = vmul.f32 0.5, %v2600_v2 }
0x1018   : > { %v2606_v0 = vmul.f32 %v2603_v6, %v2577_v49 }
0x101a   : > { %v2625_v3 = vpack.c.bf16 %v2606_v0, %v2606_v0 }
0x101c   : > { %2685 = vmatmul.bf16.gmra.mxu2 %v2625_v3 }
0x1078   : > { %v2683_v34 = vpop.f32.mrf.mxu2 }
0x1080   : > { %v2684_v8 = vpop.f32.mrf.mxu2 }
0x109f   : > { %v2686_v11 = vpop.f32.mrf.mxu2 }
0x10a0   : > { %v2690_v20 = vadd.f32 %v2686_v11, %v4318_v10  ;;  %v3155_v10 = vld [vmem:[%s4449_s20] sm:$0xff] }
0x10a1   : > { %2760 = vmatpush.bf16.msra.mxu0 %v3155_v10 }
0x10a2   : > { %v2696_v13 = vadd.f32 %v3260_v7, %v2690_v20 }
0x10a4   : > { %v2699_v14 = vsel %vm845_vm1, %v2696_v13, 0.0 }
0x10a5   : > { %2700 = vadd.xlane.f32.xlu0 %v2699_v14 }
0x10a7   : > { %v2688_v15 = vpop.f32.mrf.mxu2 }
0x1118   : > { %v2701_v17 = vpop.xlane.xlu0 %2700 }
0x1119   : > { %v2702_v53 = vmul.f32 %v2701_v17, %v3712_v44 }
0x111b   : > { %v2703_v12 = vsub.f32 %v2696_v13, %v2702_v53 }
0x111d   : > { %v2704_v18 = vmul.f32 %v2703_v12, %v2703_v12 }
0x111f   : > { %v2705_v19 = vsel %vm845_vm1, %v2704_v18, 0.0 }
0x1120   : > { %2706 = vadd.xlane.f32.xlu0 %v2705_v19 }
0x1193   : > { %v2707_v23 = vpop.xlane.xlu0 %2706 }
0x1194   : > { %v2708_v52 = vmul.f32 %v2707_v23, %v3712_v44  ;;  %v3262_v44 = vld [vmem:[%s4448_s19] ss:$0 sm:$0xff] }
0x1196   : > { %v2709_v26 = vadd.f32 1e-06, %v2708_v52 }
0x1198   : > { %3398 = vrsqrt.f32 %v2709_v26  ;;  %vm2716_vm10 = vweird.f32 %v2709_v26 }
0x119e   : > { %v3399_v27 = vpop.eup %3398 }
0x119f   : > { %v2711_v51 = vmul.f32 %v3399_v27, %v2709_v26  ;;  %vm2717_vm1 = vweird.f32 %v3399_v27 }
0x11a0   : > { %vm2718_vm11 = vmor %vm2716_vm10, %vm2717_vm1 }
0x11a1   : > { %v2712_v21 = vmul.f32 %v3399_v27, %v2711_v51 }
0x11a3   : > { %v2713_v31 = vmul.f32 0.5, %v2712_v21 }
0x11a5   : > { %v2714_v4 = vsub.f32 1.5, %v2713_v31 }
0x11a7   : > { %v2715_v32 = vmul.f32 %v3399_v27, %v2714_v4 }
0x11a9   : > { %v2719_v22 = vsel %vm2718_vm11, %v3399_v27, %v2715_v32 }
0x11aa   : > { %v2720_v25 = vmul.f32 %v2719_v22, %v2703_v12 }
0x11ac   : > { %v2724_v9 = vmul.f32 %v3261_v60, %v2720_v25 }
0x11ae   : > { %v2728_v5 = vadd.f32 %v3262_v44, %v2724_v9 }
0x11b0   : > { %v2733_v28 = vpack.c.bf16 %v2728_v5, %v2728_v5 }
0x11b2   : > { %3107 = vmatmul.msk.bf16.vlgmr.msra.gmra.mxu0 %vm838_vm2, %v2733_v28 }
0x122f   : > { %v2762_v33 = vpop.f32.mrf.mxu0 }
0x1230   : > { %v2763_v35 = vadd.f32 %v3263_v30, %v2762_v33 }
0x1232   : > { %2766 = vst [vmem:[%s679_s9] sm:$0xf] %v2763_v35 }
0x1233   : > { %3430 = shalt.err (!%p3427_p3)
}
0x1234   : > { %3159 = dma.vmem_to_hbm [thread:$0]  (%p3635_p5), %s2781_s6, 64, %s2783_s0, %s2768_s10  }
0x1237   : > { %v2764_v37 = vpop.f32.mrf.mxu0 }
0x1238 PF: > { %s4544_s9 = sld [smem:[#allocation8_spill]] }
0x1239   : > { %s4545_s3 = sld [smem:[#allocation6_spill]] }
0x123e   : > { %p3165_p4 = scmp.ge.s32.totalorder %s4544_s9, 2 }
0x123f   : > { %s2794_s1 = sand.u32 1, %s4545_s3  }
0x1240   : > { %p3162_p7 = pnand %p3165_p4, %p3639_p6  ;;  %s2795_s29 = scalar_lea.sflag [#allocation4], %s2794_s1 }
0x1242   : > { %p3163_p8 = pneg %p3162_p7 }
0x1244   : > { %3448 = dma.done.wait (%p3163_p8), %s2795_s29, 64  }
0x1245   : > { %3450 = vsyncadd (%p3163_p8), %s2795_s29, 4294967232  ;;  %s4547_s30 = sld [smem:[#allocation9_spill]]  ;;  %s4550_s3 = smov %s3457_s28 }
0x1246   : > { %s4548_s11 = sld [smem:[#allocation7_spill]] }
0x1247   : > { %s4549_s29 = sld [smem:[#allocation10_spill]] }
0x124b   : > { %p32_p9 = scmp.ge.s32.totalorder %s4547_s30, 4  }
0x124c   : > { %s4551_s28 = smov %s4548_s11 }
0x124d   :  { %34 = sbr.rel (!%p32_p9) target bundleno = 18 (0x12), region = 155 }
0x1252   :  { %2801 = vsyncpa [#allocation4], 1 }
0x1253   :  { %2803 = vsyncpa [#allocation4 + $0x1], 1 }

</bundles_post_ra>
